<compile_context>
chip_gen: v5e
topology: v5e:2x2
jax: 0.10.0
libtpu: 0.0.40
codegen_flags: <defaults>
</compile_context>

<pallas_src>
import functools
import math

import jax
import jax.numpy as jnp
import numpy as np
from jax.experimental import pallas as pl
from jax.experimental.pallas import tpu as pltpu


# ---------------------------------------------------------------------------
# Kernel
# ---------------------------------------------------------------------------
def _window_attention_kernel(x_ref, wqkv_ref, bqkv_ref, bias_ref,
                             wproj_ref, bproj_ref, o_ref, *,
                             num_heads, tokens):
    """Fused window attention for one block of windows.

    x_ref:     (BW, N*C) or (BW, N, C)   input tokens (BW windows, N tokens)
    wqkv_ref:  (C, 3C)   QKV weight, stored (in, out); qk-scale pre-folded
    bqkv_ref:  (1, 3C)   QKV bias (scale pre-folded into the Q part)
    bias_ref:  (H, N, N) relative position bias (already gathered), f32
    wproj_ref: (C, C)    output projection weight, stored (in, out)
    bproj_ref: (1, C)    output projection bias
    o_ref:     same layout as x_ref
    """
    BW = x_ref.shape[0]
    N = tokens
    C = wqkv_ref.shape[0]
    H = num_heads
    Dh = C // H
    in_dtype = x_ref.dtype

    # Unpack the (lane-dense) slab into token rows: one relayout per grid step.
    x2d = x_ref[...].reshape(BW * N, C)

    # Fused QKV projection: single MXU matmul, f32 accumulation, bias in f32.
    qkv = jnp.dot(x2d, wqkv_ref[...], preferred_element_type=jnp.float32)
    qkv = (qkv + bqkv_ref[...].astype(jnp.float32)).astype(in_dtype)
    qkv = qkv.reshape(BW, N, 3 * C)          # torch feature order (3, H, Dh)

    # Per-head attention. The output projection is accumulated head-by-head so
    # no (BW, N, C) lane-concat of head outputs is ever materialized.
    y = jnp.zeros((BW * N, C), jnp.float32)
    for h in range(H):                        # static unroll, H is small
        q_h = qkv[:, :, h * Dh:(h + 1) * Dh]               # scale folded in W
        k_h = qkv[:, :, C + h * Dh:C + (h + 1) * Dh]
        v_h = qkv[:, :, 2 * C + h * Dh:2 * C + (h + 1) * Dh]

        # scores (BW, N, N): f32 MXU accumulation + relative position bias
        s = jnp.einsum('bnd,bmd->bnm', q_h, k_h,
                       preferred_element_type=jnp.float32)
        s = s + bias_ref[h].astype(jnp.float32)

        # numerically-stable row softmax; divide -> EUP reciprocal
        s_max = jnp.max(s, axis=-1, keepdims=True)
        p = jnp.exp(s - s_max)
        denom = jnp.sum(p, axis=-1, keepdims=True)
        p = (p * pl.reciprocal(denom, approx=True)).astype(in_dtype)

        # attn_drop(p=0.0) is identity. attention-weighted values:
        o_h = jnp.einsum('bnm,bmd->bnd', p, v_h,
                         preferred_element_type=jnp.float32)
        o_h = o_h.reshape(BW * N, Dh).astype(in_dtype)

        # head-wise projection accumulation (proj_drop p=0.0 is identity)
        y = y + jnp.dot(o_h, wproj_ref[h * Dh:(h + 1) * Dh, :],
                        preferred_element_type=jnp.float32)

    y = y + bproj_ref[...].astype(jnp.float32)             # (BW*N, C) + (1, C)
    o_ref[...] = y.reshape(o_ref.shape).astype(o_ref.dtype)


# ---------------------------------------------------------------------------
# Sizing heuristics
# ---------------------------------------------------------------------------
def _round_up(v, m):
    return ((v + m - 1) // m) * m


def _vmem_limit_bytes():
    """Generation-aware scoped-VMEM request (~25% headroom for Mosaic scratch)."""
    cap = 128 * 1024 * 1024
    try:
        info = pltpu.get_tpu_info()
        cap = int(getattr(info, "vmem_capacity_bytes", cap) or cap)
    except Exception:
        pass
    return max(16 * 1024 * 1024, (cap * 3) // 4)


def _per_window_vmem_bytes(N, C, H, itemsize):
    """Per-window VMEM footprint with (8,128) sublane/lane padding applied."""
    Dh = C // H
    f32 = 4
    lane = lambda v: _round_up(v, 128)
    subN = _round_up(N, 8 if itemsize >= 4 else 16)
    b = 0
    b += 2 * 2 * lane(N * C) * itemsize            # x/out tiles, double-buffered
    b += subN * lane(3 * C) * (f32 + itemsize)     # qkv (f32 acc + cast)
    b += H * 3 * subN * lane(Dh) * itemsize        # q/k/v per-head slices
    b += H * 2 * subN * lane(N) * f32              # scores + probs
    b += H * subN * lane(Dh) * (f32 + itemsize)    # per-head attention output
    b += subN * lane(C) * f32                      # projection accumulator
    return b


def _choose_block_windows(B_, N, C, H, itemsize, vmem_budget):
    per_win = max(1, _per_window_vmem_bytes(N, C, H, itemsize))
    bw = max(1, vmem_budget // per_win)
    bw = min(bw, max(1, 4096 // max(N, 1)), B_)    # ~4K token rows per step
    if B_ >= 16:
        # keep >= 2 grid steps so the "parallel" axis can split across the two
        # TensorCores on v7x (neutral on v5e / v6e single-TC chips)
        bw = min(bw, (B_ + 1) // 2)
    if bw >= B_:
        return B_
    bw = max(8, (bw // 8) * 8)                     # sublane-aligned non-full blocks
    if bw >= B_:
        return B_
    # Prefer a divisor of B_ (no padded garbage windows), and an even grid
    # length (v7x core balance), if it keeps at least half the tile size.
    divs = [d for d in range(8, bw + 1, 8) if B_ % d == 0]
    if divs:
        even = [d for d in divs if (B_ // d) % 2 == 0]
        pick = max(even) if even else max(divs)
        if 2 * pick >= bw:
            return pick
    # Otherwise rebalance so the padded tail is as small as possible.
    n_blocks = -(-B_ // bw)
    return max(8, min(bw, _round_up(-(-B_ // n_blocks), 8)))


# ---------------------------------------------------------------------------
# pallas_call builder + wrapper
# ---------------------------------------------------------------------------
def _build_call(Bp, bw, N, C, num_heads, dtype, lane_dense, vmem_limit, cost):
    n_blocks = Bp // bw
    kernel = functools.partial(_window_attention_kernel,
                               num_heads=num_heads, tokens=N)
    if lane_dense:
        x_spec = pl.BlockSpec((bw, N * C), lambda i: (i, 0))
        out_spec = pl.BlockSpec((bw, N * C), lambda i: (i, 0))
        out_shape = jax.ShapeDtypeStruct((Bp, N * C), dtype)
    else:
        x_spec = pl.BlockSpec((bw, N, C), lambda i: (i, 0, 0))
        out_spec = pl.BlockSpec((bw, N, C), lambda i: (i, 0, 0))
        out_shape = jax.ShapeDtypeStruct((Bp, N, C), dtype)
    return pl.pallas_call(
        kernel,
        out_shape=out_shape,
        grid_spec=pltpu.PrefetchScalarGridSpec(
            num_scalar_prefetch=0,
            grid=(n_blocks,),
            in_specs=[
                x_spec,                                                # x tile
                pl.BlockSpec((C, 3 * C), lambda i: (0, 0)),            # W_qkv
                pl.BlockSpec((1, 3 * C), lambda i: (0, 0)),            # b_qkv
                pl.BlockSpec((num_heads, N, N), lambda i: (0, 0, 0)),  # rel bias
                pl.BlockSpec((C, C), lambda i: (0, 0)),                # W_proj
                pl.BlockSpec((1, C), lambda i: (0, 0)),                # b_proj
            ],
            out_specs=out_spec,
        ),
        compiler_params=pltpu.CompilerParams(
            dimension_semantics=("parallel",),
            vmem_limit_bytes=int(vmem_limit),
        ),
        cost_estimate=cost,
    )


def window_attention_pallas(x, wqkv, bqkv, rel_bias, wproj, bproj, *,
                            num_heads, scale, block_windows=None,
                            lane_dense=True):
    """x: (B_, N, C). Weights stored (in, out). rel_bias: (H, N, N)."""
    x = jnp.asarray(x)
    wqkv = jnp.asarray(wqkv)
    bqkv = jnp.asarray(bqkv)
    wproj = jnp.asarray(wproj)
    bproj = jnp.asarray(bproj)

    B_, N, C = x.shape
    H = num_heads

    # Fold the qk scale into the Q columns of the QKV projection (a parameter
    # transform -> removes the per-step activation multiply in the kernel).
    scale = float(scale)
    wqkv = wqkv.at[:, :C].multiply(scale)
    bqkv = bqkv.at[:C].multiply(scale)
    bqkv2 = bqkv.reshape(1, 3 * C)
    bproj2 = bproj.reshape(1, C)
    rel_bias = jnp.asarray(rel_bias).astype(jnp.float32)

    vmem_limit = _vmem_limit_bytes()
    if block_windows is None:
        block_windows = _choose_block_windows(B_, N, C, H, x.dtype.itemsize,
                                              vmem_limit // 2)
    bw = int(max(1, min(block_windows, B_)))
    n_blocks = -(-B_ // bw)
    Bp = n_blocks * bw

    itemsize = x.dtype.itemsize
    cost = pl.CostEstimate(
        flops=int(2 * B_ * N * C * (3 * C) + 4 * B_ * N * N * C
                  + 2 * B_ * N * C * C),
        transcendentals=int(B_ * H * N * N + B_ * H * N),
        bytes_accessed=int(2 * B_ * N * C * itemsize
                           + (C * 3 * C + 3 * C + C * C + C) * wqkv.dtype.itemsize
                           + H * N * N * 4),
    )

    def run(dense):
        xi = x.reshape(B_, N * C) if dense else x
        if Bp != B_:
            pad = [(0, Bp - B_)] + [(0, 0)] * (xi.ndim - 1)
            xi = jnp.pad(xi, pad)
        call = _build_call(Bp, bw, N, C, H, x.dtype, dense, vmem_limit, cost)
        out = call(xi, wqkv, bqkv2, rel_bias, wproj, bproj2)[:B_]
        return out.reshape(B_, N, C) if dense else out

    if not lane_dense:
        return run(False)
    try:
        out = run(True)
        jax.block_until_ready(out)   # surface any deferred error inside the try
        return out
    except Exception:
        # TODO(synk): lane-changing reshape rejected by this Mosaic build;
        # fall back to the 3-D (bw, N, C) tiling (correct, just lane-padded).
        return run(False)


# ---------------------------------------------------------------------------
# Module plumbing (relative position index, forward, pure-JAX reference)
# ---------------------------------------------------------------------------
def make_relative_position_index(window_size):
    """Same construction as the PyTorch module's registered buffer."""
    Wh, Ww = window_size
    coords_h = np.arange(Wh)
    coords_w = np.arange(Ww)
    coords = np.stack(np.meshgrid(coords_h, coords_w, indexing="ij"))  # (2,Wh,Ww)
    coords_flatten = coords.reshape(2, -1)                             # (2, N)
    rel = coords_flatten[:, :, None] - coords_flatten[:, None, :]      # (2, N, N)
    rel = rel.transpose(1, 2, 0).copy()                                # (N, N, 2)
    rel[:, :, 0] += Wh - 1
    rel[:, :, 1] += Ww - 1
    rel[:, :, 0] *= 2 * Ww - 1
    return rel.sum(-1).astype(np.int32)                                # (N, N)


def window_attention_forward(x, wqkv, bqkv, rel_pos_table, rel_pos_index,
                             wproj, bproj, *, num_heads, scale, mask=None):
    """Forward matching WindowAttention.forward with mask=None."""
    # TODO(synk): shifted-window mask (mask is not None) is not implemented.
    assert mask is None, "mask != None path not implemented"
    B_, N, C = x.shape
    # Gather the relative position bias (parameter-only transform) in plain JAX.
    rel_bias = jnp.asarray(rel_pos_table)[jnp.asarray(rel_pos_index).reshape(-1)]
    rel_bias = rel_bias.reshape(N, N, num_heads).transpose(2, 0, 1)    # (H, N, N)
    return window_attention_pallas(x, wqkv, bqkv, rel_bias, wproj, bproj,
                                   num_heads=num_heads, scale=scale)


def window_attention_ref(x, wqkv, bqkv, rel_pos_table, rel_pos_index,
                         wproj, bproj, *, num_heads, scale):
    """Pure-JAX reference mirroring the PyTorch forward (mask=None)."""
    B_, N, C = x.shape
    Dh = C // num_heads
    qkv = (x @ wqkv + bqkv).reshape(B_, N, 3, num_heads, Dh)
    qkv = qkv.transpose(2, 0, 3, 1, 4)                                 # (3,B_,H,N,Dh)
    q, k, v = qkv[0], qkv[1], qkv[2]
    q = q * scale
    attn = jnp.einsum('bhnd,bhmd->bhnm', q, k)
    rel_bias = rel_pos_table[jnp.asarray(rel_pos_index).reshape(-1)]
    rel_bias = rel_bias.reshape(N, N, num_heads).transpose(2, 0, 1)
    attn = attn + rel_bias[None]
    attn = jax.nn.softmax(attn, axis=-1)
    out = jnp.einsum('bhnm,bhmd->bhnd', attn, v)
    out = out.transpose(0, 2, 1, 3).reshape(B_, N, C)
    return out @ wproj + bproj


if __name__ == "__main__":
    # Small shapes consistent with the module: dim=32, window 4x4 (N=16),
    # 4 heads, B_ = batch * num_windows = 8.
    dim = 32
    window_size = (4, 4)
    num_heads = 4
    B_ = 8
    N = window_size[0] * window_size[1]
    head_dim = dim // num_heads
    scale = head_dim ** (-0.5)

    key = jax.random.PRNGKey(0)
    kx, kq, kqb, kp, kpb, kt = jax.random.split(key, 6)

    x = jax.random.normal(kx, (B_, N, dim), dtype=jnp.float32)

    # Deterministic parameter init (uniform, like nn.Linear's default scheme).
    # Weights stored (in, out) so the kernel computes x @ W (torch stores (out, in)).
    lim = 1.0 / math.sqrt(dim)
    wqkv = jax.random.uniform(kq, (dim, 3 * dim), minval=-lim, maxval=lim,
                              dtype=jnp.float32)
    bqkv = jax.random.uniform(kqb, (3 * dim,), minval=-lim, maxval=lim,
                              dtype=jnp.float32)
    wproj = jax.random.uniform(kp, (dim, dim), minval=-lim, maxval=lim,
                               dtype=jnp.float32)
    bproj = jax.random.uniform(kpb, (dim,), minval=-lim, maxval=lim,
                               dtype=jnp.float32)
    # relative_position_bias_table ~ trunc_normal(std=0.02) -> plain normal here.
    table_rows = (2 * window_size[0] - 1) * (2 * window_size[1] - 1)
    rel_pos_table = 0.02 * jax.random.normal(kt, (table_rows, num_heads),
                                             dtype=jnp.float32)
    rel_pos_index = make_relative_position_index(window_size)

    y = window_attention_forward(x, wqkv, bqkv, rel_pos_table, rel_pos_index,
                                 wproj, bproj, num_heads=num_heads, scale=scale)
    y = jax.block_until_ready(y)

    y_ref = window_attention_ref(x, wqkv, bqkv, rel_pos_table, rel_pos_index,
                                 wproj, bproj, num_heads=num_heads, scale=scale)

    assert y.shape == (B_, N, dim)
    # approx=True reciprocal in the softmax -> slightly looser tolerance.
    assert jnp.allclose(y, y_ref, atol=5e-3, rtol=5e-3), "mismatch vs reference"

    print("KERNEL_OK")
</pallas_src>

<mosaic_0001>
module attributes {stable_mosaic.version = 11 : i64} {
  func.func @_window_attention_kernel(%arg0: i32, %arg1: memref<8x512xf32, #tpu.memory_space<vmem>>, %arg2: memref<32x96xf32, #tpu.memory_space<vmem>>, %arg3: memref<1x96xf32, #tpu.memory_space<vmem>>, %arg4: memref<4x16x16xf32, #tpu.memory_space<vmem>>, %arg5: memref<32x32xf32, #tpu.memory_space<vmem>>, %arg6: memref<1x32xf32, #tpu.memory_space<vmem>>, %arg7: memref<8x512xf32, #tpu.memory_space<vmem>>) attributes {dimension_semantics = [#tpu.dimension_semantics<parallel>], iteration_bounds = array<i64: 1>, scalar_prefetch = 0 : i64, scratch_operands = 0 : i64, tpu.core_type = #tpu.core_type<tc>, window_params = [{transform_indices = @transform_0, window_bounds = array<i64: 8, 512>}, {pipeline_mode = #tpu.pipeline_mode<synchronous>, transform_indices = @transform_1, window_bounds = array<i64: 32, 96>}, {pipeline_mode = #tpu.pipeline_mode<synchronous>, transform_indices = @transform_2, window_bounds = array<i64: 1, 96>}, {pipeline_mode = #tpu.pipeline_mode<synchronous>, transform_indices = @transform_3, window_bounds = array<i64: 4, 16, 16>}, {pipeline_mode = #tpu.pipeline_mode<synchronous>, transform_indices = @transform_4, window_bounds = array<i64: 32, 32>}, {pipeline_mode = #tpu.pipeline_mode<synchronous>, transform_indices = @transform_5, window_bounds = array<i64: 1, 32>}, {transform_indices = @transform_6, window_bounds = array<i64: 8, 512>}]} {
    %c0 = arith.constant 0 : index
    %c0_0 = arith.constant 0 : index
    %0 = vector.load %arg1[%c0, %c0_0] : memref<8x512xf32, #tpu.memory_space<vmem>>, vector<8x512xf32>
    %1 = vector.shape_cast %0 : vector<8x512xf32> to vector<128x32xf32>
    %c0_1 = arith.constant 0 : index
    %c0_2 = arith.constant 0 : index
    %2 = vector.load %arg2[%c0_1, %c0_2] : memref<32x96xf32, #tpu.memory_space<vmem>>, vector<32x96xf32>
    %cst = arith.constant dense<0.000000e+00> : vector<128x96xf32>
    %3 = tpu.matmul %1, %2, %cst {dimension_numbers = #tpu.dot_dimension_numbers<[1], [0], [0], [1], [0, 0, 1, 1], [], []>} : vector<128x32xf32>, vector<32x96xf32>, vector<128x96xf32> -> vector<128x96xf32>
    %c0_3 = arith.constant 0 : index
    %c0_4 = arith.constant 0 : index
    %4 = vector.load %arg3[%c0_3, %c0_4] : memref<1x96xf32, #tpu.memory_space<vmem>>, vector<1x96xf32>
    %5 = vector.broadcast %4 : vector<1x96xf32> to vector<128x96xf32>
    %6 = arith.addf %3, %5 : vector<128x96xf32>
    %7 = vector.shape_cast %6 : vector<128x96xf32> to vector<8x16x96xf32>
    %cst_5 = arith.constant 0.000000e+00 : f32
    %8 = vector.broadcast %cst_5 : f32 to vector<128x32xf32>
    %9 = vector.extract_strided_slice %7 {offsets = [0, 0, 0], sizes = [8, 16, 8], strides = [1, 1, 1]} : vector<8x16x96xf32> to vector<8x16x8xf32>
    %10 = vector.extract_strided_slice %7 {offsets = [0, 0, 32], sizes = [8, 16, 8], strides = [1, 1, 1]} : vector<8x16x96xf32> to vector<8x16x8xf32>
    %11 = vector.extract_strided_slice %7 {offsets = [0, 0, 64], sizes = [8, 16, 8], strides = [1, 1, 1]} : vector<8x16x96xf32> to vector<8x16x8xf32>
    "tpu.trace_start"() <{level = 10 : i32, message = "bnd,bmd->bnm"}> : () -> ()
    %cst_6 = arith.constant dense<0.000000e+00> : vector<8x16x16xf32>
    %12 = tpu.matmul %9, %10, %cst_6 {dimension_numbers = #tpu.dot_dimension_numbers<[2], [2], [1], [1], [0, 0, 0, 1, 1, 1], [0], [0]>} : vector<8x16x8xf32>, vector<8x16x8xf32>, vector<8x16x16xf32> -> vector<8x16x16xf32>
    "tpu.trace_stop"() : () -> ()
    %c0_7 = arith.constant 0 : index
    %c0_8 = arith.constant 0 : index
    %c0_9 = arith.constant 0 : index
    %13 = vector.load %arg4[%c0_7, %c0_8, %c0_9] : memref<4x16x16xf32, #tpu.memory_space<vmem>>, vector<1x16x16xf32>
    %14 = vector.shape_cast %13 : vector<1x16x16xf32> to vector<16x16xf32>
    %15 = vector.shape_cast %14 : vector<16x16xf32> to vector<1x16x16xf32>
    %16 = vector.broadcast %15 : vector<1x16x16xf32> to vector<8x16x16xf32>
    %17 = arith.addf %12, %16 : vector<8x16x16xf32>
    %cst_10 = arith.constant dense<0xFF800000> : vector<8x16xf32>
    %18 = vector.multi_reduction <maximumf>, %17, %cst_10 [2] : vector<8x16x16xf32> to vector<8x16xf32>
    %19 = vector.shape_cast %18 : vector<8x16xf32> to vector<8x16x1xf32>
    %20 = vector.broadcast %19 : vector<8x16x1xf32> to vector<8x16x16xf32>
    %21 = arith.subf %17, %20 : vector<8x16x16xf32>
    %22 = math.exp %21 : vector<8x16x16xf32>
    %cst_11 = arith.constant dense<0.000000e+00> : vector<8x16xf32>
    %23 = vector.multi_reduction <add>, %22, %cst_11 [2] : vector<8x16x16xf32> to vector<8x16xf32>
    %24 = vector.shape_cast %23 : vector<8x16xf32> to vector<8x16x1xf32>
    %25 = tpu.reciprocal %24 {approx = true} : vector<8x16x1xf32> -> vector<8x16x1xf32>
    %26 = vector.broadcast %25 : vector<8x16x1xf32> to vector<8x16x16xf32>
    %27 = arith.mulf %22, %26 : vector<8x16x16xf32>
    "tpu.trace_start"() <{level = 10 : i32, message = "bnm,bmd->bnd"}> : () -> ()
    %cst_12 = arith.constant dense<0.000000e+00> : vector<8x16x8xf32>
    %28 = tpu.matmul %27, %11, %cst_12 {dimension_numbers = #tpu.dot_dimension_numbers<[2], [1], [1], [2], [0, 0, 0, 1, 1, 2], [0], [0]>} : vector<8x16x16xf32>, vector<8x16x8xf32>, vector<8x16x8xf32> -> vector<8x16x8xf32>
    "tpu.trace_stop"() : () -> ()
    %29 = vector.shape_cast %28 : vector<8x16x8xf32> to vector<128x8xf32>
    %c0_13 = arith.constant 0 : index
    %c0_14 = arith.constant 0 : index
    %30 = vector.load %arg5[%c0_13, %c0_14] : memref<32x32xf32, #tpu.memory_space<vmem>>, vector<8x32xf32>
    %cst_15 = arith.constant dense<0.000000e+00> : vector<128x32xf32>
    %31 = tpu.matmul %29, %30, %cst_15 {dimension_numbers = #tpu.dot_dimension_numbers<[1], [0], [0], [1], [0, 0, 1, 1], [], []>} : vector<128x8xf32>, vector<8x32xf32>, vector<128x32xf32> -> vector<128x32xf32>
    %32 = arith.addf %8, %31 : vector<128x32xf32>
    %33 = vector.extract_strided_slice %7 {offsets = [0, 0, 8], sizes = [8, 16, 8], strides = [1, 1, 1]} : vector<8x16x96xf32> to vector<8x16x8xf32>
    %34 = vector.extract_strided_slice %7 {offsets = [0, 0, 40], sizes = [8, 16, 8], strides = [1, 1, 1]} : vector<8x16x96xf32> to vector<8x16x8xf32>
    %35 = vector.extract_strided_slice %7 {offsets = [0, 0, 72], sizes = [8, 16, 8], strides = [1, 1, 1]} : vector<8x16x96xf32> to vector<8x16x8xf32>
    "tpu.trace_start"() <{level = 10 : i32, message = "bnd,bmd->bnm"}> : () -> ()
    %cst_16 = arith.constant dense<0.000000e+00> : vector<8x16x16xf32>
    %36 = tpu.matmul %33, %34, %cst_16 {dimension_numbers = #tpu.dot_dimension_numbers<[2], [2], [1], [1], [0, 0, 0, 1, 1, 1], [0], [0]>} : vector<8x16x8xf32>, vector<8x16x8xf32>, vector<8x16x16xf32> -> vector<8x16x16xf32>
    "tpu.trace_stop"() : () -> ()
    %c1 = arith.constant 1 : index
    %c0_17 = arith.constant 0 : index
    %c0_18 = arith.constant 0 : index
    %37 = vector.load %arg4[%c1, %c0_17, %c0_18] : memref<4x16x16xf32, #tpu.memory_space<vmem>>, vector<1x16x16xf32>
    %38 = vector.shape_cast %37 : vector<1x16x16xf32> to vector<16x16xf32>
    %39 = vector.shape_cast %38 : vector<16x16xf32> to vector<1x16x16xf32>
    %40 = vector.broadcast %39 : vector<1x16x16xf32> to vector<8x16x16xf32>
    %41 = arith.addf %36, %40 : vector<8x16x16xf32>
    %cst_19 = arith.constant dense<0xFF800000> : vector<8x16xf32>
    %42 = vector.multi_reduction <maximumf>, %41, %cst_19 [2] : vector<8x16x16xf32> to vector<8x16xf32>
    %43 = vector.shape_cast %42 : vector<8x16xf32> to vector<8x16x1xf32>
    %44 = vector.broadcast %43 : vector<8x16x1xf32> to vector<8x16x16xf32>
    %45 = arith.subf %41, %44 : vector<8x16x16xf32>
    %46 = math.exp %45 : vector<8x16x16xf32>
    %cst_20 = arith.constant dense<0.000000e+00> : vector<8x16xf32>
    %47 = vector.multi_reduction <add>, %46, %cst_20 [2] : vector<8x16x16xf32> to vector<8x16xf32>
    %48 = vector.shape_cast %47 : vector<8x16xf32> to vector<8x16x1xf32>
    %49 = tpu.reciprocal %48 {approx = true} : vector<8x16x1xf32> -> vector<8x16x1xf32>
    %50 = vector.broadcast %49 : vector<8x16x1xf32> to vector<8x16x16xf32>
    %51 = arith.mulf %46, %50 : vector<8x16x16xf32>
    "tpu.trace_start"() <{level = 10 : i32, message = "bnm,bmd->bnd"}> : () -> ()
    %cst_21 = arith.constant dense<0.000000e+00> : vector<8x16x8xf32>
    %52 = tpu.matmul %51, %35, %cst_21 {dimension_numbers = #tpu.dot_dimension_numbers<[2], [1], [1], [2], [0, 0, 0, 1, 1, 2], [0], [0]>} : vector<8x16x16xf32>, vector<8x16x8xf32>, vector<8x16x8xf32> -> vector<8x16x8xf32>
    "tpu.trace_stop"() : () -> ()
    %53 = vector.shape_cast %52 : vector<8x16x8xf32> to vector<128x8xf32>
    %c8 = arith.constant 8 : index
    %c0_22 = arith.constant 0 : index
    %54 = vector.load %arg5[%c8, %c0_22] : memref<32x32xf32, #tpu.memory_space<vmem>>, vector<8x32xf32>
    %cst_23 = arith.constant dense<0.000000e+00> : vector<128x32xf32>
    %55 = tpu.matmul %53, %54, %cst_23 {dimension_numbers = #tpu.dot_dimension_numbers<[1], [0], [0], [1], [0, 0, 1, 1], [], []>} : vector<128x8xf32>, vector<8x32xf32>, vector<128x32xf32> -> vector<128x32xf32>
    %56 = arith.addf %32, %55 : vector<128x32xf32>
    %57 = vector.extract_strided_slice %7 {offsets = [0, 0, 16], sizes = [8, 16, 8], strides = [1, 1, 1]} : vector<8x16x96xf32> to vector<8x16x8xf32>
    %58 = vector.extract_strided_slice %7 {offsets = [0, 0, 48], sizes = [8, 16, 8], strides = [1, 1, 1]} : vector<8x16x96xf32> to vector<8x16x8xf32>
    %59 = vector.extract_strided_slice %7 {offsets = [0, 0, 80], sizes = [8, 16, 8], strides = [1, 1, 1]} : vector<8x16x96xf32> to vector<8x16x8xf32>
    "tpu.trace_start"() <{level = 10 : i32, message = "bnd,bmd->bnm"}> : () -> ()
    %cst_24 = arith.constant dense<0.000000e+00> : vector<8x16x16xf32>
    %60 = tpu.matmul %57, %58, %cst_24 {dimension_numbers = #tpu.dot_dimension_numbers<[2], [2], [1], [1], [0, 0, 0, 1, 1, 1], [0], [0]>} : vector<8x16x8xf32>, vector<8x16x8xf32>, vector<8x16x16xf32> -> vector<8x16x16xf32>
    "tpu.trace_stop"() : () -> ()
    %c2 = arith.constant 2 : index
    %c0_25 = arith.constant 0 : index
    %c0_26 = arith.constant 0 : index
    %61 = vector.load %arg4[%c2, %c0_25, %c0_26] : memref<4x16x16xf32, #tpu.memory_space<vmem>>, vector<1x16x16xf32>
    %62 = vector.shape_cast %61 : vector<1x16x16xf32> to vector<16x16xf32>
    %63 = vector.shape_cast %62 : vector<16x16xf32> to vector<1x16x16xf32>
    %64 = vector.broadcast %63 : vector<1x16x16xf32> to vector<8x16x16xf32>
    %65 = arith.addf %60, %64 : vector<8x16x16xf32>
    %cst_27 = arith.constant dense<0xFF800000> : vector<8x16xf32>
    %66 = vector.multi_reduction <maximumf>, %65, %cst_27 [2] : vector<8x16x16xf32> to vector<8x16xf32>
    %67 = vector.shape_cast %66 : vector<8x16xf32> to vector<8x16x1xf32>
    %68 = vector.broadcast %67 : vector<8x16x1xf32> to vector<8x16x16xf32>
    %69 = arith.subf %65, %68 : vector<8x16x16xf32>
    %70 = math.exp %69 : vector<8x16x16xf32>
    %cst_28 = arith.constant dense<0.000000e+00> : vector<8x16xf32>
    %71 = vector.multi_reduction <add>, %70, %cst_28 [2] : vector<8x16x16xf32> to vector<8x16xf32>
    %72 = vector.shape_cast %71 : vector<8x16xf32> to vector<8x16x1xf32>
    %73 = tpu.reciprocal %72 {approx = true} : vector<8x16x1xf32> -> vector<8x16x1xf32>
    %74 = vector.broadcast %73 : vector<8x16x1xf32> to vector<8x16x16xf32>
    %75 = arith.mulf %70, %74 : vector<8x16x16xf32>
    "tpu.trace_start"() <{level = 10 : i32, message = "bnm,bmd->bnd"}> : () -> ()
    %cst_29 = arith.constant dense<0.000000e+00> : vector<8x16x8xf32>
    %76 = tpu.matmul %75, %59, %cst_29 {dimension_numbers = #tpu.dot_dimension_numbers<[2], [1], [1], [2], [0, 0, 0, 1, 1, 2], [0], [0]>} : vector<8x16x16xf32>, vector<8x16x8xf32>, vector<8x16x8xf32> -> vector<8x16x8xf32>
    "tpu.trace_stop"() : () -> ()
    %77 = vector.shape_cast %76 : vector<8x16x8xf32> to vector<128x8xf32>
    %c16 = arith.constant 16 : index
    %c0_30 = arith.constant 0 : index
    %78 = vector.load %arg5[%c16, %c0_30] : memref<32x32xf32, #tpu.memory_space<vmem>>, vector<8x32xf32>
    %cst_31 = arith.constant dense<0.000000e+00> : vector<128x32xf32>
    %79 = tpu.matmul %77, %78, %cst_31 {dimension_numbers = #tpu.dot_dimension_numbers<[1], [0], [0], [1], [0, 0, 1, 1], [], []>} : vector<128x8xf32>, vector<8x32xf32>, vector<128x32xf32> -> vector<128x32xf32>
    %80 = arith.addf %56, %79 : vector<128x32xf32>
    %81 = vector.extract_strided_slice %7 {offsets = [0, 0, 24], sizes = [8, 16, 8], strides = [1, 1, 1]} : vector<8x16x96xf32> to vector<8x16x8xf32>
    %82 = vector.extract_strided_slice %7 {offsets = [0, 0, 56], sizes = [8, 16, 8], strides = [1, 1, 1]} : vector<8x16x96xf32> to vector<8x16x8xf32>
    %83 = vector.extract_strided_slice %7 {offsets = [0, 0, 88], sizes = [8, 16, 8], strides = [1, 1, 1]} : vector<8x16x96xf32> to vector<8x16x8xf32>
    "tpu.trace_start"() <{level = 10 : i32, message = "bnd,bmd->bnm"}> : () -> ()
    %cst_32 = arith.constant dense<0.000000e+00> : vector<8x16x16xf32>
    %84 = tpu.matmul %81, %82, %cst_32 {dimension_numbers = #tpu.dot_dimension_numbers<[2], [2], [1], [1], [0, 0, 0, 1, 1, 1], [0], [0]>} : vector<8x16x8xf32>, vector<8x16x8xf32>, vector<8x16x16xf32> -> vector<8x16x16xf32>
    "tpu.trace_stop"() : () -> ()
    %c3 = arith.constant 3 : index
    %c0_33 = arith.constant 0 : index
    %c0_34 = arith.constant 0 : index
    %85 = vector.load %arg4[%c3, %c0_33, %c0_34] : memref<4x16x16xf32, #tpu.memory_space<vmem>>, vector<1x16x16xf32>
    %86 = vector.shape_cast %85 : vector<1x16x16xf32> to vector<16x16xf32>
    %87 = vector.shape_cast %86 : vector<16x16xf32> to vector<1x16x16xf32>
    %88 = vector.broadcast %87 : vector<1x16x16xf32> to vector<8x16x16xf32>
    %89 = arith.addf %84, %88 : vector<8x16x16xf32>
    %cst_35 = arith.constant dense<0xFF800000> : vector<8x16xf32>
    %90 = vector.multi_reduction <maximumf>, %89, %cst_35 [2] : vector<8x16x16xf32> to vector<8x16xf32>
    %91 = vector.shape_cast %90 : vector<8x16xf32> to vector<8x16x1xf32>
    %92 = vector.broadcast %91 : vector<8x16x1xf32> to vector<8x16x16xf32>
    %93 = arith.subf %89, %92 : vector<8x16x16xf32>
    %94 = math.exp %93 : vector<8x16x16xf32>
    %cst_36 = arith.constant dense<0.000000e+00> : vector<8x16xf32>
    %95 = vector.multi_reduction <add>, %94, %cst_36 [2] : vector<8x16x16xf32> to vector<8x16xf32>
    %96 = vector.shape_cast %95 : vector<8x16xf32> to vector<8x16x1xf32>
    %97 = tpu.reciprocal %96 {approx = true} : vector<8x16x1xf32> -> vector<8x16x1xf32>
    %98 = vector.broadcast %97 : vector<8x16x1xf32> to vector<8x16x16xf32>
    %99 = arith.mulf %94, %98 : vector<8x16x16xf32>
    "tpu.trace_start"() <{level = 10 : i32, message = "bnm,bmd->bnd"}> : () -> ()
    %cst_37 = arith.constant dense<0.000000e+00> : vector<8x16x8xf32>
    %100 = tpu.matmul %99, %83, %cst_37 {dimension_numbers = #tpu.dot_dimension_numbers<[2], [1], [1], [2], [0, 0, 0, 1, 1, 2], [0], [0]>} : vector<8x16x16xf32>, vector<8x16x8xf32>, vector<8x16x8xf32> -> vector<8x16x8xf32>
    "tpu.trace_stop"() : () -> ()
    %101 = vector.shape_cast %100 : vector<8x16x8xf32> to vector<128x8xf32>
    %c24 = arith.constant 24 : index
    %c0_38 = arith.constant 0 : index
    %102 = vector.load %arg5[%c24, %c0_38] : memref<32x32xf32, #tpu.memory_space<vmem>>, vector<8x32xf32>
    %cst_39 = arith.constant dense<0.000000e+00> : vector<128x32xf32>
    %103 = tpu.matmul %101, %102, %cst_39 {dimension_numbers = #tpu.dot_dimension_numbers<[1], [0], [0], [1], [0, 0, 1, 1], [], []>} : vector<128x8xf32>, vector<8x32xf32>, vector<128x32xf32> -> vector<128x32xf32>
    %104 = arith.addf %80, %103 : vector<128x32xf32>
    %c0_40 = arith.constant 0 : index
    %c0_41 = arith.constant 0 : index
    %105 = vector.load %arg6[%c0_40, %c0_41] : memref<1x32xf32, #tpu.memory_space<vmem>>, vector<1x32xf32>
    %106 = vector.broadcast %105 : vector<1x32xf32> to vector<128x32xf32>
    %107 = arith.addf %104, %106 : vector<128x32xf32>
    %108 = vector.shape_cast %107 : vector<128x32xf32> to vector<8x512xf32>
    %c0_42 = arith.constant 0 : index
    %c0_43 = arith.constant 0 : index
    %109 = vector.load %arg7[%c0_42, %c0_43] : memref<8x512xf32, #tpu.memory_space<vmem>>, vector<8x512xf32>
    tpu.vector_store %arg7[%c0_42, %c0_43], %108 {strides = array<i32>} : memref<8x512xf32, #tpu.memory_space<vmem>>, vector<8x512xf32>,
    return
  }
  func.func @transform_0(%arg0: i32) -> (i32, i32) {
    %c0_i32 = arith.constant 0 : i32
    %c0_i32_0 = arith.constant 0 : i32
    return %arg0, %c0_i32 : i32, i32
  }
  func.func @transform_1(%arg0: i32) -> (i32, i32) {
    %c0_i32 = arith.constant 0 : i32
    %c0_i32_0 = arith.constant 0 : i32
    %c0_i32_1 = arith.constant 0 : i32
    return %c0_i32, %c0_i32_0 : i32, i32
  }
  func.func @transform_2(%arg0: i32) -> (i32, i32) {
    %c0_i32 = arith.constant 0 : i32
    %c0_i32_0 = arith.constant 0 : i32
    %c0_i32_1 = arith.constant 0 : i32
    return %c0_i32, %c0_i32_0 : i32, i32
  }
  func.func @transform_3(%arg0: i32) -> (i32, i32, i32) {
    %c0_i32 = arith.constant 0 : i32
    %c0_i32_0 = arith.constant 0 : i32
    %c0_i32_1 = arith.constant 0 : i32
    %c0_i32_2 = arith.constant 0 : i32
    return %c0_i32, %c0_i32_0, %c0_i32_1 : i32, i32, i32
  }
  func.func @transform_4(%arg0: i32) -> (i32, i32) {
    %c0_i32 = arith.constant 0 : i32
    %c0_i32_0 = arith.constant 0 : i32
    %c0_i32_1 = arith.constant 0 : i32
    return %c0_i32, %c0_i32_0 : i32, i32
  }
  func.func @transform_5(%arg0: i32) -> (i32, i32) {
    %c0_i32 = arith.constant 0 : i32
    %c0_i32_0 = arith.constant 0 : i32
    %c0_i32_1 = arith.constant 0 : i32
    return %c0_i32, %c0_i32_0 : i32, i32
  }
  func.func @transform_6(%arg0: i32) -> (i32, i32) {
    %c0_i32 = arith.constant 0 : i32
    %c0_i32_0 = arith.constant 0 : i32
    return %arg0, %c0_i32 : i32, i32
  }
}

module attributes {stable_mosaic.version = 11 : i64} {
  func.func @_window_attention_kernel(%arg0: i32, %arg1: memref<8x16x32xf32, #tpu.memory_space<vmem>>, %arg2: memref<32x96xf32, #tpu.memory_space<vmem>>, %arg3: memref<1x96xf32, #tpu.memory_space<vmem>>, %arg4: memref<4x16x16xf32, #tpu.memory_space<vmem>>, %arg5: memref<32x32xf32, #tpu.memory_space<vmem>>, %arg6: memref<1x32xf32, #tpu.memory_space<vmem>>, %arg7: memref<8x16x32xf32, #tpu.memory_space<vmem>>) attributes {dimension_semantics = [#tpu.dimension_semantics<parallel>], iteration_bounds = array<i64: 1>, scalar_prefetch = 0 : i64, scratch_operands = 0 : i64, tpu.core_type = #tpu.core_type<tc>, window_params = [{transform_indices = @transform_0, window_bounds = array<i64: 8, 16, 32>}, {pipeline_mode = #tpu.pipeline_mode<synchronous>, transform_indices = @transform_1, window_bounds = array<i64: 32, 96>}, {pipeline_mode = #tpu.pipeline_mode<synchronous>, transform_indices = @transform_2, window_bounds = array<i64: 1, 96>}, {pipeline_mode = #tpu.pipeline_mode<synchronous>, transform_indices = @transform_3, window_bounds = array<i64: 4, 16, 16>}, {pipeline_mode = #tpu.pipeline_mode<synchronous>, transform_indices = @transform_4, window_bounds = array<i64: 32, 32>}, {pipeline_mode = #tpu.pipeline_mode<synchronous>, transform_indices = @transform_5, window_bounds = array<i64: 1, 32>}, {transform_indices = @transform_6, window_bounds = array<i64: 8, 16, 32>}]} {
    %c0 = arith.constant 0 : index
    %c0_0 = arith.constant 0 : index
    %c0_1 = arith.constant 0 : index
    %0 = vector.load %arg1[%c0, %c0_0, %c0_1] : memref<8x16x32xf32, #tpu.memory_space<vmem>>, vector<8x16x32xf32>
    %1 = vector.shape_cast %0 : vector<8x16x32xf32> to vector<128x32xf32>
    %c0_2 = arith.constant 0 : index
    %c0_3 = arith.constant 0 : index
    %2 = vector.load %arg2[%c0_2, %c0_3] : memref<32x96xf32, #tpu.memory_space<vmem>>, vector<32x96xf32>
    %cst = arith.constant dense<0.000000e+00> : vector<128x96xf32>
    %3 = tpu.matmul %1, %2, %cst {dimension_numbers = #tpu.dot_dimension_numbers<[1], [0], [0], [1], [0, 0, 1, 1], [], []>} : vector<128x32xf32>, vector<32x96xf32>, vector<128x96xf32> -> vector<128x96xf32>
    %c0_4 = arith.constant 0 : index
    %c0_5 = arith.constant 0 : index
    %4 = vector.load %arg3[%c0_4, %c0_5] : memref<1x96xf32, #tpu.memory_space<vmem>>, vector<1x96xf32>
    %5 = vector.broadcast %4 : vector<1x96xf32> to vector<128x96xf32>
    %6 = arith.addf %3, %5 : vector<128x96xf32>
    %7 = vector.shape_cast %6 : vector<128x96xf32> to vector<8x16x96xf32>
    %cst_6 = arith.constant 0.000000e+00 : f32
    %8 = vector.broadcast %cst_6 : f32 to vector<128x32xf32>
    %9 = vector.extract_strided_slice %7 {offsets = [0, 0, 0], sizes = [8, 16, 8], strides = [1, 1, 1]} : vector<8x16x96xf32> to vector<8x16x8xf32>
    %10 = vector.extract_strided_slice %7 {offsets = [0, 0, 32], sizes = [8, 16, 8], strides = [1, 1, 1]} : vector<8x16x96xf32> to vector<8x16x8xf32>
    %11 = vector.extract_strided_slice %7 {offsets = [0, 0, 64], sizes = [8, 16, 8], strides = [1, 1, 1]} : vector<8x16x96xf32> to vector<8x16x8xf32>
    "tpu.trace_start"() <{level = 10 : i32, message = "bnd,bmd->bnm"}> : () -> ()
    %cst_7 = arith.constant dense<0.000000e+00> : vector<8x16x16xf32>
    %12 = tpu.matmul %9, %10, %cst_7 {dimension_numbers = #tpu.dot_dimension_numbers<[2], [2], [1], [1], [0, 0, 0, 1, 1, 1], [0], [0]>} : vector<8x16x8xf32>, vector<8x16x8xf32>, vector<8x16x16xf32> -> vector<8x16x16xf32>
    "tpu.trace_stop"() : () -> ()
    %c0_8 = arith.constant 0 : index
    %c0_9 = arith.constant 0 : index
    %c0_10 = arith.constant 0 : index
    %13 = vector.load %arg4[%c0_8, %c0_9, %c0_10] : memref<4x16x16xf32, #tpu.memory_space<vmem>>, vector<1x16x16xf32>
    %14 = vector.shape_cast %13 : vector<1x16x16xf32> to vector<16x16xf32>
    %15 = vector.shape_cast %14 : vector<16x16xf32> to vector<1x16x16xf32>
    %16 = vector.broadcast %15 : vector<1x16x16xf32> to vector<8x16x16xf32>
    %17 = arith.addf %12, %16 : vector<8x16x16xf32>
    %cst_11 = arith.constant dense<0xFF800000> : vector<8x16xf32>
    %18 = vector.multi_reduction <maximumf>, %17, %cst_11 [2] : vector<8x16x16xf32> to vector<8x16xf32>
    %19 = vector.shape_cast %18 : vector<8x16xf32> to vector<8x16x1xf32>
    %20 = vector.broadcast %19 : vector<8x16x1xf32> to vector<8x16x16xf32>
    %21 = arith.subf %17, %20 : vector<8x16x16xf32>
    %22 = math.exp %21 : vector<8x16x16xf32>
    %cst_12 = arith.constant dense<0.000000e+00> : vector<8x16xf32>
    %23 = vector.multi_reduction <add>, %22, %cst_12 [2] : vector<8x16x16xf32> to vector<8x16xf32>
    %24 = vector.shape_cast %23 : vector<8x16xf32> to vector<8x16x1xf32>
    %25 = tpu.reciprocal %24 {approx = true} : vector<8x16x1xf32> -> vector<8x16x1xf32>
    %26 = vector.broadcast %25 : vector<8x16x1xf32> to vector<8x16x16xf32>
    %27 = arith.mulf %22, %26 : vector<8x16x16xf32>
    "tpu.trace_start"() <{level = 10 : i32, message = "bnm,bmd->bnd"}> : () -> ()
    %cst_13 = arith.constant dense<0.000000e+00> : vector<8x16x8xf32>
    %28 = tpu.matmul %27, %11, %cst_13 {dimension_numbers = #tpu.dot_dimension_numbers<[2], [1], [1], [2], [0, 0, 0, 1, 1, 2], [0], [0]>} : vector<8x16x16xf32>, vector<8x16x8xf32>, vector<8x16x8xf32> -> vector<8x16x8xf32>
    "tpu.trace_stop"() : () -> ()
    %29 = vector.shape_cast %28 : vector<8x16x8xf32> to vector<128x8xf32>
    %c0_14 = arith.constant 0 : index
    %c0_15 = arith.constant 0 : index
    %30 = vector.load %arg5[%c0_14, %c0_15] : memref<32x32xf32, #tpu.memory_space<vmem>>, vector<8x32xf32>
    %cst_16 = arith.constant dense<0.000000e+00> : vector<128x32xf32>
    %31 = tpu.matmul %29, %30, %cst_16 {dimension_numbers = #tpu.dot_dimension_numbers<[1], [0], [0], [1], [0, 0, 1, 1], [], []>} : vector<128x8xf32>, vector<8x32xf32>, vector<128x32xf32> -> vector<128x32xf32>
    %32 = arith.addf %8, %31 : vector<128x32xf32>
    %33 = vector.extract_strided_slice %7 {offsets = [0, 0, 8], sizes = [8, 16, 8], strides = [1, 1, 1]} : vector<8x16x96xf32> to vector<8x16x8xf32>
    %34 = vector.extract_strided_slice %7 {offsets = [0, 0, 40], sizes = [8, 16, 8], strides = [1, 1, 1]} : vector<8x16x96xf32> to vector<8x16x8xf32>
    %35 = vector.extract_strided_slice %7 {offsets = [0, 0, 72], sizes = [8, 16, 8], strides = [1, 1, 1]} : vector<8x16x96xf32> to vector<8x16x8xf32>
    "tpu.trace_start"() <{level = 10 : i32, message = "bnd,bmd->bnm"}> : () -> ()
    %cst_17 = arith.constant dense<0.000000e+00> : vector<8x16x16xf32>
    %36 = tpu.matmul %33, %34, %cst_17 {dimension_numbers = #tpu.dot_dimension_numbers<[2], [2], [1], [1], [0, 0, 0, 1, 1, 1], [0], [0]>} : vector<8x16x8xf32>, vector<8x16x8xf32>, vector<8x16x16xf32> -> vector<8x16x16xf32>
    "tpu.trace_stop"() : () -> ()
    %c1 = arith.constant 1 : index
    %c0_18 = arith.constant 0 : index
    %c0_19 = arith.constant 0 : index
    %37 = vector.load %arg4[%c1, %c0_18, %c0_19] : memref<4x16x16xf32, #tpu.memory_space<vmem>>, vector<1x16x16xf32>
    %38 = vector.shape_cast %37 : vector<1x16x16xf32> to vector<16x16xf32>
    %39 = vector.shape_cast %38 : vector<16x16xf32> to vector<1x16x16xf32>
    %40 = vector.broadcast %39 : vector<1x16x16xf32> to vector<8x16x16xf32>
    %41 = arith.addf %36, %40 : vector<8x16x16xf32>
    %cst_20 = arith.constant dense<0xFF800000> : vector<8x16xf32>
    %42 = vector.multi_reduction <maximumf>, %41, %cst_20 [2] : vector<8x16x16xf32> to vector<8x16xf32>
    %43 = vector.shape_cast %42 : vector<8x16xf32> to vector<8x16x1xf32>
    %44 = vector.broadcast %43 : vector<8x16x1xf32> to vector<8x16x16xf32>
    %45 = arith.subf %41, %44 : vector<8x16x16xf32>
    %46 = math.exp %45 : vector<8x16x16xf32>
    %cst_21 = arith.constant dense<0.000000e+00> : vector<8x16xf32>
    %47 = vector.multi_reduction <add>, %46, %cst_21 [2] : vector<8x16x16xf32> to vector<8x16xf32>
    %48 = vector.shape_cast %47 : vector<8x16xf32> to vector<8x16x1xf32>
    %49 = tpu.reciprocal %48 {approx = true} : vector<8x16x1xf32> -> vector<8x16x1xf32>
    %50 = vector.broadcast %49 : vector<8x16x1xf32> to vector<8x16x16xf32>
    %51 = arith.mulf %46, %50 : vector<8x16x16xf32>
    "tpu.trace_start"() <{level = 10 : i32, message = "bnm,bmd->bnd"}> : () -> ()
    %cst_22 = arith.constant dense<0.000000e+00> : vector<8x16x8xf32>
    %52 = tpu.matmul %51, %35, %cst_22 {dimension_numbers = #tpu.dot_dimension_numbers<[2], [1], [1], [2], [0, 0, 0, 1, 1, 2], [0], [0]>} : vector<8x16x16xf32>, vector<8x16x8xf32>, vector<8x16x8xf32> -> vector<8x16x8xf32>
    "tpu.trace_stop"() : () -> ()
    %53 = vector.shape_cast %52 : vector<8x16x8xf32> to vector<128x8xf32>
    %c8 = arith.constant 8 : index
    %c0_23 = arith.constant 0 : index
    %54 = vector.load %arg5[%c8, %c0_23] : memref<32x32xf32, #tpu.memory_space<vmem>>, vector<8x32xf32>
    %cst_24 = arith.constant dense<0.000000e+00> : vector<128x32xf32>
    %55 = tpu.matmul %53, %54, %cst_24 {dimension_numbers = #tpu.dot_dimension_numbers<[1], [0], [0], [1], [0, 0, 1, 1], [], []>} : vector<128x8xf32>, vector<8x32xf32>, vector<128x32xf32> -> vector<128x32xf32>
    %56 = arith.addf %32, %55 : vector<128x32xf32>
    %57 = vector.extract_strided_slice %7 {offsets = [0, 0, 16], sizes = [8, 16, 8], strides = [1, 1, 1]} : vector<8x16x96xf32> to vector<8x16x8xf32>
    %58 = vector.extract_strided_slice %7 {offsets = [0, 0, 48], sizes = [8, 16, 8], strides = [1, 1, 1]} : vector<8x16x96xf32> to vector<8x16x8xf32>
    %59 = vector.extract_strided_slice %7 {offsets = [0, 0, 80], sizes = [8, 16, 8], strides = [1, 1, 1]} : vector<8x16x96xf32> to vector<8x16x8xf32>
    "tpu.trace_start"() <{level = 10 : i32, message = "bnd,bmd->bnm"}> : () -> ()
    %cst_25 = arith.constant dense<0.000000e+00> : vector<8x16x16xf32>
    %60 = tpu.matmul %57, %58, %cst_25 {dimension_numbers = #tpu.dot_dimension_numbers<[2], [2], [1], [1], [0, 0, 0, 1, 1, 1], [0], [0]>} : vector<8x16x8xf32>, vector<8x16x8xf32>, vector<8x16x16xf32> -> vector<8x16x16xf32>
    "tpu.trace_stop"() : () -> ()
    %c2 = arith.constant 2 : index
    %c0_26 = arith.constant 0 : index
    %c0_27 = arith.constant 0 : index
    %61 = vector.load %arg4[%c2, %c0_26, %c0_27] : memref<4x16x16xf32, #tpu.memory_space<vmem>>, vector<1x16x16xf32>
    %62 = vector.shape_cast %61 : vector<1x16x16xf32> to vector<16x16xf32>
    %63 = vector.shape_cast %62 : vector<16x16xf32> to vector<1x16x16xf32>
    %64 = vector.broadcast %63 : vector<1x16x16xf32> to vector<8x16x16xf32>
    %65 = arith.addf %60, %64 : vector<8x16x16xf32>
    %cst_28 = arith.constant dense<0xFF800000> : vector<8x16xf32>
    %66 = vector.multi_reduction <maximumf>, %65, %cst_28 [2] : vector<8x16x16xf32> to vector<8x16xf32>
    %67 = vector.shape_cast %66 : vector<8x16xf32> to vector<8x16x1xf32>
    %68 = vector.broadcast %67 : vector<8x16x1xf32> to vector<8x16x16xf32>
    %69 = arith.subf %65, %68 : vector<8x16x16xf32>
    %70 = math.exp %69 : vector<8x16x16xf32>
    %cst_29 = arith.constant dense<0.000000e+00> : vector<8x16xf32>
    %71 = vector.multi_reduction <add>, %70, %cst_29 [2] : vector<8x16x16xf32> to vector<8x16xf32>
    %72 = vector.shape_cast %71 : vector<8x16xf32> to vector<8x16x1xf32>
    %73 = tpu.reciprocal %72 {approx = true} : vector<8x16x1xf32> -> vector<8x16x1xf32>
    %74 = vector.broadcast %73 : vector<8x16x1xf32> to vector<8x16x16xf32>
    %75 = arith.mulf %70, %74 : vector<8x16x16xf32>
    "tpu.trace_start"() <{level = 10 : i32, message = "bnm,bmd->bnd"}> : () -> ()
    %cst_30 = arith.constant dense<0.000000e+00> : vector<8x16x8xf32>
    %76 = tpu.matmul %75, %59, %cst_30 {dimension_numbers = #tpu.dot_dimension_numbers<[2], [1], [1], [2], [0, 0, 0, 1, 1, 2], [0], [0]>} : vector<8x16x16xf32>, vector<8x16x8xf32>, vector<8x16x8xf32> -> vector<8x16x8xf32>
    "tpu.trace_stop"() : () -> ()
    %77 = vector.shape_cast %76 : vector<8x16x8xf32> to vector<128x8xf32>
    %c16 = arith.constant 16 : index
    %c0_31 = arith.constant 0 : index
    %78 = vector.load %arg5[%c16, %c0_31] : memref<32x32xf32, #tpu.memory_space<vmem>>, vector<8x32xf32>
    %cst_32 = arith.constant dense<0.000000e+00> : vector<128x32xf32>
    %79 = tpu.matmul %77, %78, %cst_32 {dimension_numbers = #tpu.dot_dimension_numbers<[1], [0], [0], [1], [0, 0, 1, 1], [], []>} : vector<128x8xf32>, vector<8x32xf32>, vector<128x32xf32> -> vector<128x32xf32>
    %80 = arith.addf %56, %79 : vector<128x32xf32>
    %81 = vector.extract_strided_slice %7 {offsets = [0, 0, 24], sizes = [8, 16, 8], strides = [1, 1, 1]} : vector<8x16x96xf32> to vector<8x16x8xf32>
    %82 = vector.extract_strided_slice %7 {offsets = [0, 0, 56], sizes = [8, 16, 8], strides = [1, 1, 1]} : vector<8x16x96xf32> to vector<8x16x8xf32>
    %83 = vector.extract_strided_slice %7 {offsets = [0, 0, 88], sizes = [8, 16, 8], strides = [1, 1, 1]} : vector<8x16x96xf32> to vector<8x16x8xf32>
    "tpu.trace_start"() <{level = 10 : i32, message = "bnd,bmd->bnm"}> : () -> ()
    %cst_33 = arith.constant dense<0.000000e+00> : vector<8x16x16xf32>
    %84 = tpu.matmul %81, %82, %cst_33 {dimension_numbers = #tpu.dot_dimension_numbers<[2], [2], [1], [1], [0, 0, 0, 1, 1, 1], [0], [0]>} : vector<8x16x8xf32>, vector<8x16x8xf32>, vector<8x16x16xf32> -> vector<8x16x16xf32>
    "tpu.trace_stop"() : () -> ()
    %c3 = arith.constant 3 : index
    %c0_34 = arith.constant 0 : index
    %c0_35 = arith.constant 0 : index
    %85 = vector.load %arg4[%c3, %c0_34, %c0_35] : memref<4x16x16xf32, #tpu.memory_space<vmem>>, vector<1x16x16xf32>
    %86 = vector.shape_cast %85 : vector<1x16x16xf32> to vector<16x16xf32>
    %87 = vector.shape_cast %86 : vector<16x16xf32> to vector<1x16x16xf32>
    %88 = vector.broadcast %87 : vector<1x16x16xf32> to vector<8x16x16xf32>
    %89 = arith.addf %84, %88 : vector<8x16x16xf32>
    %cst_36 = arith.constant dense<0xFF800000> : vector<8x16xf32>
    %90 = vector.multi_reduction <maximumf>, %89, %cst_36 [2] : vector<8x16x16xf32> to vector<8x16xf32>
    %91 = vector.shape_cast %90 : vector<8x16xf32> to vector<8x16x1xf32>
    %92 = vector.broadcast %91 : vector<8x16x1xf32> to vector<8x16x16xf32>
    %93 = arith.subf %89, %92 : vector<8x16x16xf32>
    %94 = math.exp %93 : vector<8x16x16xf32>
    %cst_37 = arith.constant dense<0.000000e+00> : vector<8x16xf32>
    %95 = vector.multi_reduction <add>, %94, %cst_37 [2] : vector<8x16x16xf32> to vector<8x16xf32>
    %96 = vector.shape_cast %95 : vector<8x16xf32> to vector<8x16x1xf32>
    %97 = tpu.reciprocal %96 {approx = true} : vector<8x16x1xf32> -> vector<8x16x1xf32>
    %98 = vector.broadcast %97 : vector<8x16x1xf32> to vector<8x16x16xf32>
    %99 = arith.mulf %94, %98 : vector<8x16x16xf32>
    "tpu.trace_start"() <{level = 10 : i32, message = "bnm,bmd->bnd"}> : () -> ()
    %cst_38 = arith.constant dense<0.000000e+00> : vector<8x16x8xf32>
    %100 = tpu.matmul %99, %83, %cst_38 {dimension_numbers = #tpu.dot_dimension_numbers<[2], [1], [1], [2], [0, 0, 0, 1, 1, 2], [0], [0]>} : vector<8x16x16xf32>, vector<8x16x8xf32>, vector<8x16x8xf32> -> vector<8x16x8xf32>
    "tpu.trace_stop"() : () -> ()
    %101 = vector.shape_cast %100 : vector<8x16x8xf32> to vector<128x8xf32>
    %c24 = arith.constant 24 : index
    %c0_39 = arith.constant 0 : index
    %102 = vector.load %arg5[%c24, %c0_39] : memref<32x32xf32, #tpu.memory_space<vmem>>, vector<8x32xf32>
    %cst_40 = arith.constant dense<0.000000e+00> : vector<128x32xf32>
    %103 = tpu.matmul %101, %102, %cst_40 {dimension_numbers = #tpu.dot_dimension_numbers<[1], [0], [0], [1], [0, 0, 1, 1], [], []>} : vector<128x8xf32>, vector<8x32xf32>, vector<128x32xf32> -> vector<128x32xf32>
    %104 = arith.addf %80, %103 : vector<128x32xf32>
    %c0_41 = arith.constant 0 : index
    %c0_42 = arith.constant 0 : index
    %105 = vector.load %arg6[%c0_41, %c0_42] : memref<1x32xf32, #tpu.memory_space<vmem>>, vector<1x32xf32>
    %106 = vector.broadcast %105 : vector<1x32xf32> to vector<128x32xf32>
    %107 = arith.addf %104, %106 : vector<128x32xf32>
    %108 = vector.shape_cast %107 : vector<128x32xf32> to vector<8x16x32xf32>
    %c0_43 = arith.constant 0 : index
    %c0_44 = arith.constant 0 : index
    %c0_45 = arith.constant 0 : index
    %109 = vector.load %arg7[%c0_43, %c0_44, %c0_45] : memref<8x16x32xf32, #tpu.memory_space<vmem>>, vector<8x16x32xf32>
    tpu.vector_store %arg7[%c0_43, %c0_44, %c0_45], %108 {strides = array<i32>} : memref<8x16x32xf32, #tpu.memory_space<vmem>>, vector<8x16x32xf32>,
    return
  }
  func.func @transform_0(%arg0: i32) -> (i32, i32, i32) {
    %c0_i32 = arith.constant 0 : i32
    %c0_i32_0 = arith.constant 0 : i32
    %c0_i32_1 = arith.constant 0 : i32
    return %arg0, %c0_i32, %c0_i32_0 : i32, i32, i32
  }
  func.func @transform_1(%arg0: i32) -> (i32, i32) {
    %c0_i32 = arith.constant 0 : i32
    %c0_i32_0 = arith.constant 0 : i32
    %c0_i32_1 = arith.constant 0 : i32
    return %c0_i32, %c0_i32_0 : i32, i32
  }
  func.func @transform_2(%arg0: i32) -> (i32, i32) {
    %c0_i32 = arith.constant 0 : i32
    %c0_i32_0 = arith.constant 0 : i32
    %c0_i32_1 = arith.constant 0 : i32
    return %c0_i32, %c0_i32_0 : i32, i32
  }
  func.func @transform_3(%arg0: i32) -> (i32, i32, i32) {
    %c0_i32 = arith.constant 0 : i32
    %c0_i32_0 = arith.constant 0 : i32
    %c0_i32_1 = arith.constant 0 : i32
    %c0_i32_2 = arith.constant 0 : i32
    return %c0_i32, %c0_i32_0, %c0_i32_1 : i32, i32, i32
  }
  func.func @transform_4(%arg0: i32) -> (i32, i32) {
    %c0_i32 = arith.constant 0 : i32
    %c0_i32_0 = arith.constant 0 : i32
    %c0_i32_1 = arith.constant 0 : i32
    return %c0_i32, %c0_i32_0 : i32, i32
  }
  func.func @transform_5(%arg0: i32) -> (i32, i32) {
    %c0_i32 = arith.constant 0 : i32
    %c0_i32_0 = arith.constant 0 : i32
    %c0_i32_1 = arith.constant 0 : i32
    return %c0_i32, %c0_i32_0 : i32, i32
  }
  func.func @transform_6(%arg0: i32) -> (i32, i32, i32) {
    %c0_i32 = arith.constant 0 : i32
    %c0_i32_0 = arith.constant 0 : i32
    %c0_i32_1 = arith.constant 0 : i32
    return %arg0, %c0_i32, %c0_i32_0 : i32, i32, i32
  }
}

</mosaic_0001>

<bundles_post_ra>
// kernel: tpu_custom_call.1
= control target key start
LH: loop header
LB: loop body
LE: loop exit
PB: predicated region body
PF: predicated region fallthrough
CT: control target
= control target key end

     0   :  { %11 = vsyncpa [#allocation3], 0  ;;  %s6804_s0 = inlined_call_operand.hbm [shape: f32[8,16,32], index: 0, kind: input, shape index: {}]   ;;  %s6805_s1 = inlined_call_operand.hbm [shape: f32[32,96], index: 1, kind: input, shape index: {}]   ;;  %s6806_s2 = inlined_call_operand.vmem [shape: f32[1,96], index: 2, kind: input, shape index: {}]   ;;  %s6807_s3 = inlined_call_operand.hbm [shape: f32[4,16,16], index: 3, kind: input, shape index: {}]   ;;  %s6808_s4 = inlined_call_operand.hbm [shape: f32[32,32], index: 4, kind: input, shape index: {}]   ;;  %s6809_s5 = inlined_call_operand.vmem [shape: f32[1,32], index: 5, kind: input, shape index: {}]   ;;  %s6810_s6 = inlined_call_operand.hbm [shape: f32[8,16,32], index: 6, kind: output, shape index: {}]  }
   0x1   :  { %12 = vsyncpa [#allocation6], 0 }
   0x2   :  { %13 = vsyncpa [#allocation9], 0 }
   0x3   :  { %14 = vsyncpa [#allocation4], 0  ;;  %s32_s23 = sshll.u32 %s6805_s1, 4  ;;  %s4679_s24 = smov [#allocation5]   ;;  %s33_s23 = int_to_ptr.hbm [resolvable:$true] %s32_s23 }
   0x4   :  { %s34_s25 = sshll.u32 %s4679_s24, 4  ;;  %s19_s28 = sshll.u32 %s6804_s0, 4  ;;  %s35_s25 = int_to_ptr.vmem [resolvable:$true] %s34_s25  ;;  %s20_s28 = int_to_ptr.hbm [resolvable:$true] %s19_s28 }
   0x5   :  { %s4680_s29 = smov 128   ;;  %s4681_s30 = smov 8  }
   0x6   :  { %40 = dma.hbm_to_vmem [thread:$0]  %s33_s23, 512, %s35_s25, [#allocation6], %s4680_s29, %s4680_s29, %s4681_s30  }
   0x7   :  { %s4682_s7 = smov [#allocation2]   ;;  %s47_s1 = sshll.u32 %s6807_s3, 4  ;;  %s48_s1 = int_to_ptr.hbm [resolvable:$true] %s47_s1 }
   0x8   :  { %s21_s8 = sshll.u32 %s4682_s7, 4  ;;  %s60_s12 = sshll.u32 %s6808_s4, 4  ;;  %s22_s8 = int_to_ptr.vmem [resolvable:$true] %s21_s8  ;;  %s61_s12 = int_to_ptr.hbm [resolvable:$true] %s60_s12 }
   0x9   :  { %27 = dma.hbm_to_vmem [thread:$0]  %s20_s28, 2048, %s22_s8, [#allocation3], %s4680_s29, %s4680_s29, %s4681_s30  }
   0xa   :  { %s4683_s13 = smov [#allocation7]   ;;  %s4684_s15 = smov [#allocation8]  }
   0xb   :  { %s49_s14 = sshll.u32 %s4683_s13, 4  ;;  %s62_s3 = sshll.u32 %s4684_s15, 4  ;;  %s50_s14 = int_to_ptr.vmem [resolvable:$true] %s49_s14  ;;  %s63_s3 = int_to_ptr.vmem [resolvable:$true] %s62_s3 }
   0xc   :  { %55 = dma.hbm_to_vmem [thread:$0]  %s48_s1, 1024, %s50_s14, [#allocation6], %s4680_s29, %s4680_s29, %s4681_s30  }
   0xd   :  { %68 = dma.hbm_to_vmem [thread:$0]  %s61_s12, 512, %s63_s3, [#allocation9], %s4680_s29, %s4680_s29, %s4681_s30  }
   0xe   :  { %4671 = dma.done.wait [#allocation3], 2048  }
   0xf   :  { %4672 = vsyncadd [#allocation3], 4294965248 }
  0x10   :  { %4673 = dma.done.wait [#allocation6], 1536  }
  0x11   :  { %4674 = vsyncadd [#allocation6], 4294965760 }
  0x12   :  { %4675 = dma.done.wait [#allocation9], 512  }
  0x13   :  { %4676 = vsyncadd [#allocation9], 4294966784  ;;  %v106_v0 = vld [vmem:[#allocation5 + $0x18] sm:$0xff]  ;;  %v105_v1 = vld [vmem:[#allocation5 + $0x10] sm:$0xff]  ;;  %vm111_vm0 = vcmask 261120   ;;  %s4685_s17 = smov 96  }
  0x14   :  { %172 = vmatpush.msra.mxu0 %v106_v0  ;;  %v104_v2 = vld [vmem:[#allocation5 + $0x8] sm:$0xff]  ;;  %v103_v3 = vld [vmem:[#allocation5] sm:$0xff]  ;;  %v89_v6 = vld [vmem:[#allocation2 + $0x10] sm:$0xff]  ;;  %s4687_s18 = smov 120   ;;  %s4688_s19 = smov 64   ;;  %vm233_vm1 = vcmask 64512  }
  0x15   :  { %v87_v4 = vld [vmem:[#allocation2] sm:$0xff]  ;;  %v88_v5 = vld [vmem:[#allocation2 + $0x8] sm:$0xff]  ;;  %v90_v7 = vld [vmem:[#allocation2 + $0x18] sm:$0xff]  ;;  %s4689_s20 = smov 56   ;;  %s4690_s21 = smov 80   ;;  %vm524_vm2 = vcmask 130048  }
  0x16   :  { %173 = vmatpush.msra.mxu0 %v105_v1  ;;  %v91_v8 = vld [vmem:[#allocation2 + $0x20] sm:$0xff]  ;;  %v92_v9 = vld [vmem:[#allocation2 + $0x28] sm:$0xff]  ;;  %v93_v10 = vld [vmem:[#allocation2 + $0x30] sm:$0xff]  ;;  %s4691_s22 = smov 112   ;;  %s4692_s23 = smov 48  }
  0x17   :  { %v94_v11 = vld [vmem:[#allocation2 + $0x38] sm:$0xff]  ;;  %v95_v12 = vld [vmem:[#allocation2 + $0x40] sm:$0xff]  ;;  %v96_v13 = vld [vmem:[#allocation2 + $0x48] sm:$0xff]  ;;  %s4693_s24 = smov 72   ;;  %s4694_s25 = smov 104  }
  0x18   :  { %174 = vmatpush.msra.mxu0 %v104_v2  ;;  %v97_v14 = vld [vmem:[#allocation2 + $0x50] sm:$0xff]  ;;  %v98_v15 = vld [vmem:[#allocation2 + $0x58] sm:$0xff]  ;;  %v99_v16 = vld [vmem:[#allocation2 + $0x60] sm:$0xff]  ;;  %s4695_s26 = smov 40   ;;  %s3824_s10 = sshll.u32 %s6810_s6, 4  ;;  %s3825_s10 = int_to_ptr.hbm [resolvable:$true] %s3824_s10 }
  0x19   :  { %v100_v17 = vld [vmem:[#allocation2 + $0x68] sm:$0xff]  ;;  %v101_v18 = vld [vmem:[#allocation2 + $0x70] sm:$0xff]  ;;  %v102_v19 = vld [vmem:[#allocation2 + $0x78] sm:$0xff] }
  0x1a   :  { %175 = vmatpush.msra.mxu0 %v103_v3  ;;  %v4775_v20 = vld [vmem:[%s6806_s2] ss:$0 sm:$0xff]  ;;  %s4686_s2 = smov 88  }
  0x1b   :  { %3839 = vmatmul.msk.f32.vlgmr.msra.gmra.mxu0 %vm111_vm0, %v87_v4 }
  0x23   :  { %3840 = vmatmul.msk.f32.gmra.mxu0 %vm111_vm0, %v88_v5 }
  0x2b   :  { %3841 = vmatmul.msk.f32.gmra.mxu0 %vm111_vm0, %v89_v6 }
  0x33   :  { %3842 = vmatmul.msk.f32.gmra.mxu0 %vm111_vm0, %v90_v7 }
  0x3b   :  { %3843 = vmatmul.msk.f32.gmra.mxu0 %vm111_vm0, %v91_v8 }
  0x43   :  { %3844 = vmatmul.msk.f32.gmra.mxu0 %vm111_vm0, %v92_v9 }
  0x4b   :  { %3845 = vmatmul.msk.f32.gmra.mxu0 %vm111_vm0, %v93_v10 }
  0x53   :  { %3846 = vmatmul.msk.f32.gmra.mxu0 %vm111_vm0, %v94_v11 }
  0x5b   :  { %3847 = vmatmul.msk.f32.gmra.mxu0 %vm111_vm0, %v95_v12 }
  0x63   :  { %3848 = vmatmul.msk.f32.gmra.mxu0 %vm111_vm0, %v96_v13 }
  0x6b   :  { %3849 = vmatmul.msk.f32.gmra.mxu0 %vm111_vm0, %v97_v14 }
  0x73   :  { %3850 = vmatmul.msk.f32.gmra.mxu0 %vm111_vm0, %v98_v15 }
  0x7b   :  { %3851 = vmatmul.msk.f32.gmra.mxu0 %vm111_vm0, %v99_v16 }
  0x83   :  { %3852 = vmatmul.msk.f32.gmra.mxu0 %vm111_vm0, %v100_v17 }
  0x8b   :  { %3853 = vmatmul.msk.f32.gmra.mxu0 %vm111_vm0, %v101_v18 }
  0x93   :  { %3854 = vmatmul.msk.f32.gmra.mxu0 %vm111_vm0, %v102_v19 }
  0x98   :  { %v177_v21 = vpop.f32.mrf.mxu0 }
  0x99   :  { %v4778_v22 = vadd.f32 %v4775_v20, %v177_v21 }
  0x9b   :  { %6843 = vst [vmem:[#allocation15_spill] sm:$0xff] %v4778_v22  ;;  %229 = vrot.lane.b32.xlu0 %v4778_v22, %s4685_s17 }
  0xa0   :  { %v180_v23 = vpop.f32.mrf.mxu0 }
  0xa1   :  { %v4783_v24 = vadd.f32 %v4775_v20, %v180_v23 }
  0xa3   :  { %231 = vrot.lane.b32.xlu0 %v4783_v24, %s4685_s17  ;;  %v4847_v46 = vpack.i.bf16 %v4778_v22, %v4783_v24 }
  0xa5   :  { %6852 = vst [vmem:[#allocation24_spill] sm:$0xff] %v4847_v46 }
  0xa8   :  { %v183_v25 = vpop.f32.mrf.mxu0 }
  0xa9   :  { %v4788_v26 = vadd.f32 %v4775_v20, %v183_v25 }
  0xab   :  { %267 = vrot.lane.b32.xlu2 %v4788_v26, %s4685_s17 }
  0xb0   :  { %v186_v27 = vpop.f32.mrf.mxu0 }
  0xb1   :  { %v4803_v33 = vadd.f32 %v4775_v20, %v186_v27 }
  0xb3   :  { %6846 = vst [vmem:[#allocation18_spill] sm:$0xff] %v4803_v33  ;;  %v4858_v49 = vpack.i.bf16 %v4788_v26, %v4803_v33 }
  0xb5   :  { %6853 = vst [vmem:[#allocation25_spill] sm:$0xff] %v4858_v49 }
  0xb8   :  { %v189_v28 = vpop.f32.mrf.mxu0 }
  0xb9   :  { %v4793_v29 = vadd.f32 %v4775_v20, %v189_v28 }
  0xbb   :  { %6844 = vst [vmem:[#allocation16_spill] sm:$0xff] %v4793_v29  ;;  %304 = vrot.lane.b32.xlu1 %v4793_v29, %s4685_s17 }
  0xc0   :  { %v192_v30 = vpop.f32.mrf.mxu0 }
  0xc1   :  { %v4798_v31 = vadd.f32 %v4775_v20, %v192_v30 }
  0xc3   :  { %6845 = vst [vmem:[#allocation17_spill] sm:$0xff] %v4798_v31  ;;  %306 = vrot.lane.b32.xlu1 %v4798_v31, %s4685_s17  ;;  %v4963_v6 = vpack.i.bf16 %v4793_v29, %v4798_v31 }
  0xc5   :  { %6857 = vst [vmem:[#allocation29_spill] sm:$0xff] %v4963_v6 }
  0xc8   :  { %v195_v32 = vpop.f32.mrf.mxu0 }
  0xc9   :  { %v4806_v34 = vadd.f32 %v4775_v20, %v195_v32 }
  0xcb   :  { %6847 = vst [vmem:[#allocation19_spill] sm:$0xff] %v4806_v34  ;;  %269 = vrot.lane.b32.xlu1 %v4803_v33, %s4685_s17  ;;  %341 = vrot.lane.b32.xlu2 %v4806_v34, %s4685_s17  ;;  %v4141_v47 = vpack.i.bf16 %v4806_v34, %v4793_v29 }
  0xd0   :  { %v198_v35 = vpop.f32.mrf.mxu0 }
  0xd1   :  { %v4813_v36 = vadd.f32 %v4775_v20, %v198_v35 }
  0xd3   :  { %6848 = vst [vmem:[#allocation20_spill] sm:$0xff] %v4813_v36  ;;  %343 = vrot.lane.b32.xlu2 %v4813_v36, %s4685_s17  ;;  %v4136_v44 = vpack.i.bf16 %v4813_v36, %v4798_v31  ;;  %v5012_v16 = vpack.i.bf16 %v4806_v34, %v4813_v36 }
  0xd5   :  { %6859 = vst [vmem:[#allocation31_spill] sm:$0xff] %v5012_v16 }
  0xd8   :  { %v201_v37 = vpop.f32.mrf.mxu0 }
  0xd9   :  { %v4818_v38 = vadd.f32 %v4775_v20, %v201_v37 }
  0xdb   :  { %6849 = vst [vmem:[#allocation21_spill] sm:$0xff] %v4818_v38  ;;  %378 = vrot.lane.b32.xlu1 %v4818_v38, %s4685_s17  ;;  %1028 = vrot.lane.b32.xlu2 %v4788_v26, %s4686_s2 }
  0xe0   :  { %v204_v39 = vpop.f32.mrf.mxu0 }
  0xe1   :  { %v4825_v40 = vadd.f32 %v4775_v20, %v204_v39 }
  0xe3   :  { %987 = vrot.lane.b32.xlu2 %v4783_v24, %s4687_s18  ;;  %380 = vrot.lane.b32.xlu0 %v4825_v40, %s4685_s17  ;;  %v4836_v43 = vpack.i.bf16 %v4818_v38, %v4825_v40 }
  0xe5   :  { %6851 = vst [vmem:[#allocation23_spill] sm:$0xff] %v4836_v43 }
  0xe8   :  { %v207_v41 = vpop.f32.mrf.mxu0 }
  0xe9   :  { %v4832_v42 = vadd.f32 %v4775_v20, %v207_v41 }
  0xeb   :  { %6850 = vst [vmem:[#allocation22_spill] sm:$0xff] %v4832_v42  ;;  %415 = vrot.lane.b32.xlu1 %v4832_v42, %s4685_s17  ;;  %4152 = vrot.lane.b32.xlu2 %v4836_v43, %s4688_s19 }
  0xec   :  { %4137 = vrot.lane.b32.xlu0 %v4136_v44, %s4688_s19 }
  0xf0   :  { %v210_v45 = vpop.f32.mrf.mxu0 }
  0xf1   :  { %v4879_v54 = vadd.f32 %v4775_v20, %v210_v45 }
  0xf3   :  { %1108 = vrot.lane.b32.xlu2 %v4813_v36, %s4686_s2  ;;  %4132 = vrot.lane.b32.xlu1 %v4847_v46, %s4688_s19  ;;  %6854 = vst [vmem:[#allocation26_spill] sm:$0xff] %v4879_v54 }
  0xf4   :  { %4142 = vrot.lane.b32.xlu0 %v4141_v47, %s4688_s19 }
  0xf8   :  { %v213_v48 = vpop.f32.mrf.mxu0 }
  0xf9   :  { %v4874_v52 = vadd.f32 %v4775_v20, %v213_v48 }
  0xfb   :  { %991 = vrot.lane.b32.xlu1 %v4783_v24, %s4686_s2  ;;  %v4156_v53 = vpack.i.bf16 %v4874_v52, %v4832_v42 }
  0xfc   :  { %4147 = vrot.lane.b32.xlu0 %v4858_v49, %s4688_s19 }
 0x100   :  { %v216_v50 = vpop.f32.mrf.mxu0 }
 0x101   :  { %v4865_v51 = vadd.f32 %v4775_v20, %v216_v50 }
 0x103   :  { %454 = vrot.lane.b32.xlu2 %v4865_v51, %s4685_s17  ;;  %1026 = vrot.lane.b32.xlu1 %v4803_v33, %s4687_s18  ;;  %v4161_v60 = vpack.i.bf16 %v4865_v51, %v4879_v54 }
 0x104   :  { %1030 = vrot.lane.b32.xlu0 %v4803_v33, %s4686_s2 }
 0x105   :  { %v268_v59 = vpop.permute.xlu2 %267 }
 0x108   :  { %v219_v55 = vpop.f32.mrf.mxu0 }
 0x109   :  { %v4887_v57 = vadd.f32 %v4775_v20, %v219_v55  ;;  %v5046_v55 = vld [vmem:[#allocation7] sm:$0xff] }
 0x10b   :  { %1147 = vrot.lane.b32.xlu2 %v4825_v40, %s4686_s2  ;;  %4157 = vrot.lane.b32.xlu1 %v4156_v53, %s4688_s19  ;;  %6855 = vst [vmem:[#allocation27_spill] sm:$0xff] %v4887_v57 }
 0x10c   :  { %417 = vrot.lane.b32.xlu0 %v4879_v54, %s4685_s17 }
 0x10d   :  { %v230_v56 = vpop.permute.xlu0 %229 }
 0x110   :  { %v222_v61 = vpop.f32.mrf.mxu0 }
 0x111   :  { %v4915_v63 = vadd.f32 %v4775_v20, %v222_v61 }
 0x113   :  { %1106 = vrot.lane.b32.xlu2 %v4806_v34, %s4686_s2  ;;  %1258 = vrot.lane.b32.xlu1 %v4887_v57, %s4687_s18  ;;  %6856 = vst [vmem:[#allocation28_spill] sm:$0xff] %v4915_v63  ;;  %v4998_v13 = vpack.i.bf16 %v4887_v57, %v4915_v63 }
 0x114   :  { %989 = vrot.lane.b32.xlu0 %v4778_v22, %s4686_s2 }
 0x115   :  { %v232_v58 = vpop.permute.xlu0 %231  ;;  %6858 = vst [vmem:[#allocation30_spill] sm:$0xff] %v4998_v13 }
 0x116   :  { %3855 = vmatpush.xpose.msk.msra.mxu1 %vm233_vm1, %v232_v58 }
 0x11a   :  { %3856 = vmatpush.xpose.msk.msra.mxu1 %vm233_vm1, %v230_v56 }
 0x11b   :  { %1102 = vrot.lane.b32.xlu2 %v4806_v34, %s4687_s18  ;;  %1069 = vrot.lane.b32.xlu1 %v4798_v31, %s4686_s2 }
 0x11c   :  { %452 = vrot.lane.b32.xlu0 %v4874_v52, %s4685_s17 }
 0x11d   :  { %3857 = vmatmul.msk.f32.vlgmr.msra.gmra.mxu1 %vm233_vm1, %v4778_v22 }
 0x123   :  { %4162 = vrot.lane.b32.xlu2 %v4161_v60, %s4688_s19  ;;  %1225 = vrot.lane.b32.xlu1 %v4865_v51, %s4686_s2 }
 0x124   :  { %985 = vrot.lane.b32.xlu0 %v4778_v22, %s4687_s18 }
 0x125   :  { %v342_v62 = vpop.permute.xlu2 %341  ;;  %3858 = vmatmul.msk.f32.gmra.mxu1 %vm233_vm1, %v4783_v24 }
 0x12b   :  { %491 = vrot.lane.b32.xlu2 %v4915_v63, %s4685_s17  ;;  %1065 = vrot.lane.b32.xlu1 %v4798_v31, %s4687_s18 }
 0x12c   :  { %1024 = vrot.lane.b32.xlu0 %v4788_v26, %s4687_s18 }
 0x12d   :  { %v305_v0 = vpop.permute.xlu1 %304  ;;  %v344_v1 = vpop.permute.xlu2 %343 }
 0x12e   :  { %3867 = vmatpush.xpose.msk.msrb.mxu1 %vm233_vm1, %v344_v1 }
 0x132   :  { %3868 = vmatpush.xpose.msk.msrb.mxu1 %vm233_vm1, %v342_v62  ;;  %v5059_v62 = vld [vmem:[#allocation7 + $0x8] sm:$0xff] }
 0x133   :  { %1141 = vrot.lane.b32.xlu2 %v4818_v38, %s4687_s18  ;;  %1221 = vrot.lane.b32.xlu1 %v4865_v51, %s4687_s18 }
 0x134   :  { %1145 = vrot.lane.b32.xlu0 %v4818_v38, %s4686_s2 }
 0x135   :  { %v307_v2 = vpop.permute.xlu1 %306  ;;  %3869 = vmatmul.msk.f32.vlgmr.msrb.gmra.mxu1 %vm233_vm1, %v4806_v34  ;;  %v4934_v3 = vpop.permute.xlu2 %1028 }
 0x136   :  { %3863 = vmatpush.xpose.msk.msra.mxu3 %vm233_vm1, %v307_v2 }
 0x13a   :  { %3864 = vmatpush.xpose.msk.msra.mxu3 %vm233_vm1, %v305_v0 }
 0x13b   :  { %1104 = vrot.lane.b32.xlu2 %v4813_v36, %s4687_s18  ;;  %1184 = vrot.lane.b32.xlu1 %v4832_v42, %s4686_s2 }
 0x13c   :  { %489 = vrot.lane.b32.xlu0 %v4887_v57, %s4685_s17 }
 0x13d   :  { %3865 = vmatmul.msk.f32.vlgmr.msra.gmra.mxu3 %vm233_vm1, %v4793_v29  ;;  %v270_v4 = vpop.permute.xlu1 %269  ;;  %3870 = vmatmul.msk.f32.gmra.mxu1 %vm233_vm1, %v4813_v36  ;;  %v4948_v5 = vpop.permute.xlu2 %987 }
 0x13e   :  { %3859 = vmatpush.xpose.msk.msra.mxu2 %vm233_vm1, %v270_v4 }
 0x142   :  { %3860 = vmatpush.xpose.msk.msra.mxu2 %vm233_vm1, %v268_v59 }
 0x143   :  { %1143 = vrot.lane.b32.xlu2 %v4825_v40, %s4687_s18  ;;  %1182 = vrot.lane.b32.xlu1 %v4879_v54, %s4687_s18 }
 0x144   :  { %1262 = vrot.lane.b32.xlu0 %v4887_v57, %s4686_s2 }
 0x145   :  { %3861 = vmatmul.msk.f32.vlgmr.msra.gmra.mxu2 %vm233_vm1, %v4788_v26  ;;  %3866 = vmatmul.msk.f32.gmra.mxu3 %vm233_vm1, %v4798_v31  ;;  %v4965_v7 = vpop.permute.xlu2 %4152 }
 0x146   :  { %v4154_v47 = vunpack.i.l.bf16 %v4965_v7  ;;  %v4155_v50 = vunpack.i.h.bf16 %v4965_v7 }
 0x14b   :  { %1063 = vrot.lane.b32.xlu2 %v4793_v29, %s4687_s18  ;;  %4172 = vrot.lane.b32.xlu1 %v4963_v6, %s4689_s20 }
 0x14c   :  { %1067 = vrot.lane.b32.xlu0 %v4793_v29, %s4686_s2 }
 0x14d   :  { %3862 = vmatmul.msk.f32.gmra.mxu2 %vm233_vm1, %v4803_v33  ;;  %v4981_v8 = vpop.permute.xlu2 %1108  ;;  %v379_v10 = vpop.permute.xlu1 %378 }
 0x153   :  { %1180 = vrot.lane.b32.xlu2 %v4832_v42, %s4687_s18  ;;  %1264 = vrot.lane.b32.xlu1 %v4915_v63, %s4686_s2 }
 0x154   :  { %1223 = vrot.lane.b32.xlu0 %v4874_v52, %s4686_s2 }
 0x155   :  { %v381_v9 = vpop.permute.xlu0 %380 }
 0x156   :  { %3871 = vmatpush.xpose.msk.msrb.mxu2 %vm233_vm1, %v381_v9 }
 0x15a   :  { %3872 = vmatpush.xpose.msk.msrb.mxu2 %vm233_vm1, %v379_v10 }
 0x15b   :  { %2028 = vrot.lane.b32.xlu2 %v4803_v33, %s4690_s21  ;;  %1260 = vrot.lane.b32.xlu1 %v4915_v63, %s4687_s18 }
 0x15c   :  { %1219 = vrot.lane.b32.xlu0 %v4874_v52, %s4687_s18 }
 0x15d   :  { %v455_v11 = vpop.permute.xlu2 %454  ;;  %3873 = vmatmul.msk.f32.vlgmr.msrb.gmra.mxu2 %vm233_vm1, %v4818_v38  ;;  %v416_v19 = vpop.permute.xlu1 %415 }
 0x15e   :  { %v4993_v12 = vpop.permute.xlu0 %4137  ;;  %3879 = vmatpush.xpose.msk.msra.mxu1 %vm233_vm1, %v455_v11 }
 0x15f   :  { %v4140_v35 = vunpack.i.h.bf16 %v4993_v12  ;;  %v4139_v9 = vunpack.i.l.bf16 %v4993_v12 }
 0x163   :  { %4177 = vrot.lane.b32.xlu2 %v4998_v13, %s4688_s19 }
 0x164   :  { %1186 = vrot.lane.b32.xlu0 %v4879_v54, %s4686_s2 }
 0x165   :  { %v5004_v14 = vpop.permute.xlu2 %1147  ;;  %3874 = vmatmul.msk.f32.gmra.mxu2 %vm233_vm1, %v4825_v40  ;;  %v4133_v27 = vpop.permute.xlu1 %4132 }
 0x166   :  { %v5008_v15 = vpop.permute.xlu0 %4142  ;;  %v4134_v28 = vunpack.i.l.bf16 %v4133_v27  ;;  %v4135_v30 = vunpack.i.h.bf16 %v4133_v27 }
 0x167   :  { %v4145_v39 = vunpack.i.h.bf16 %v5008_v15  ;;  %v4144_v11 = vunpack.i.l.bf16 %v5008_v15 }
 0x16c   :  { %4167 = vrot.lane.b32.xlu0 %v5012_v16, %s4689_s20 }
 0x16d   :  { %v5016_v17 = vpop.permute.xlu2 %1106  ;;  %v5041_v48 = vpop.permute.xlu1 %991 }
 0x16e   :  { %v4148_v18 = vpop.permute.xlu0 %4147 }
 0x16f   :  { %v4149_v41 = vunpack.i.l.bf16 %v4148_v18  ;;  %v4150_v45 = vunpack.i.h.bf16 %v4148_v18 }
 0x174   :  { %4182 = vrot.lane.b32.xlu0 %v4998_v13, %s4689_s20 }
 0x175   :  { %v5020_v20 = vpop.permute.xlu2 %1102  ;;  %v5053_v59 = vpop.permute.xlu1 %1026 }
 0x176   :  { %6860 = vst [vmem:[#allocation32_spill] sm:$0xff] %v5020_v20  ;;  %v5022_v21 = vpop.permute.xlu0 %1030 }
 0x177   :  { %6861 = vst [vmem:[#allocation33_spill] sm:$0xff] %v5053_v59 }
 0x17d   :  { %v5024_v23 = vpop.permute.xlu2 %4162  ;;  %v5068_v7 = vpop.permute.xlu1 %4157 }
 0x17e   :  { %v418_v25 = vpop.permute.xlu0 %417 }
 0x17f   :  { %3875 = vmatpush.xpose.msk.msrb.mxu3 %vm233_vm1, %v418_v25  ;;  %v4159_v25 = vunpack.i.l.bf16 %v5068_v7 }
 0x183   :  { %3876 = vmatpush.xpose.msk.msrb.mxu3 %vm233_vm1, %v416_v19  ;;  %v4164_v19 = vunpack.i.l.bf16 %v5024_v23 }
 0x185   :  { %v492_v32 = vpop.permute.xlu2 %491  ;;  %v5073_v18 = vpop.permute.xlu1 %1258 }
 0x186   :  { %3877 = vmatmul.msk.f32.vlgmr.msrb.gmra.mxu3 %vm233_vm1, %v4832_v42  ;;  %v5031_v37 = vpop.permute.xlu0 %989  ;;  %3883 = vmatpush.xpose.msk.msra.mxu2 %vm233_vm1, %v492_v32  ;;  %6862 = vst [vmem:[#allocation34_spill] sm:$0xff] %v5073_v18 }
 0x187   :  { %727 = vmatpush.msra.mxu3 %v4134_v28 }
 0x189   :  { %728 = vmatpush.msra.mxu3 %v4135_v30 }
 0x18b   :  { %832 = vmatpush.msrb.mxu3 %v4140_v35 }
 0x18d   :  { %833 = vmatpush.msrb.mxu3 %v4145_v39  ;;  %v5081_v12 = vpop.permute.xlu1 %1069 }
 0x18e   :  { %3878 = vmatmul.msk.f32.gmra.mxu3 %vm233_vm1, %v4879_v54  ;;  %v453_v44 = vpop.permute.xlu0 %452 }
 0x18f   :  { %3880 = vmatpush.xpose.msk.msra.mxu1 %vm233_vm1, %v453_v44 }
 0x192   :  { %3881 = vmatmul.msk.f32.vlgmr.msra.gmra.mxu1 %vm233_vm1, %v4874_v52 }
 0x193   :  { %762 = vmatpush.msrb.mxu1 %v4149_v41 }
 0x195   :  { %763 = vmatpush.msrb.mxu1 %v4150_v45  ;;  %v5088_v30 = vpop.permute.xlu1 %1225 }
 0x196   :  { %v5044_v53 = vpop.permute.xlu0 %985 }
 0x197   :  { %867 = vmatpush.msra.mxu1 %v4154_v47 }
 0x199   :  { %868 = vmatpush.msra.mxu1 %v4155_v50 }
 0x19a   :  { %3882 = vmatmul.msk.f32.gmra.mxu1 %vm233_vm1, %v4865_v51  ;;  %v259_v56 = vpop.f32.mrf.mxu1 }
 0x19b   :  { %v5051_v58 = vadd.f32 %v259_v56, %v5046_v55 }
 0x19d   :  { %v525_v60 = vsel %vm524_vm2, %v5051_v58, -inf  ;;  %v5095_v44 = vpop.permute.xlu1 %1065 }
 0x19e   :  { %v5057_v61 = vpop.permute.xlu0 %1024  ;;  %526 = vmax.xlane.f32.xlu1 %v525_v60  ;;  %6863 = vst [vmem:[#allocation35_spill] sm:$0xff] %v5095_v44 }
 0x1a2   :  { %v262_v0 = vpop.f32.mrf.mxu1 }
 0x1a3   :  { %v5062_v1 = vadd.f32 %v262_v0, %v5059_v62 }
 0x1a5   :  { %v528_v2 = vsel %vm524_vm2, %v5062_v1, -inf }
 0x1a6   :  { %v5066_v4 = vpop.permute.xlu0 %1145  ;;  %529 = vmax.xlane.f32.xlu2 %v528_v2  ;;  %v5107_v2 = vpop.permute.xlu2 %1141 }
 0x1a7   :  { %6864 = vst [vmem:[#allocation36_spill] sm:$0xff] %v5107_v2 }
 0x1ae   :  { %v490_v10 = vpop.permute.xlu0 %489 }
 0x1af   :  { %3884 = vmatpush.xpose.msk.msra.mxu2 %vm233_vm1, %v490_v10  ;;  %v5112_v10 = vpop.permute.xlu1 %1221 }
 0x1b0   :  { %6865 = vst [vmem:[#allocation37_spill] sm:$0xff] %v5112_v10 }
 0x1b2   :  { %3885 = vmatmul.msk.f32.vlgmr.msra.gmra.mxu2 %vm233_vm1, %v4887_v57  ;;  %v370_v56 = vpop.f32.mrf.mxu1 }
 0x1b3   :  { %797 = vmatpush.msrb.mxu2 %v4139_v9  ;;  %v5110_v9 = vadd.f32 %v370_v56, %v5046_v55 }
 0x1b5   :  { %798 = vmatpush.msrb.mxu2 %v4144_v11  ;;  %v543_v11 = vsel %vm524_vm2, %v5110_v9, -inf }
 0x1b6   :  { %v5139_v43 = vpop.permute.xlu0 %1262 }
 0x1b7   :  { %902 = vmatpush.msra.mxu2 %v4164_v19 }
 0x1b9   :  { %903 = vmatpush.msra.mxu2 %v4159_v25  ;;  %v5116_v25 = vpop.permute.xlu2 %1104 }
 0x1ba   :  { %3886 = vmatmul.msk.f32.gmra.mxu2 %vm233_vm1, %v4915_v63  ;;  %v373_v19 = vpop.f32.mrf.mxu1  ;;  %6866 = vst [vmem:[#allocation38_spill] sm:$0xff] %v5116_v25 }
 0x1be   :  { %v5147_v46 = vpop.permute.xlu0 %1067 }
 0x1c0   :  { %v333_v27 = vpop.f32.mrf.mxu3 }
 0x1c1   :  { %v5084_v15 = vadd.f32 %v333_v27, %v5046_v55  ;;  %v5119_v27 = vadd.f32 %v373_v19, %v5059_v62 }
 0x1c3   :  { %v537_v28 = vsel %vm524_vm2, %v5084_v15, -inf }
 0x1c4   :  { %538 = vmax.xlane.f32.xlu0 %v537_v28 }
 0x1c8   :  { %v296_v32 = vpop.f32.mrf.mxu2  ;;  %v336_v41 = vpop.f32.mrf.mxu3 }
 0x1c9   :  { %v5091_v35 = vadd.f32 %v296_v32, %v5046_v55  ;;  %v5098_v45 = vadd.f32 %v336_v41, %v5059_v62  ;;  %v5121_v32 = vpop.permute.xlu1 %1184 }
 0x1ca   :  { %6867 = vst [vmem:[#allocation39_spill] sm:$0xff] %v5121_v32 }
 0x1cb   :  { %v531_v39 = vsel %vm524_vm2, %v5091_v35, -inf  ;;  %v540_v0 = vsel %vm524_vm2, %v5098_v45, -inf }
 0x1cc   :  { %532 = vmax.xlane.f32.xlu1 %v531_v39  ;;  %v546_v39 = vsel %vm524_vm2, %v5119_v27, -inf }
 0x1d0   :  { %v299_v47 = vpop.f32.mrf.mxu2 }
 0x1d1   :  { %v5101_v50 = vadd.f32 %v299_v47, %v5059_v62  ;;  %v5128_v47 = vpop.permute.xlu2 %1143 }
 0x1d2   :  { %6868 = vst [vmem:[#allocation40_spill] sm:$0xff] %v5128_v47 }
 0x1d3   :  { %v534_v60 = vsel %vm524_vm2, %v5101_v50, -inf }
 0x1d4   :  { %535 = vmax.xlane.f32.xlu2 %v534_v60  ;;  %541 = vmax.xlane.f32.xlu1 %v540_v0  ;;  %v5132_v0 = vpop.permute.xlu1 %1182 }
 0x1d5   :  { %6869 = vst [vmem:[#allocation41_spill] sm:$0xff] %v5132_v0 }
 0x1d9   :  { %v5137_v19 = vpop.permute.xlu2 %1063 }
 0x1da   :  { %6870 = vst [vmem:[#allocation42_spill] sm:$0xff] %v5137_v19 }
 0x1dc   :  { %544 = vmax.xlane.f32.xlu2 %v543_v11 }
 0x1e0   :  { %v407_v28 = vpop.f32.mrf.mxu2 }
 0x1e1   :  { %v5126_v41 = vadd.f32 %v407_v28, %v5046_v55  ;;  %v5145_v13 = vpop.permute.xlu2 %1180 }
 0x1e2   :  { %6871 = vst [vmem:[#allocation43_spill] sm:$0xff] %v5145_v13 }
 0x1e3   :  { %v549_v56 = vsel %vm524_vm2, %v5126_v41, -inf }
 0x1e4   :  { %547 = vmax.xlane.f32.xlu2 %v546_v39  ;;  %v5143_v39 = vpop.permute.xlu1 %4172 }
 0x1e8   :  { %v410_v60 = vpop.f32.mrf.mxu2 }
 0x1e9   :  { %v5135_v11 = vadd.f32 %v410_v60, %v5059_v62  ;;  %v5151_v6 = vpop.permute.xlu2 %2028  ;;  %v5153_v60 = vpop.permute.xlu0 %1223 }
 0x1ea   :  { %6872 = vst [vmem:[#allocation44_spill] sm:$0xff] %v5151_v6 }
 0x1eb   :  { %v552_v28 = vsel %vm524_vm2, %v5135_v11, -inf }
 0x1ec   :  { %550 = vmax.xlane.f32.xlu2 %v549_v56  ;;  %v5149_v56 = vpop.permute.xlu1 %1264 }
 0x1f1   :  { %v5162_v13 = vpop.permute.xlu2 %4177  ;;  %v5164_v19 = vpop.permute.xlu0 %1219 }
 0x1f2   :  { %6874 = vst [vmem:[#allocation46_spill] sm:$0xff] %v5164_v19 }
 0x1f4   :  { %553 = vmax.xlane.f32.xlu2 %v552_v28  ;;  %v5155_v16 = vpop.permute.xlu1 %1260 }
 0x1f5   :  { %6873 = vst [vmem:[#allocation45_spill] sm:$0xff] %v5155_v16 }
 0x209   :  { %v444_v49 = vpop.f32.mrf.mxu3 }
 0x20a   :  { %v5158_v0 = vadd.f32 %v444_v49, %v5046_v55 }
 0x20c   :  { %v555_v28 = vsel %vm524_vm2, %v5158_v0, -inf }
 0x20d   :  { %556 = vmax.xlane.f32.xlu0 %v555_v28 }
 0x20f   :  { %v481_v44 = vpop.f32.mrf.mxu1 }
 0x210   :  { %v5167_v18 = vadd.f32 %v481_v44, %v5046_v55 }
 0x211   :  { %v447_v6 = vpop.f32.mrf.mxu3  ;;  %v527_v10 = vpop.xlane.xlu1 %526 }
 0x212   :  { %v5170_v16 = vadd.f32 %v447_v6, %v5059_v62  ;;  %v573_v49 = vsub.f32 %v5051_v58, %v527_v10  ;;  %v561_v32 = vsel %vm524_vm2, %v5167_v18, -inf  ;;  %v5183_v10 = vpop.permute.xlu0 %1186 }
 0x213   :  { %562 = vmax.xlane.f32.xlu1 %v561_v32  ;;  %6875 = vst [vmem:[#allocation47_spill] sm:$0xff] %v5183_v10 }
 0x214   :  { %v558_v28 = vsel %vm524_vm2, %v5170_v16, -inf  ;;  %v589_v47 = vmul.f32 1.442695, %v573_v49 }
 0x215   :  { %559 = vmax.xlane.f32.xlu2 %v558_v28 }
 0x216   :  { %4293 = vpow2.f32 %v589_v47 }
 0x217   :  { %v484_v19 = vpop.f32.mrf.mxu1 }
 0x218   :  { %v5178_v44 = vadd.f32 %v484_v19, %v5059_v62 }
 0x219   :  { %v530_v57 = vpop.xlane.xlu2 %529 }
 0x21a   :  { %v574_v6 = vsub.f32 %v5062_v1, %v530_v57  ;;  %v564_v58 = vsel %vm524_vm2, %v5178_v44, -inf  ;;  %v5189_v19 = vpop.permute.xlu0 %4167 }
 0x21b   :  { %565 = vmax.xlane.f32.xlu0 %v564_v58  ;;  %6876 = vst [vmem:[#allocation48_spill] sm:$0xff] %v5189_v19 }
 0x21c   :  { %v591_v32 = vmul.f32 1.442695, %v574_v6  ;;  %v5185_v2 = vpop.eup %4293 }
 0x21d   :  { %v621_v49 = vsel %vm524_vm2, %v5185_v2, 0.0 }
 0x21e   :  { %4295 = vpow2.f32 %v591_v32 }
 0x222   :  { %v5195_v1 = vpop.permute.xlu0 %4182 }
 0x223   :  { %622 = vadd.xlane.f32.xlu0 %v621_v49  ;;  %6877 = vst [vmem:[#allocation49_spill] sm:$0xff] %v5195_v1 }
 0x224   :  { %v5191_v47 = vpop.eup %4295 }
 0x225   :  { %v624_v57 = vsel %vm524_vm2, %v5191_v47, 0.0 }
 0x22b   :  { %625 = vadd.xlane.f32.xlu0 %v624_v57 }
 0x235   :  { %v518_v28 = vpop.f32.mrf.mxu2 }
 0x236   :  { %v5198_v6 = vadd.f32 %v518_v28, %v5046_v55 }
 0x237   :  { %v539_v58 = vpop.xlane.xlu0 %538 }
 0x238   :  { %v577_v32 = vsub.f32 %v5084_v15, %v539_v58  ;;  %v567_v49 = vsel %vm524_vm2, %v5198_v6, -inf }
 0x239   :  { %568 = vmax.xlane.f32.xlu1 %v567_v49 }
 0x23a   :  { %v597_v10 = vmul.f32 1.442695, %v577_v32 }
 0x23c   :  { %4297 = vpow2.f32 %v597_v10 }
 0x23d   :  { %v521_v25 = vpop.f32.mrf.mxu2 }
 0x23e   :  { %v5204_v19 = vadd.f32 %v521_v25, %v5059_v62 }
 0x23f   :  { %v533_v57 = vpop.xlane.xlu1 %532 }
 0x240   :  { %v575_v1 = vsub.f32 %v5091_v35, %v533_v57  ;;  %v570_v55 = vsel %vm524_vm2, %v5204_v19, -inf }
 0x241   :  { %571 = vmax.xlane.f32.xlu2 %v570_v55 }
 0x242   :  { %v5209_v28 = vpop.eup %4297  ;;  %v593_v15 = vmul.f32 1.442695, %v575_v1 }
 0x243   :  { %v633_v58 = vsel %vm524_vm2, %v5209_v28, 0.0 }
 0x244   :  { %4299 = vpow2.f32 %v593_v15  ;;  %634 = vadd.xlane.f32.xlu0 %v633_v58 }
 0x247   :  { %v536_v10 = vpop.xlane.xlu2 %535  ;;  %v542_v32 = vpop.xlane.xlu1 %541 }
 0x248   :  { %v576_v62 = vsub.f32 %v5101_v50, %v536_v10  ;;  %v578_v25 = vsub.f32 %v5098_v45, %v542_v32 }
 0x24a   :  { %v5215_v49 = vpop.eup %4299  ;;  %v595_v35 = vmul.f32 1.442695, %v576_v62  ;;  %v599_v57 = vmul.f32 1.442695, %v578_v25 }
 0x24b   :  { %v627_v55 = vsel %vm524_vm2, %v5215_v49, 0.0 }
 0x24c   :  { %4301 = vpow2.f32 %v595_v35  ;;  %628 = vadd.xlane.f32.xlu2 %v627_v55 }
 0x24d   :  { %4303 = vpow2.f32 %v599_v57 }
 0x24f   :  { %v545_v1 = vpop.xlane.xlu2 %544 }
 0x250   :  { %v579_v15 = vsub.f32 %v5110_v9, %v545_v1 }
 0x252   :  { %v5220_v58 = vpop.eup %4301  ;;  %v601_v20 = vmul.f32 1.442695, %v579_v15 }
 0x253   :  { %v5222_v59 = vpop.eup %4303  ;;  %v630_v45 = vsel %vm524_vm2, %v5220_v58, 0.0 }
 0x254   :  { %4305 = vpow2.f32 %v601_v20  ;;  %v636_v50 = vsel %vm524_vm2, %v5222_v59, 0.0  ;;  %631 = vadd.xlane.f32.xlu1 %v630_v45 }
 0x255   :  { %637 = vadd.xlane.f32.xlu2 %v636_v50 }
 0x257   :  { %v548_v10 = vpop.xlane.xlu2 %547 }
 0x258   :  { %v580_v32 = vsub.f32 %v5119_v27, %v548_v10 }
 0x25a   :  { %v5229_v62 = vpop.eup %4305  ;;  %v603_v9 = vmul.f32 1.442695, %v580_v32 }
 0x25b   :  { %v639_v25 = vsel %vm524_vm2, %v5229_v62, 0.0 }
 0x25c   :  { %4307 = vpow2.f32 %v603_v9 }
 0x25d   :  { %640 = vadd.xlane.f32.xlu2 %v639_v25 }
 0x25f   :  { %v551_v35 = vpop.xlane.xlu2 %550 }
 0x260   :  { %v581_v57 = vsub.f32 %v5126_v41, %v551_v35 }
 0x262   :  { %v5234_v20 = vpop.eup %4307  ;;  %v605_v55 = vmul.f32 1.442695, %v581_v57 }
 0x263   :  { %v642_v1 = vsel %vm524_vm2, %v5234_v20, 0.0 }
 0x264   :  { %4309 = vpow2.f32 %v605_v55 }
 0x265   :  { %643 = vadd.xlane.f32.xlu2 %v642_v1 }
 0x267   :  { %v554_v27 = vpop.xlane.xlu2 %553 }
 0x268   :  { %v582_v15 = vsub.f32 %v5135_v11, %v554_v27 }
 0x26a   :  { %v5239_v45 = vpop.eup %4309  ;;  %v607_v50 = vmul.f32 1.442695, %v582_v15 }
 0x26b   :  { %v645_v10 = vsel %vm524_vm2, %v5239_v45, 0.0 }
 0x26c   :  { %4311 = vpow2.f32 %v607_v50  ;;  %646 = vadd.xlane.f32.xlu0 %v645_v10 }
 0x272   :  { %v5243_v41 = vpop.eup %4311 }
 0x273   :  { %v648_v32 = vsel %vm524_vm2, %v5243_v41, 0.0 }
 0x274   :  { %649 = vadd.xlane.f32.xlu1 %v648_v32 }
 0x280   :  { %v557_v9 = vpop.xlane.xlu0 %556 }
 0x281   :  { %v583_v25 = vsub.f32 %v5158_v0, %v557_v9 }
 0x283   :  { %v609_v35 = vmul.f32 1.442695, %v583_v25 }
 0x285   :  { %4313 = vpow2.f32 %v609_v35 }
 0x286   :  { %v563_v11 = vpop.xlane.xlu1 %562 }
 0x287   :  { %v585_v57 = vsub.f32 %v5167_v18, %v563_v11 }
 0x288   :  { %v560_v55 = vpop.xlane.xlu2 %559 }
 0x289   :  { %v613_v1 = vmul.f32 1.442695, %v585_v57  ;;  %v584_v27 = vsub.f32 %v5170_v16, %v560_v55 }
 0x28b   :  { %v5250_v15 = vpop.eup %4313  ;;  %4315 = vpow2.f32 %v613_v1  ;;  %v611_v50 = vmul.f32 1.442695, %v584_v27 }
 0x28c   :  { %v651_v10 = vsel %vm524_vm2, %v5250_v15, 0.0 }
 0x28d   :  { %4317 = vpow2.f32 %v611_v50  ;;  %652 = vadd.xlane.f32.xlu0 %v651_v10  ;;  %v4165_v50 = vunpack.i.h.bf16 %v5024_v23  ;;  %v4160_v10 = vunpack.i.h.bf16 %v5068_v7 }
 0x28e   :  { %v566_v32 = vpop.xlane.xlu0 %565 }
 0x28f   :  { %v586_v0 = vsub.f32 %v5178_v44, %v566_v32 }
 0x291   :  { %v5255_v9 = vpop.eup %4315  ;;  %v615_v25 = vmul.f32 1.442695, %v586_v0 }
 0x292   :  { %v657_v18 = vsel %vm524_vm2, %v5255_v9, 0.0 }
 0x293   :  { %v5259_v35 = vpop.eup %4317  ;;  %4319 = vpow2.f32 %v615_v25  ;;  %658 = vadd.xlane.f32.xlu2 %v657_v18 }
 0x294   :  { %v654_v16 = vsel %vm524_vm2, %v5259_v35, 0.0 }
 0x295   :  { %655 = vadd.xlane.f32.xlu1 %v654_v16 }
 0x296   :  { %v623_v11 = vpop.xlane.xlu0 %622 }
 0x297   :  { %4321 = vrcp.f32 %v623_v11 }
 0x299   :  { %v5263_v57 = vpop.eup %4319 }
 0x29a   :  { %v660_v44 = vsel %vm524_vm2, %v5263_v57, 0.0 }
 0x29d   :  { %v4322_v55 = vpop.eup %4321  ;;  %661 = vadd.xlane.f32.xlu1 %v660_v44 }
 0x29e   :  { %v685_v1 = vmul.f32 %v4322_v55, %v5185_v2  ;;  %v626_v27 = vpop.xlane.xlu0 %625 }
 0x29f   :  { %4323 = vrcp.f32 %v626_v27 }
 0x2a0   :  { %3887 = vmatmul.msk.f32.vlgmr.msra.gmra.mxu3 %vm524_vm2, %v685_v1 }
 0x2a1   :  { %937 = vmatpush.msra.mxu3 %v4165_v50 }
 0x2a3   :  { %938 = vmatpush.msra.mxu3 %v4160_v10  ;;  %v4179_v10 = vunpack.i.l.bf16 %v5162_v13 }
 0x2a5   :  { %v4324_v32 = vpop.eup %4323 }
 0x2a6   :  { %v686_v0 = vmul.f32 %v4324_v32, %v5191_v47 }
 0x2a8   :  { %3888 = vmatmul.msk.f32.gmra.mxu3 %vm524_vm2, %v686_v0 }
 0x2ab   :  { %2026 = vrot.lane.b32.xlu2 %v4788_v26, %s4690_s21 }
 0x2ac   :  { %v569_v25 = vpop.xlane.xlu1 %568 }
 0x2ad   :  { %v587_v2 = vsub.f32 %v5198_v6, %v569_v25 }
 0x2af   :  { %v617_v18 = vmul.f32 1.442695, %v587_v2 }
 0x2b1   :  { %4325 = vpow2.f32 %v617_v18 }
 0x2b4   :  { %v572_v7 = vpop.xlane.xlu2 %571 }
 0x2b5   :  { %v588_v55 = vsub.f32 %v5204_v19, %v572_v7 }
 0x2b6   :  { %1989 = vrot.lane.b32.xlu1 %v4783_v24, %s4690_s21 }
 0x2b7   :  { %v5278_v23 = vpop.eup %4325  ;;  %v635_v16 = vpop.xlane.xlu0 %634  ;;  %v619_v27 = vmul.f32 1.442695, %v588_v55 }
 0x2b8   :  { %4327 = vrcp.f32 %v635_v16  ;;  %v663_v47 = vsel %vm524_vm2, %v5278_v23, 0.0 }
 0x2b9   :  { %664 = vadd.xlane.f32.xlu0 %v663_v47 }
 0x2be   :  { %v4328_v11 = vpop.eup %4327  ;;  %1985 = vrot.lane.b32.xlu1 %v4783_v24, %s4691_s22 }
 0x2bf   :  { %v689_v6 = vmul.f32 %v4328_v11, %v5209_v28  ;;  %v629_v44 = vpop.xlane.xlu2 %628 }
 0x2c0   :  { %4329 = vrcp.f32 %v629_v44 }
 0x2c1   :  { %3891 = vmatmul.msk.f32.vlgmr.msrb.gmra.mxu2 %vm524_vm2, %v689_v6 }
 0x2c2   :  { %3903 = vmatpush.xpose.msk.msrb.mxu2 %vm233_vm1, %v5041_v48  ;;  %v4180_v48 = vunpack.i.h.bf16 %v5162_v13 }
 0x2c6   :  { %v4330_v1 = vpop.eup %4329  ;;  %2065 = vrot.lane.b32.xlu1 %v4793_v29, %s4690_s21  ;;  %3904 = vmatpush.xpose.msk.msrb.mxu2 %vm233_vm1, %v5031_v37 }
 0x2c7   :  { %v687_v50 = vmul.f32 %v4330_v1, %v5215_v49  ;;  %v632_v28 = vpop.xlane.xlu1 %631 }
 0x2c8   :  { %v638_v32 = vpop.xlane.xlu2 %637  ;;  %4331 = vrcp.f32 %v632_v28  ;;  %v6885_v28 = vld [vmem:[#allocation47_spill] sm:$0xff] }
 0x2c9   :  { %4333 = vrcp.f32 %v638_v32  ;;  %3889 = vmatmul.msk.f32.vlgmr.msrb.gmra.mxu1 %vm524_vm2, %v687_v50  ;;  %v6887_v32 = vld [vmem:[#allocation46_spill] sm:$0xff] }
 0x2ca   :  { %4335 = vpow2.f32 %v619_v27  ;;  %972 = vmatpush.msrb.mxu1 %v4179_v10  ;;  %v6886_v10 = vld [vmem:[#allocation40_spill] sm:$0xff] }
 0x2cc   :  { %973 = vmatpush.msrb.mxu1 %v4180_v48  ;;  %v6888_v48 = vld [vmem:[#allocation39_spill] sm:$0xff] }
 0x2cd   :  { %2106 = vrot.lane.b32.xlu0 %v4813_v36, %s4690_s21 }
 0x2ce   :  { %v4332_v19 = vpop.eup %4331  ;;  %2262 = vrot.lane.b32.xlu1 %v4915_v63, %s4690_s21 }
 0x2cf   :  { %v4334_v37 = vpop.eup %4333  ;;  %v688_v49 = vmul.f32 %v4332_v19, %v5220_v58  ;;  %v6889_v19 = vld [vmem:[#allocation49_spill] sm:$0xff] }
 0x2d0   :  { %v5302_v0 = vpop.eup %4335  ;;  %v641_v25 = vpop.xlane.xlu2 %640  ;;  %v690_v2 = vmul.f32 %v4334_v37, %v5222_v59  ;;  %v4184_v37 = vunpack.i.l.bf16 %v6889_v19 }
 0x2d1   :  { %4337 = vrcp.f32 %v641_v25  ;;  %3890 = vmatmul.msk.f32.gmra.mxu1 %vm524_vm2, %v688_v49  ;;  %v666_v13 = vsel %vm524_vm2, %v5302_v0, 0.0  ;;  %v6890_v49 = vld [vmem:[#allocation37_spill] sm:$0xff]  ;;  %v6891_v25 = vld [vmem:[#allocation34_spill] sm:$0xff] }
 0x2d2   :  { %3892 = vmatmul.msk.f32.gmra.mxu2 %vm524_vm2, %v690_v2  ;;  %v4185_v2 = vunpack.i.h.bf16 %v6889_v19 }
 0x2d4   :  { %667 = vadd.xlane.f32.xlu2 %v666_v13 }
 0x2d5   :  { %1987 = vrot.lane.b32.xlu0 %v4778_v22, %s4690_s21 }
 0x2d6   :  { %2145 = vrot.lane.b32.xlu1 %v4825_v40, %s4690_s21 }
 0x2d7   :  { %v4338_v58 = vpop.eup %4337 }
 0x2d8   :  { %v691_v18 = vmul.f32 %v4338_v58, %v5229_v62  ;;  %v644_v7 = vpop.xlane.xlu2 %643  ;;  %v6892_v58 = vld [vmem:[#allocation45_spill] sm:$0xff] }
 0x2d9   :  { %4339 = vrcp.f32 %v644_v7 }
 0x2da   :  { %3893 = vmatmul.msk.f32.vlgmr.msrb.gmra.mxu3 %vm524_vm2, %v691_v18 }
 0x2db   :  { %3907 = vmatpush.xpose.msk.msrb.mxu3 %vm233_vm1, %v5022_v21 }
 0x2dd   :  { %2102 = vrot.lane.b32.xlu0 %v4813_v36, %s4691_s22 }
 0x2de   :  { %2139 = vrot.lane.b32.xlu1 %v4818_v38, %s4691_s22 }
 0x2df   :  { %v4340_v59 = vpop.eup %4339  ;;  %3908 = vmatpush.xpose.msk.msrb.mxu3 %vm233_vm1, %v4934_v3  ;;  %v647_v16 = vpop.xlane.xlu0 %646 }
 0x2e0   :  { %4341 = vrcp.f32 %v647_v16  ;;  %v692_v62 = vmul.f32 %v4340_v59, %v5234_v20 }
 0x2e2   :  { %3894 = vmatmul.msk.f32.gmra.mxu3 %vm524_vm2, %v692_v62 }
 0x2e5   :  { %2182 = vrot.lane.b32.xlu0 %v4832_v42, %s4690_s21 }
 0x2e6   :  { %v4342_v21 = vpop.eup %4341 }
 0x2e7   :  { %v693_v47 = vmul.f32 %v4342_v21, %v5239_v45  ;;  %v650_v11 = vpop.xlane.xlu1 %649  ;;  %v5341_v45 = vpack.i.bf16 %v4874_v52, %v4865_v51  ;;  %v6893_v21 = vld [vmem:[#allocation42_spill] sm:$0xff] }
 0x2e8   :  { %4343 = vrcp.f32 %v650_v11  ;;  %v6894_v11 = vld [vmem:[#allocation35_spill] sm:$0xff] }
 0x2e9   :  { %3895 = vmatmul.msk.f32.vlgmr.msra.gmra.mxu1 %vm524_vm2, %v693_v47  ;;  %6878 = vst [vmem:[#allocation50_spill] sm:$0xff] %v5341_v45 }
 0x2ea   :  { %3911 = vmatpush.xpose.msk.msra.mxu1 %vm233_vm1, %v5081_v12 }
 0x2ec   :  { %2022 = vrot.lane.b32.xlu2 %v4788_v26, %s4691_s22 }
 0x2ed   :  { %2178 = vrot.lane.b32.xlu0 %v4832_v42, %s4691_s22 }
 0x2ee   :  { %v4344_v3 = vpop.eup %4343  ;;  %3912 = vmatpush.xpose.msk.msra.mxu1 %vm233_vm1, %v5147_v46 }
 0x2ef   :  { %v694_v20 = vmul.f32 %v4344_v3, %v5243_v41  ;;  %v6895_v3 = vld [vmem:[#allocation43_spill] sm:$0xff] }
 0x2f1   :  { %3896 = vmatmul.msk.f32.gmra.mxu1 %vm524_vm2, %v694_v20 }
 0x2f4   :  { %4187 = vrot.lane.b32.xlu2 %v5341_v45, %s4689_s20 }
 0x2f5   :  { %2180 = vrot.lane.b32.xlu0 %v4879_v54, %s4691_s22 }
 0x2fc   :  { %2024 = vrot.lane.b32.xlu2 %v4803_v33, %s4691_s22 }
 0x2fd   :  { %2063 = vrot.lane.b32.xlu0 %v4798_v31, %s4691_s22 }
 0x300   :  { %v653_v46 = vpop.xlane.xlu0 %652 }
 0x301   :  { %4345 = vrcp.f32 %v653_v46  ;;  %v6897_v46 = vld [vmem:[#allocation41_spill] sm:$0xff] }
 0x304   :  { %2104 = vrot.lane.b32.xlu2 %v4806_v34, %s4690_s21 }
 0x305   :  { %2143 = vrot.lane.b32.xlu0 %v4818_v38, %s4690_s21 }
 0x306   :  { %v659_v12 = vpop.xlane.xlu2 %658 }
 0x307   :  { %v4346_v41 = vpop.eup %4345  ;;  %4347 = vrcp.f32 %v659_v12 }
 0x308   :  { %v695_v6 = vmul.f32 %v4346_v41, %v5250_v15  ;;  %v656_v44 = vpop.xlane.xlu1 %655 }
 0x309   :  { %4349 = vrcp.f32 %v656_v44 }
 0x30a   :  { %3897 = vmatmul.msk.f32.vlgmr.msra.gmra.mxu2 %vm524_vm2, %v695_v6 }
 0x30b   :  { %3915 = vmatpush.xpose.msk.msra.mxu2 %vm233_vm1, %v4981_v8 }
 0x30c   :  { %2100 = vrot.lane.b32.xlu2 %v4806_v34, %s4691_s22 }
 0x30d   :  { %v4348_v55 = vpop.eup %4347 }
 0x30e   :  { %v697_v1 = vmul.f32 %v4348_v55, %v5255_v9 }
 0x30f   :  { %v4350_v27 = vpop.eup %4349  ;;  %3916 = vmatpush.xpose.msk.msra.mxu2 %vm233_vm1, %v5016_v17 }
 0x310   :  { %v662_v50 = vpop.xlane.xlu1 %661  ;;  %3899 = vmatmul.msk.f32.vlgmr.msra.gmra.mxu3 %vm524_vm2, %v697_v1  ;;  %v696_v15 = vmul.f32 %v4350_v27, %v5259_v35 }
 0x311   :  { %4351 = vrcp.f32 %v662_v50  ;;  %3919 = vmatpush.xpose.msk.msra.mxu3 %vm233_vm1, %v5004_v14  ;;  %v4174_v14 = vunpack.i.l.bf16 %v5143_v39 }
 0x312   :  { %3898 = vmatmul.msk.f32.gmra.mxu2 %vm524_vm2, %v696_v15 }
 0x314   :  { %1983 = vrot.lane.b32.xlu2 %v4778_v22, %s4691_s22 }
 0x315   :  { %3920 = vmatpush.xpose.msk.msra.mxu3 %vm233_vm1, %v5066_v4  ;;  %v6880_v4 = vld [vmem:[#allocation32_spill] sm:$0xff] }
 0x317   :  { %v4352_v8 = vpop.eup %4351 }
 0x318   :  { %v698_v17 = vmul.f32 %v4352_v8, %v5263_v57  ;;  %v6884_v57 = vld [vmem:[#allocation27_spill] sm:$0xff] }
 0x31a   :  { %3900 = vmatmul.msk.f32.gmra.mxu3 %vm524_vm2, %v698_v17  ;;  %3905 = vmatmul.msk.f32.vlgmr.msrb.gmra.mxu2 %vm233_vm1, %v5044_v53  ;;  %v6879_v53 = vld [vmem:[#allocation33_spill] sm:$0xff] }
 0x31b   :  { %3927 = vmatpush.xpose.msk.msrb.mxu2 %vm233_vm1, %v5088_v30  ;;  %v6881_v30 = vld [vmem:[#allocation48_spill] sm:$0xff] }
 0x31c   :  { %2184 = vrot.lane.b32.xlu2 %v4879_v54, %s4690_s21  ;;  %v4170_v35 = vunpack.i.h.bf16 %v6881_v30 }
 0x31f   :  { %3928 = vmatpush.xpose.msk.msrb.mxu2 %vm233_vm1, %v5153_v60  ;;  %v6883_v60 = vld [vmem:[#allocation36_spill] sm:$0xff] }
 0x322   :  { %3906 = vmatmul.msk.f32.gmra.mxu2 %vm233_vm1, %v4948_v5  ;;  %3909 = vmatmul.msk.f32.vlgmr.msrb.gmra.mxu3 %vm233_vm1, %v5057_v61  ;;  %v4175_v5 = vunpack.i.h.bf16 %v5143_v39 }
 0x323   :  { %3931 = vmatpush.xpose.msk.msrb.mxu3 %vm233_vm1, %v5149_v56  ;;  %v4169_v56 = vunpack.i.l.bf16 %v6881_v30  ;;  %v5441_v20 = vpop.f32.mrf.mxu3 }
 0x324   :  { %2067 = vrot.lane.b32.xlu2 %v4798_v31, %s4690_s21  ;;  %6896 = vst [vmem:[#allocation33_spill] sm:$0xff] %v5441_v20 }
 0x327   :  { %3932 = vmatpush.xpose.msk.msrb.mxu3 %vm233_vm1, %v5139_v43  ;;  %v6882_v43 = vld [vmem:[#allocation38_spill] sm:$0xff] }
 0x32a   :  { %3910 = vmatmul.msk.f32.gmra.mxu3 %vm233_vm1, %v6879_v53  ;;  %3917 = vmatmul.msk.f32.vlgmr.msra.gmra.mxu2 %vm233_vm1, %v6880_v4  ;;  %v5473_v4 = vld [vmem:[#allocation7 + $0x10] sm:$0xff] }
 0x32b   :  { %1569 = vmatpush.msra.mxu2 %v4174_v14 }
 0x32c   :  { %2061 = vrot.lane.b32.xlu2 %v4793_v29, %s4691_s22  ;;  %v665_v61 = vpop.xlane.xlu0 %664 }
 0x32d   :  { %4353 = vrcp.f32 %v665_v61  ;;  %1570 = vmatpush.msra.mxu2 %v4175_v5 }
 0x332   :  { %3918 = vmatmul.msk.f32.gmra.mxu2 %vm233_vm1, %v6882_v43  ;;  %3921 = vmatmul.msk.f32.vlgmr.msra.gmra.mxu3 %vm233_vm1, %v6883_v60  ;;  %v5484_v60 = vld [vmem:[#allocation7 + $0x18] sm:$0xff] }
 0x333   :  { %v4354_v9 = vpop.eup %4353  ;;  %1604 = vmatpush.msra.mxu3 %v4169_v56 }
 0x334   :  { %v699_v39 = vmul.f32 %v4354_v9, %v5278_v23  ;;  %2260 = vrot.lane.b32.xlu2 %v6884_v57, %s4690_s21  ;;  %v5421_v23 = vpop.permute.xlu2 %2026 }
 0x335   :  { %1605 = vmatpush.msra.mxu3 %v4170_v35 }
 0x336   :  { %3901 = vmatmul.msk.f32.vlgmr.msrb.gmra.mxu1 %vm524_vm2, %v699_v39 }
 0x337   :  { %3923 = vmatpush.xpose.msk.msrb.mxu1 %vm233_vm1, %v6885_v28 }
 0x33a   :  { %3922 = vmatmul.msk.f32.gmra.mxu3 %vm233_vm1, %v6886_v10  ;;  %3929 = vmatmul.msk.f32.vlgmr.msrb.gmra.mxu2 %vm233_vm1, %v6887_v32 }
 0x33b   :  { %3924 = vmatpush.xpose.msk.msrb.mxu1 %vm233_vm1, %v6888_v48 }
 0x33c   :  { %2256 = vrot.lane.b32.xlu2 %v6884_v57, %s4691_s22 }
 0x342   :  { %3930 = vmatmul.msk.f32.gmra.mxu2 %vm233_vm1, %v6890_v49  ;;  %3933 = vmatmul.msk.f32.vlgmr.msrb.gmra.mxu3 %vm233_vm1, %v6891_v25 }
 0x343   :  { %1744 = vmatpush.msrb.mxu3 %v4184_v37 }
 0x344   :  { %v5447_v12 = vpop.f32.mrf.mxu2 }
 0x345   :  { %1745 = vmatpush.msrb.mxu3 %v4185_v2  ;;  %6899 = vst [vmem:[#allocation48_spill] sm:$0xff] %v5447_v12 }
 0x346   :  { %v5465_v8 = vpop.f32.mrf.mxu1 }
 0x347   :  { %v668_v13 = vpop.xlane.xlu2 %667  ;;  %6907 = vst [vmem:[#allocation37_spill] sm:$0xff] %v5465_v8 }
 0x348   :  { %4355 = vrcp.f32 %v668_v13 }
 0x34a   :  { %3934 = vmatmul.msk.f32.gmra.mxu3 %vm233_vm1, %v6892_v58 }
 0x34e   :  { %v4356_v18 = vpop.eup %4355  ;;  %v5471_v53 = vpop.f32.mrf.mxu1 }
 0x34f   :  { %v5431_v7 = vpop.permute.xlu2 %2022  ;;  %v700_v59 = vmul.f32 %v4356_v18, %v5302_v0  ;;  %v5445_v0 = vpop.f32.mrf.mxu3  ;;  %6908 = vst [vmem:[#allocation34_spill] sm:$0xff] %v5471_v53 }
 0x350   :  { %6898 = vst [vmem:[#allocation32_spill] sm:$0xff] %v5445_v0 }
 0x351   :  { %3902 = vmatmul.msk.f32.gmra.mxu1 %vm524_vm2, %v700_v59  ;;  %v5513_v59 = vpop.permute.xlu0 %2106 }
 0x355   :  { %v5451_v6 = vpop.f32.mrf.mxu2 }
 0x356   :  { %6901 = vst [vmem:[#allocation36_spill] sm:$0xff] %v5451_v6 }
 0x357   :  { %v4188_v16 = vpop.permute.xlu2 %4187 }
 0x358   :  { %v4189_v62 = vunpack.i.l.bf16 %v4188_v16  ;;  %v4190_v47 = vunpack.i.h.bf16 %v4188_v16 }
 0x359   :  { %3913 = vmatmul.msk.f32.vlgmr.msra.gmra.mxu1 %vm233_vm1, %v6893_v21 }
 0x35a   :  { %1709 = vmatpush.msrb.mxu2 %v4189_v62 }
 0x35c   :  { %1710 = vmatpush.msrb.mxu2 %v4190_v47 }
 0x35d   :  { %v5449_v41 = vpop.f32.mrf.mxu3 }
 0x35e   :  { %6900 = vst [vmem:[#allocation38_spill] sm:$0xff] %v5449_v41 }
 0x35f   :  { %v5511_v18 = vpop.permute.xlu2 %2024 }
 0x361   :  { %3914 = vmatmul.msk.f32.gmra.mxu1 %vm233_vm1, %v6894_v11 }
 0x365   :  { %v5453_v44 = vpop.f32.mrf.mxu3 }
 0x366   :  { %6902 = vst [vmem:[#allocation47_spill] sm:$0xff] %v5453_v44  ;;  %v5482_v43 = vpop.f32.mrf.mxu1 }
 0x367   :  { %6909 = vst [vmem:[#allocation45_spill] sm:$0xff] %v5482_v43 }
 0x369   :  { %3925 = vmatmul.msk.f32.vlgmr.msrb.gmra.mxu1 %vm233_vm1, %v6895_v3  ;;  %v5523_v3 = vpop.permute.xlu2 %2104 }
 0x36e   :  { %v5495_v48 = vpop.f32.mrf.mxu1 }
 0x36f   :  { %6912 = vst [vmem:[#allocation43_spill] sm:$0xff] %v5495_v48 }
 0x371   :  { %3926 = vmatmul.msk.f32.gmra.mxu1 %vm233_vm1, %v6897_v46 }
 0x38d   :  { %v5455_v55 = vpop.f32.mrf.mxu2 }
 0x38e   :  { %6903 = vst [vmem:[#allocation40_spill] sm:$0xff] %v5455_v55 }
 0x393   :  { %v5457_v1 = vpop.f32.mrf.mxu3 }
 0x394   :  { %6904 = vst [vmem:[#allocation46_spill] sm:$0xff] %v5457_v1 }
 0x395   :  { %v5459_v27 = vpop.f32.mrf.mxu2 }
 0x396   :  { %6905 = vst [vmem:[#allocation39_spill] sm:$0xff] %v5459_v27 }
 0x39d   :  { %v5461_v50 = vpop.f32.mrf.mxu3  ;;  %v5463_v15 = vpop.f32.mrf.mxu2 }
 0x39e   :  { %6906 = vst [vmem:[#allocation49_spill] sm:$0xff] %v5461_v50 }
 0x3a5   :  { %v5467_v17 = vpop.f32.mrf.mxu2  ;;  %v5469_v14 = vpop.f32.mrf.mxu3 }
 0x3ad   :  { %v5475_v5 = vpop.f32.mrf.mxu3  ;;  %v1135_v61 = vpop.f32.mrf.mxu2 }
 0x3ae   :  { %v5478_v30 = vadd.f32 %v1135_v61, %v5473_v4 }
 0x3b0   :  { %v1315_v56 = vsel %vm524_vm2, %v5478_v30, -inf }
 0x3b1   :  { %1316 = vmax.xlane.f32.xlu0 %v1315_v56  ;;  %v5528_v56 = vpop.permute.xlu0 %1987 }
 0x3b3   :  { %v5502_v25 = vpop.f32.mrf.mxu1 }
 0x3b4   :  { %6913 = vst [vmem:[#allocation41_spill] sm:$0xff] %v5502_v25 }
 0x3b5   :  { %v1138_v9 = vpop.f32.mrf.mxu2  ;;  %v5486_v35 = vpop.f32.mrf.mxu3 }
 0x3b6   :  { %6910 = vst [vmem:[#allocation42_spill] sm:$0xff] %v5486_v35  ;;  %v5489_v39 = vadd.f32 %v1138_v9, %v5484_v60 }
 0x3b8   :  { %v1318_v28 = vsel %vm524_vm2, %v5489_v39, -inf }
 0x3b9   :  { %1319 = vmax.xlane.f32.xlu2 %v1318_v28 }
 0x3bd   :  { %v5493_v10 = vpop.f32.mrf.mxu3  ;;  %v1252_v32 = vpop.f32.mrf.mxu2 }
 0x3be   :  { %6911 = vst [vmem:[#allocation35_spill] sm:$0xff] %v5493_v10  ;;  %v5498_v19 = vadd.f32 %v1252_v32, %v5473_v4 }
 0x3c0   :  { %v1333_v37 = vsel %vm524_vm2, %v5498_v19, -inf }
 0x3c1   :  { %1334 = vmax.xlane.f32.xlu1 %v1333_v37 }
 0x3c5   :  { %v1291_v49 = vpop.f32.mrf.mxu3  ;;  %v1255_v47 = vpop.f32.mrf.mxu2 }
 0x3c6   :  { %v5505_v2 = vadd.f32 %v1291_v49, %v5473_v4  ;;  %v5521_v11 = vadd.f32 %v1255_v47, %v5484_v60  ;;  %v5539_v49 = vpop.permute.xlu2 %2100 }
 0x3c8   :  { %v1339_v13 = vsel %vm524_vm2, %v5505_v2, -inf  ;;  %v1336_v9 = vsel %vm524_vm2, %v5521_v11, -inf }
 0x3c9   :  { %1340 = vmax.xlane.f32.xlu1 %v1339_v13 }
 0x3cd   :  { %v1294_v32 = vpop.f32.mrf.mxu3 }
 0x3ce   :  { %v5509_v58 = vpop.f32.mrf.mxu1  ;;  %v5537_v37 = vadd.f32 %v1294_v32, %v5484_v60 }
 0x3cf   :  { %6914 = vst [vmem:[#allocation51_spill] sm:$0xff] %v5509_v58 }
 0x3d0   :  { %v1342_v13 = vsel %vm524_vm2, %v5537_v37, -inf }
 0x3d6   :  { %v1096_v16 = vpop.f32.mrf.mxu1 }
 0x3d7   :  { %v5516_v62 = vadd.f32 %v1096_v16, %v5473_v4  ;;  %v5543_v16 = vpop.permute.xlu0 %2102 }
 0x3d9   :  { %v1309_v21 = vsel %vm524_vm2, %v5516_v62, -inf }
 0x3da   :  { %1310 = vmax.xlane.f32.xlu2 %v1309_v21  ;;  %v5545_v21 = vpop.permute.xlu2 %1983 }
 0x3de   :  { %v1099_v46 = vpop.f32.mrf.mxu1 }
 0x3df   :  { %v5526_v61 = vadd.f32 %v1099_v46, %v5484_v60  ;;  %v5547_v47 = vpop.permute.xlu0 %2182  ;;  %v5551_v46 = vpop.permute.xlu1 %1989 }
 0x3e1   :  { %v1312_v28 = vsel %vm524_vm2, %v5526_v61, -inf }
 0x3e2   :  { %2223 = vrot.lane.b32.xlu1 %v4865_v51, %s4690_s21  ;;  %1337 = vmax.xlane.f32.xlu2 %v1336_v9  ;;  %v5553_v9 = vpop.permute.xlu2 %2184 }
 0x3e3   :  { %1313 = vmax.xlane.f32.xlu0 %v1312_v28 }
 0x3e7   :  { %v5555_v28 = vpop.permute.xlu0 %2178  ;;  %v5559_v32 = vpop.permute.xlu1 %1985 }
 0x3ea   :  { %1343 = vmax.xlane.f32.xlu2 %v1342_v13  ;;  %v5561_v10 = vpop.permute.xlu2 %2067 }
 0x3ef   :  { %v5563_v13 = vpop.permute.xlu0 %2180  ;;  %v5565_v35 = vpop.permute.xlu1 %2065 }
 0x3f2   :  { %v5567_v58 = vpop.permute.xlu2 %2061 }
 0x3f7   :  { %2141 = vrot.lane.b32.xlu0 %v4825_v40, %s4691_s22  ;;  %v5569_v57 = vpop.permute.xlu0 %2063  ;;  %v5571_v25 = vpop.permute.xlu1 %2262 }
 0x3fa   :  { %v5573_v50 = vpop.permute.xlu2 %2260 }
 0x3ff   :  { %v5575_v1 = vpop.permute.xlu0 %2143  ;;  %v5577_v27 = vpop.permute.xlu1 %2145 }
 0x402   :  { %2258 = vrot.lane.b32.xlu2 %v4915_v63, %s4691_s22  ;;  %v5579_v63 = vpop.permute.xlu2 %2256 }
 0x407   :  { %v5582_v38 = vpop.permute.xlu1 %2139 }
 0x424   :  { %v1317_v55 = vpop.xlane.xlu0 %1316 }
 0x425   :  { %v1351_v48 = vsub.f32 %v5478_v30, %v1317_v55 }
 0x427   :  { %v1373_v43 = vmul.f32 1.442695, %v1351_v48 }
 0x429   :  { %4357 = vpow2.f32 %v1373_v43 }
 0x42c   :  { %v1320_v44 = vpop.xlane.xlu2 %1319 }
 0x42d   :  { %v1352_v41 = vsub.f32 %v5489_v39, %v1320_v44 }
 0x42f   :  { %v5585_v6 = vpop.eup %4357  ;;  %v1375_v12 = vmul.f32 1.442695, %v1352_v41 }
 0x430   :  { %v1411_v53 = vsel %vm524_vm2, %v5585_v6, 0.0 }
 0x431   :  { %4359 = vpow2.f32 %v1375_v12  ;;  %1412 = vadd.xlane.f32.xlu0 %v1411_v53 }
 0x434   :  { %v1335_v8 = vpop.xlane.xlu1 %1334 }
 0x435   :  { %v1357_v39 = vsub.f32 %v5498_v19, %v1335_v8 }
 0x437   :  { %v5589_v0 = vpop.eup %4359  ;;  %v1385_v33 = vmul.f32 1.442695, %v1357_v39 }
 0x438   :  { %v1414_v55 = vsel %vm524_vm2, %v5589_v0, 0.0 }
 0x439   :  { %1415 = vadd.xlane.f32.xlu1 %v1414_v55 }
 0x43c   :  { %v1341_v30 = vpop.xlane.xlu1 %1340 }
 0x43d   :  { %v1359_v43 = vsub.f32 %v5505_v2, %v1341_v30 }
 0x43f   :  { %v1389_v48 = vmul.f32 1.442695, %v1359_v43 }
 0x441   :  { %4361 = vpow2.f32 %v1389_v48 }
 0x447   :  { %v5594_v44 = vpop.eup %4361 }
 0x448   :  { %v1435_v41 = vsel %vm524_vm2, %v5594_v44, 0.0 }
 0x449   :  { %1436 = vadd.xlane.f32.xlu2 %v1435_v41 }
 0x44d   :  { %v1311_v12 = vpop.xlane.xlu2 %1310 }
 0x44e   :  { %v1349_v53 = vsub.f32 %v5516_v62, %v1311_v12 }
 0x450   :  { %v1369_v20 = vmul.f32 1.442695, %v1349_v53 }
 0x452   :  { %4363 = vpow2.f32 %v1369_v20 }
 0x453   :  { %4365 = vpow2.f32 %v1385_v33 }
 0x455   :  { %v1338_v55 = vpop.xlane.xlu2 %1337 }
 0x456   :  { %v1314_v34 = vpop.xlane.xlu0 %1313  ;;  %v1358_v43 = vsub.f32 %v5521_v11, %v1338_v55 }
 0x457   :  { %v1350_v2 = vsub.f32 %v5526_v61, %v1314_v34 }
 0x458   :  { %v5601_v30 = vpop.eup %4363  ;;  %v1387_v62 = vmul.f32 1.442695, %v1358_v43 }
 0x459   :  { %v1371_v48 = vmul.f32 1.442695, %v1350_v2  ;;  %v1405_v41 = vsel %vm524_vm2, %v5601_v30, 0.0  ;;  %v5606_v19 = vpop.eup %4365  ;;  %v1213_v2 = vpop.f32.mrf.mxu1 }
 0x45a   :  { %1406 = vadd.xlane.f32.xlu1 %v1405_v41  ;;  %v1429_v33 = vsel %vm524_vm2, %v5606_v19, 0.0  ;;  %v5632_v43 = vadd.f32 %v1213_v2, %v5473_v4  ;;  %v5638_v41 = vpop.permute.xlu1 %2223 }
 0x45b   :  { %4367 = vpow2.f32 %v1371_v48  ;;  %v5636_v48 = vadd.f32 %v5475_v5, %v5484_v60 }
 0x45c   :  { %4369 = vpow2.f32 %v1387_v62 }
 0x45d   :  { %v1344_v8 = vpop.xlane.xlu2 %1343 }
 0x45e   :  { %v1360_v20 = vsub.f32 %v5537_v37, %v1344_v8  ;;  %v1327_v8 = vsel %vm524_vm2, %v5632_v43, -inf }
 0x460   :  { %v1391_v12 = vmul.f32 1.442695, %v1360_v20  ;;  %v5644_v20 = vadd.f32 %v5469_v14, %v5473_v4  ;;  %v6915_v14 = vld [vmem:[#allocation44_spill] sm:$0xff] }
 0x461   :  { %v5609_v53 = vpop.eup %4367 }
 0x462   :  { %4371 = vpow2.f32 %v1391_v12  ;;  %1430 = vadd.xlane.f32.xlu1 %v1429_v33  ;;  %v1408_v34 = vsel %vm524_vm2, %v5609_v53, 0.0  ;;  %v5615_v11 = vpop.eup %4369  ;;  %v1306_v12 = vsel %vm524_vm2, %v5636_v48, -inf  ;;  %v1303_v5 = vsel %vm524_vm2, %v5644_v20, -inf }
 0x463   :  { %1409 = vadd.xlane.f32.xlu0 %v1408_v34  ;;  %v1432_v39 = vsel %vm524_vm2, %v5615_v11, 0.0  ;;  %v1216_v34 = vpop.f32.mrf.mxu1 }
 0x464   :  { %v5652_v2 = vadd.f32 %v1216_v34, %v5484_v60 }
 0x468   :  { %v5617_v61 = vpop.eup %4371 }
 0x469   :  { %v1438_v37 = vsel %vm524_vm2, %v5617_v61, 0.0  ;;  %v5629_v55 = vpop.permute.xlu0 %2141 }
 0x46a   :  { %1439 = vadd.xlane.f32.xlu2 %v1438_v37 }
 0x46b   :  { %1433 = vadd.xlane.f32.xlu0 %v1432_v39 }
 0x47b   :  { %2219 = vrot.lane.b32.xlu1 %v4865_v51, %s4691_s22 }
 0x47f   :  { %2217 = vrot.lane.b32.xlu0 %v4874_v52, %s4691_s22 }
 0x482   :  { %2221 = vrot.lane.b32.xlu2 %v4874_v52, %s4690_s21 }
 0x4a4   :  { %v1413_v62 = vpop.xlane.xlu0 %1412 }
 0x4a5   :  { %4373 = vrcp.f32 %v1413_v62  ;;  %1328 = vmax.xlane.f32.xlu1 %v1327_v8  ;;  %v1330_v62 = vsel %vm524_vm2, %v5652_v2, -inf }
 0x4a9   :  { %1307 = vmax.xlane.f32.xlu0 %v1306_v12  ;;  %v5661_v12 = vpop.permute.xlu2 %2258 }
 0x4ab   :  { %v4374_v33 = vpop.eup %4373  ;;  %1304 = vmax.xlane.f32.xlu2 %v1303_v5 }
 0x4ac   :  { %v1463_v37 = vmul.f32 %v4374_v33, %v5585_v6  ;;  %v1416_v39 = vpop.xlane.xlu1 %1415 }
 0x4ad   :  { %4375 = vrcp.f32 %v1416_v39 }
 0x4ae   :  { %3941 = vmatmul.msk.f32.vlgmr.msra.gmra.mxu3 %vm524_vm2, %v1463_v37 }
 0x4af   :  { %3987 = vmatpush.xpose.msk.msra.mxu3 %vm233_vm1, %v6915_v14 }
 0x4b3   :  { %v4376_v8 = vpop.eup %4375  ;;  %3988 = vmatpush.xpose.msk.msra.mxu3 %vm233_vm1, %v5421_v23  ;;  %1331 = vmax.xlane.f32.xlu2 %v1330_v62  ;;  %v6916_v23 = vld [vmem:[#allocation25_spill] sm:$0xff] }
 0x4b4   :  { %v1464_v6 = vmul.f32 %v4376_v8, %v5589_v0  ;;  %v6917_v0 = vld [vmem:[#allocation31_spill] sm:$0xff] }
 0x4b6   :  { %3942 = vmatmul.msk.f32.gmra.mxu3 %vm524_vm2, %v1464_v6 }
 0x4bc   :  { %v1437_v5 = vpop.xlane.xlu2 %1436 }
 0x4bd   :  { %4377 = vrcp.f32 %v1437_v5 }
 0x4c3   :  { %v4378_v33 = vpop.eup %4377 }
 0x4c4   :  { %v1471_v34 = vmul.f32 %v4378_v33, %v5594_v44 }
 0x4c6   :  { %3949 = vmatmul.msk.f32.vlgmr.msrb.gmra.mxu3 %vm524_vm2, %v1471_v34 }
 0x4c7   :  { %3995 = vmatpush.xpose.msk.msrb.mxu3 %vm233_vm1, %v5513_v59 }
 0x4cb   :  { %3996 = vmatpush.xpose.msk.msrb.mxu3 %vm233_vm1, %v5523_v3  ;;  %4192 = vrot.lane.b32.xlu2 %v6916_v23, %s4689_s20  ;;  %v6918_v3 = vld [vmem:[#allocation29_spill] sm:$0xff] }
 0x4cd   :  { %v1407_v37 = vpop.xlane.xlu1 %1406 }
 0x4ce   :  { %4379 = vrcp.f32 %v1407_v37 }
 0x4d3   :  { %4207 = vrot.lane.b32.xlu2 %v6917_v0, %s4692_s23 }
 0x4d4   :  { %v4380_v39 = vpop.eup %4379 }
 0x4d5   :  { %v1461_v44 = vmul.f32 %v4380_v39, %v5601_v30  ;;  %v1431_v59 = vpop.xlane.xlu1 %1430 }
 0x4d6   :  { %v1410_v14 = vpop.xlane.xlu0 %1409 }
 0x4d7   :  { %4381 = vrcp.f32 %v1410_v14  ;;  %3939 = vmatmul.msk.f32.vlgmr.msra.gmra.mxu2 %vm524_vm2, %v1461_v44 }
 0x4d8   :  { %3983 = vmatpush.xpose.msk.msra.mxu2 %vm233_vm1, %v5551_v46  ;;  %4383 = vrcp.f32 %v1431_v59 }
 0x4db   :  { %4222 = vrot.lane.b32.xlu2 %v6918_v3, %s4692_s23  ;;  %v5795_v3 = vadd.f32 %v5463_v15, %v5473_v4 }
 0x4dc   :  { %3984 = vmatpush.xpose.msk.msra.mxu2 %vm233_vm1, %v5528_v56 }
 0x4dd   :  { %v4382_v62 = vpop.eup %4381  ;;  %v1440_v8 = vpop.xlane.xlu2 %1439 }
 0x4de   :  { %4385 = vrcp.f32 %v1440_v8  ;;  %v1462_v30 = vmul.f32 %v4382_v62, %v5609_v53  ;;  %v1434_v6 = vpop.xlane.xlu0 %1433  ;;  %v4384_v5 = vpop.eup %4383  ;;  %v5797_v62 = vld [vmem:[#allocation7 + $0x28] sm:$0xff] }
 0x4df   :  { %4387 = vrcp.f32 %v1434_v6  ;;  %v1469_v56 = vmul.f32 %v4384_v5, %v5606_v19  ;;  %v1297_v5 = vsel %vm524_vm2, %v5795_v3, -inf }
 0x4e0   :  { %3940 = vmatmul.msk.f32.gmra.mxu2 %vm524_vm2, %v1462_v30 }
 0x4e3   :  { %2966 = vrot.lane.b32.xlu2 %v4793_v29, %s4693_s24 }
 0x4e4   :  { %v4386_v46 = vpop.eup %4385 }
 0x4e5   :  { %v1472_v33 = vmul.f32 %v4386_v46, %v5617_v61  ;;  %v4388_v53 = vpop.eup %4387  ;;  %v4196_v61 = vpack.i.bf16 %v4832_v42, %v4879_v54  ;;  %v5808_v46 = vadd.f32 %v5467_v17, %v5484_v60 }
 0x4e6   :  { %v1470_v34 = vmul.f32 %v4388_v53, %v5615_v11 }
 0x4e7   :  { %3950 = vmatmul.msk.f32.gmra.mxu3 %vm524_vm2, %v1472_v33  ;;  %v1300_v4 = vsel %vm524_vm2, %v5808_v46, -inf }
 0x4e8   :  { %3947 = vmatmul.msk.f32.vlgmr.msrb.gmra.mxu2 %vm524_vm2, %v1469_v56 }
 0x4e9   :  { %3991 = vmatpush.xpose.msk.msrb.mxu2 %vm233_vm1, %v5561_v10 }
 0x4eb   :  { %2927 = vrot.lane.b32.xlu2 %v4788_v26, %s4693_s24 }
 0x4ed   :  { %3992 = vmatpush.xpose.msk.msrb.mxu2 %vm233_vm1, %v5565_v35 }
 0x4ef   :  { %3989 = vmatmul.msk.f32.vlgmr.msra.gmra.mxu3 %vm233_vm1, %v5431_v7  ;;  %v2222_v7 = vpop.permute.xlu2 %2221 }
 0x4f0   :  { %3948 = vmatmul.msk.f32.gmra.mxu2 %vm524_vm2, %v1470_v34  ;;  %4003 = vmatpush.xpose.msk.msra.mxu3 %vm233_vm1, %v5553_v9 }
 0x4f3   :  { %3046 = vrot.lane.b32.xlu2 %v4825_v40, %s4693_s24 }
 0x4f4   :  { %4004 = vmatpush.xpose.msk.msra.mxu3 %vm233_vm1, %v5547_v47 }
 0x4f7   :  { %3990 = vmatmul.msk.f32.gmra.mxu3 %vm233_vm1, %v5511_v18 }
 0x4f8   :  { %3985 = vmatmul.msk.f32.vlgmr.msra.gmra.mxu2 %vm233_vm1, %v5545_v21 }
 0x4f9   :  { %3999 = vmatpush.xpose.msk.msra.mxu2 %vm233_vm1, %v5577_v27  ;;  %v2220_v27 = vpop.permute.xlu1 %2219 }
 0x4fd   :  { %4000 = vmatpush.xpose.msk.msra.mxu2 %vm233_vm1, %v5575_v1  ;;  %v2218_v1 = vpop.permute.xlu0 %2217 }
 0x4ff   :  { %3997 = vmatmul.msk.f32.vlgmr.msrb.gmra.mxu3 %vm233_vm1, %v5539_v49 }
 0x500   :  { %3986 = vmatmul.msk.f32.gmra.mxu2 %vm233_vm1, %v5559_v32  ;;  %4011 = vmatpush.xpose.msk.msrb.mxu3 %vm233_vm1, %v5571_v25 }
 0x504   :  { %4012 = vmatpush.xpose.msk.msrb.mxu3 %vm233_vm1, %v5573_v50 }
 0x507   :  { %3998 = vmatmul.msk.f32.gmra.mxu3 %vm233_vm1, %v5543_v16 }
 0x508   :  { %3993 = vmatmul.msk.f32.vlgmr.msrb.gmra.mxu2 %vm233_vm1, %v5567_v58 }
 0x509   :  { %4007 = vmatpush.xpose.msk.msrb.mxu2 %vm233_vm1, %v5638_v41  ;;  %v6922_v41 = vld [vmem:[#allocation23_spill] sm:$0xff] }
 0x50d   :  { %4008 = vmatpush.xpose.msk.msrb.mxu2 %vm233_vm1, %v2222_v7 }
 0x50f   :  { %4005 = vmatmul.msk.f32.vlgmr.msra.gmra.mxu3 %vm233_vm1, %v5555_v28 }
 0x510   :  { %3994 = vmatmul.msk.f32.gmra.mxu2 %vm233_vm1, %v5569_v57 }
 0x517   :  { %4006 = vmatmul.msk.f32.gmra.mxu3 %vm233_vm1, %v5563_v13 }
 0x518   :  { %4001 = vmatmul.msk.f32.vlgmr.msra.gmra.mxu2 %vm233_vm1, %v5582_v38  ;;  %v1329_v10 = vpop.xlane.xlu1 %1328 }
 0x519   :  { %v1355_v57 = vsub.f32 %v5632_v43, %v1329_v10  ;;  %v6920_v43 = vld [vmem:[#allocation30_spill] sm:$0xff] }
 0x51b   :  { %v1381_v38 = vmul.f32 1.442695, %v1355_v57 }
 0x51c   :  { %v1308_v50 = vpop.xlane.xlu0 %1307 }
 0x51d   :  { %v1348_v35 = vsub.f32 %v5636_v48, %v1308_v50 }
 0x51e   :  { %v1305_v25 = vpop.xlane.xlu2 %1304 }
 0x51f   :  { %v1367_v58 = vmul.f32 1.442695, %v1348_v35  ;;  %v1347_v18 = vsub.f32 %v5644_v20, %v1305_v25  ;;  %4013 = vmatmul.msk.f32.vlgmr.msrb.gmra.mxu3 %vm233_vm1, %v5579_v63 }
 0x520   :  { %4002 = vmatmul.msk.f32.gmra.mxu2 %vm233_vm1, %v5629_v55  ;;  %v6919_v55 = vld [vmem:[#allocation24_spill] sm:$0xff] }
 0x521   :  { %4389 = vpow2.f32 %v1367_v58  ;;  %v1365_v49 = vmul.f32 1.442695, %v1347_v18 }
 0x523   :  { %4391 = vpow2.f32 %v1365_v49 }
 0x524   :  { %4393 = vpow2.f32 %v1381_v38 }
 0x526   :  { %v5745_v16 = vpop.xlane.xlu2 %1331 }
 0x527   :  { %v5747_v21 = vpop.eup %4389  ;;  %4014 = vmatmul.msk.f32.gmra.mxu3 %vm233_vm1, %v5661_v12 }
 0x528   :  { %4009 = vmatmul.msk.f32.vlgmr.msrb.gmra.mxu2 %vm233_vm1, %v2218_v1  ;;  %v1402_v63 = vsel %vm524_vm2, %v5747_v21, 0.0 }
 0x529   :  { %v5754_v47 = vpop.eup %4391  ;;  %1403 = vadd.xlane.f32.xlu1 %v1402_v63  ;;  %v5852_v63 = vld [vmem:[#allocation7 + $0x20] sm:$0xff] }
 0x52a   :  { %v1399_v9 = vsel %vm524_vm2, %v5754_v47, 0.0  ;;  %v5758_v32 = vpop.eup %4393 }
 0x52b   :  { %1400 = vadd.xlane.f32.xlu0 %v1399_v9  ;;  %v1423_v11 = vsel %vm524_vm2, %v5758_v32, 0.0 }
 0x52e   :  { %v4193_v28 = vpop.permute.xlu2 %4192 }
 0x52f   :  { %v4194_v13 = vunpack.i.l.bf16 %v4193_v28  ;;  %v4195_v19 = vunpack.i.h.bf16 %v4193_v28 }
 0x530   :  { %4010 = vmatmul.msk.f32.gmra.mxu2 %vm233_vm1, %v2220_v27 }
 0x531   :  { %1534 = vmatpush.msra.mxu1 %v4194_v13  ;;  %v5772_v48 = vpop.f32.mrf.mxu3 }
 0x532   :  { %6921 = vst [vmem:[#allocation44_spill] sm:$0xff] %v5772_v48 }
 0x533   :  { %1535 = vmatpush.msra.mxu1 %v4195_v19  ;;  %1424 = vadd.xlane.f32.xlu0 %v1423_v11 }
 0x539   :  { %v5777_v20 = vpop.f32.mrf.mxu3 }
 0x53a   :  { %6923 = vst [vmem:[#allocation31_spill] sm:$0xff] %v5777_v20 }
 0x542   :  { %4197 = vrot.lane.b32.xlu1 %v4196_v61, %s4689_s20 }
 0x547   :  { %4212 = vrot.lane.b32.xlu0 %v6919_v55, %s4692_s23 }
 0x549   :  { %v5781_v37 = vpop.f32.mrf.mxu3 }
 0x54a   :  { %4202 = vrot.lane.b32.xlu1 %v6916_v23, %s4692_s23  ;;  %6925 = vst [vmem:[#allocation24_spill] sm:$0xff] %v5781_v37 }
 0x54f   :  { %4227 = vrot.lane.b32.xlu0 %v6920_v43, %s4692_s23 }
 0x552   :  { %4217 = vrot.lane.b32.xlu1 %v4196_v61, %s4692_s23  ;;  %v4208_v61 = vpop.permute.xlu2 %4207 }
 0x557   :  { %4232 = vrot.lane.b32.xlu0 %v6922_v41, %s4692_s23 }
 0x55a   :  { %v5779_v12 = vpop.f32.mrf.mxu2 }
 0x55b   :  { %6924 = vst [vmem:[#allocation29_spill] sm:$0xff] %v5779_v12 }
 0x563   :  { %v5783_v0 = vpop.f32.mrf.mxu2 }
 0x564   :  { %6926 = vst [vmem:[#allocation23_spill] sm:$0xff] %v5783_v0 }
 0x56a   :  { %v5785_v39 = vpop.f32.mrf.mxu3 }
 0x56b   :  { %6927 = vst [vmem:[#allocation52_spill] sm:$0xff] %v5785_v39  ;;  %v5787_v44 = vpop.f32.mrf.mxu2 }
 0x56c   :  { %6928 = vst [vmem:[#allocation53_spill] sm:$0xff] %v5787_v44 }
 0x572   :  { %v5789_v14 = vpop.f32.mrf.mxu3 }
 0x573   :  { %v5791_v59 = vpop.f32.mrf.mxu2 }
 0x574   :  { %6929 = vst [vmem:[#allocation54_spill] sm:$0xff] %v5791_v59 }
 0x57a   :  { %v2058_v8 = vpop.f32.mrf.mxu3 }
 0x57b   :  { %v5799_v30 = vpop.f32.mrf.mxu2  ;;  %v5802_v6 = vadd.f32 %v2058_v8, %v5797_v62 }
 0x57c   :  { %1298 = vmax.xlane.f32.xlu1 %v1297_v5 }
 0x57d   :  { %v2304_v15 = vsel %vm524_vm2, %v5802_v6, -inf }
 0x57e   :  { %2305 = vmax.xlane.f32.xlu2 %v2304_v15 }
 0x581   :  { %1301 = vmax.xlane.f32.xlu0 %v1300_v4 }
 0x582   :  { %v5814_v33 = vpop.f32.mrf.mxu3 }
 0x583   :  { %v5816_v56 = vpop.f32.mrf.mxu2 }
 0x58a   :  { %v5818_v53 = vpop.f32.mrf.mxu3 }
 0x58b   :  { %v5820_v34 = vpop.f32.mrf.mxu2 }
 0x592   :  { %v5822_v7 = vpop.f32.mrf.mxu3 }
 0x593   :  { %v5824_v17 = vpop.f32.mrf.mxu2 }
 0x595   :  { %2968 = vrot.lane.b32.xlu1 %v4798_v31, %s4693_s24  ;;  %4237 = vrot.lane.b32.xlu0 %v5341_v45, %s4692_s23 }
 0x59a   :  { %v2214_v60 = vpop.f32.mrf.mxu3 }
 0x59b   :  { %v5830_v1 = vpop.f32.mrf.mxu2  ;;  %v5833_v27 = vadd.f32 %v2214_v60, %v5797_v62  ;;  %v6930_v60 = vld [vmem:[#allocation19_spill] sm:$0xff] }
 0x59c   :  { %v1404_v10 = vpop.xlane.xlu1 %1403 }
 0x59d   :  { %2890 = vrot.lane.b32.xlu1 %v4783_v24, %s4693_s24  ;;  %3085 = vrot.lane.b32.xlu0 %v4879_v54, %s4693_s24  ;;  %v2328_v50 = vsel %vm524_vm2, %v5833_v27, -inf }
 0x59e   :  { %2329 = vmax.xlane.f32.xlu2 %v2328_v50  ;;  %v1401_v35 = vpop.xlane.xlu0 %1400 }
 0x59f   :  { %4395 = vrcp.f32 %v1401_v35 }
 0x5a0   :  { %4397 = vrcp.f32 %v1404_v10 }
 0x5a2   :  { %v2289_v38 = vpop.f32.mrf.mxu3 }
 0x5a3   :  { %v2175_v25 = vpop.f32.mrf.mxu2  ;;  %v5855_v9 = vadd.f32 %v2289_v38, %v5852_v63 }
 0x5a4   :  { %v5842_v58 = vadd.f32 %v2175_v25, %v5797_v62 }
 0x5a5   :  { %v4396_v18 = vpop.eup %4395  ;;  %2962 = vrot.lane.b32.xlu1 %v4793_v29, %s4694_s25  ;;  %2886 = vrot.lane.b32.xlu0 %v4783_v24, %s4694_s25 }
 0x5a6   :  { %v1459_v57 = vmul.f32 %v4396_v18, %v5754_v47  ;;  %v2322_v49 = vsel %vm524_vm2, %v5842_v58, -inf  ;;  %v4398_v28 = vpop.eup %4397  ;;  %v1425_v13 = vpop.xlane.xlu0 %1424  ;;  %v2337_v47 = vsel %vm524_vm2, %v5855_v9, -inf }
 0x5a7   :  { %2323 = vmax.xlane.f32.xlu2 %v2322_v49  ;;  %v1460_v19 = vmul.f32 %v4398_v28, %v5747_v21  ;;  %4399 = vrcp.f32 %v1425_v13  ;;  %v4223_v49 = vpop.permute.xlu2 %4222 }
 0x5a8   :  { %3937 = vmatmul.msk.f32.vlgmr.msra.gmra.mxu1 %vm524_vm2, %v1459_v57 }
 0x5aa   :  { %v2292_v50 = vpop.f32.mrf.mxu3 }
 0x5ab   :  { %v2250_v11 = vpop.f32.mrf.mxu2  ;;  %v5876_v18 = vadd.f32 %v2292_v50, %v5797_v62 }
 0x5ac   :  { %v5866_v8 = vadd.f32 %v2250_v11, %v5852_v63  ;;  %v4209_v11 = vunpack.i.l.bf16 %v4208_v61 }
 0x5ad   :  { %2888 = vrot.lane.b32.xlu1 %v4778_v22, %s4693_s24  ;;  %3007 = vrot.lane.b32.xlu0 %v4813_v36, %s4693_s24  ;;  %v4400_v15 = vpop.eup %4399 }
 0x5ae   :  { %v2331_v21 = vsel %vm524_vm2, %v5866_v8, -inf  ;;  %v1467_v10 = vmul.f32 %v4400_v15, %v5758_v32  ;;  %v4224_v32 = vunpack.i.l.bf16 %v4223_v49  ;;  %v4210_v15 = vunpack.i.h.bf16 %v4208_v61 }
 0x5af   :  { %2338 = vmax.xlane.f32.xlu2 %v2337_v47  ;;  %v2340_v47 = vsel %vm524_vm2, %v5876_v18, -inf  ;;  %v1356_v61 = vsub.f32 %v5652_v2, %v5745_v16 }
 0x5b0   :  { %3938 = vmatmul.msk.f32.gmra.mxu1 %vm524_vm2, %v1460_v19 }
 0x5b1   :  { %v1383_v50 = vmul.f32 1.442695, %v1356_v61 }
 0x5b3   :  { %4401 = vpow2.f32 %v1383_v50 }
 0x5b4   :  { %v4198_v5 = vpop.permute.xlu1 %4197 }
 0x5b5   :  { %v4199_v4 = vunpack.i.l.bf16 %v4198_v5  ;;  %2884 = vrot.lane.b32.xlu1 %v4778_v22, %s4694_s25  ;;  %3005 = vrot.lane.b32.xlu0 %v6930_v60, %s4693_s24  ;;  %v4200_v35 = vunpack.i.h.bf16 %v4198_v5  ;;  %v4225_v5 = vunpack.i.h.bf16 %v4223_v49 }
 0x5b7   :  { %2332 = vmax.xlane.f32.xlu2 %v2331_v21  ;;  %1674 = vmatpush.msrb.mxu1 %v4199_v4  ;;  %v6931_v4 = vld [vmem:[#allocation18_spill] sm:$0xff]  ;;  %v981_v21 = vld [vmem:[#allocation8] sm:$0xff] }
 0x5b9   :  { %1675 = vmatpush.msrb.mxu1 %v4200_v35  ;;  %v4213_v25 = vpop.permute.xlu0 %4212  ;;  %v5903_v35 = vpop.eup %4401 }
 0x5ba   :  { %3945 = vmatmul.msk.f32.vlgmr.msrb.gmra.mxu1 %vm524_vm2, %v1467_v10  ;;  %v4214_v57 = vunpack.i.l.bf16 %v4213_v25  ;;  %v4215_v38 = vunpack.i.h.bf16 %v4213_v25  ;;  %v1426_v10 = vsel %vm524_vm2, %v5903_v35, 0.0 }
 0x5bb   :  { %1930 = vmatpush.msra.mxu1 %v981_v21  ;;  %v5963_v21 = vadd.f32 %v5824_v17, %v5797_v62  ;;  %v5979_v17 = vadd.f32 %v5830_v1, %v5852_v63 }
 0x5bc   :  { %v4203_v28 = vpop.permute.xlu1 %4202  ;;  %2497 = vmatpush.msra.mxu2 %v4214_v57  ;;  %v5919_v57 = vadd.f32 %v5816_v56, %v5797_v62  ;;  %v5938_v56 = vadd.f32 %v5799_v30, %v5852_v63  ;;  %v5954_v30 = vadd.f32 %v5818_v53, %v5797_v62  ;;  %v5971_v53 = vadd.f32 %v5822_v7, %v5852_v63 }
 0x5bd   :  { %v4204_v13 = vunpack.i.l.bf16 %v4203_v28  ;;  %2964 = vrot.lane.b32.xlu1 %v4798_v31, %s4694_s25  ;;  %3001 = vrot.lane.b32.xlu0 %v6930_v60, %s4694_s25  ;;  %v4205_v19 = vunpack.i.h.bf16 %v4203_v28  ;;  %v6934_v31 = vld [vmem:[#allocation37_spill] sm:$0xff] }
 0x5be   :  { %2498 = vmatpush.msra.mxu2 %v4215_v38  ;;  %v2298_v38 = vsel %vm524_vm2, %v5919_v57, -inf }
 0x5bf   :  { %2341 = vmax.xlane.f32.xlu2 %v2340_v47  ;;  %2532 = vmatpush.msra.mxu3 %v4204_v13 }
 0x5c0   :  { %2567 = vmatpush.msrb.mxu2 %v4224_v32 }
 0x5c1   :  { %2533 = vmatpush.msra.mxu3 %v4205_v19  ;;  %v5921_v49 = vpop.permute.xlu0 %4227  ;;  %v5942_v19 = vadd.f32 %v5820_v34, %v5852_v63  ;;  %v2316_v34 = vsel %vm524_vm2, %v5954_v30, -inf }
 0x5c2   :  { %2568 = vmatpush.msrb.mxu2 %v4225_v5 }
 0x5c3   :  { %2602 = vmatpush.msrb.mxu3 %v4209_v11  ;;  %v2307_v5 = vsel %vm524_vm2, %v5942_v19, -inf }
 0x5c4   :  { %v5907_v25 = vpop.permute.xlu1 %4217 }
 0x5c5   :  { %2603 = vmatpush.msrb.mxu3 %v4210_v15  ;;  %3083 = vrot.lane.b32.xlu1 %v4832_v42, %s4693_s24 }
 0x5c6   :  { %2925 = vrot.lane.b32.xlu0 %v6931_v4, %s4694_s25 }
 0x5c9   :  { %v5931_v13 = vpop.permute.xlu0 %4232 }
 0x5cd   :  { %2929 = vrot.lane.b32.xlu1 %v6931_v4, %s4693_s24 }
 0x5ce   :  { %3124 = vrot.lane.b32.xlu0 %v4865_v51, %s4693_s24 }
 0x5d5   :  { %3079 = vrot.lane.b32.xlu1 %v4832_v42, %s4694_s25 }
 0x5dd   :  { %2923 = vrot.lane.b32.xlu1 %v4788_v26, %s4694_s25  ;;  %v5911_v26 = vadd.f32 %v5789_v14, %v5852_v63  ;;  %v5929_v14 = vadd.f32 %v5814_v33, %v5852_v63  ;;  %v2295_v33 = vsel %vm524_vm2, %v5938_v56, -inf }
 0x5df   :  { %v2301_v2 = vsel %vm524_vm2, %v5911_v26, -inf  ;;  %v2313_v32 = vsel %vm524_vm2, %v5929_v14, -inf }
 0x5e5   :  { %3081 = vrot.lane.b32.xlu1 %v4879_v54, %s4694_s25 }
 0x5ed   :  { %3003 = vrot.lane.b32.xlu1 %v4813_v36, %s4694_s25 }
 0x5ef   :  { %v5915_v16 = vpop.xlane.xlu1 %1298 }
 0x5f4   :  { %v5944_v11 = vpop.xlane.xlu0 %1301 }
 0x5f8   :  { %1427 = vadd.xlane.f32.xlu0 %v1426_v10  ;;  %v2310_v10 = vsel %vm524_vm2, %v5963_v21, -inf }
 0x600   :  { %2302 = vmax.xlane.f32.xlu0 %v2301_v2  ;;  %v2325_v2 = vsel %vm524_vm2, %v5971_v53, -inf }
 0x607   :  { %v5925_v28 = vpop.permute.xlu1 %2968  ;;  %v5956_v4 = vpop.permute.xlu0 %4237 }
 0x608   :  { %2299 = vmax.xlane.f32.xlu0 %v2298_v38 }
 0x60f   :  { %v2891_v47 = vpop.permute.xlu1 %2890  ;;  %v5965_v50 = vpop.permute.xlu0 %3085 }
 0x610   :  { %2314 = vmax.xlane.f32.xlu0 %v2313_v32  ;;  %4047 = vmatpush.xpose.msk.msrb.mxu1 %vm233_vm1, %v2891_v47  ;;  %v2319_v32 = vsel %vm524_vm2, %v5979_v17, -inf  ;;  %v2253_v47 = vpop.f32.mrf.mxu2 }
 0x617   :  { %2296 = vmax.xlane.f32.xlu1 %v2295_v33  ;;  %v5950_v15 = vpop.permute.xlu1 %2962  ;;  %v5975_v38 = vpop.permute.xlu0 %2886  ;;  %v5984_v33 = vadd.f32 %v2253_v47, %v5797_v62 }
 0x618   :  { %2308 = vmax.xlane.f32.xlu0 %v2307_v5 }
 0x61f   :  { %v2889_v61 = vpop.permute.xlu1 %2888  ;;  %v3008_v7 = vpop.permute.xlu0 %3007 }
 0x620   :  { %2317 = vmax.xlane.f32.xlu0 %v2316_v34  ;;  %4048 = vmatpush.xpose.msk.msrb.mxu1 %vm233_vm1, %v2889_v61  ;;  %v5988_v34 = vpop.permute.xlu2 %2966  ;;  %v2334_v61 = vsel %vm524_vm2, %v5984_v33, -inf }
 0x627   :  { %v5986_v5 = vpop.permute.xlu1 %2884 }
 0x628   :  { %2311 = vmax.xlane.f32.xlu0 %v2310_v10  ;;  %v3006_v10 = vpop.permute.xlu0 %3005  ;;  %v5994_v63 = vpop.permute.xlu2 %2927 }
 0x62f   :  { %v5992_v1 = vpop.permute.xlu1 %2964 }
 0x630   :  { %2326 = vmax.xlane.f32.xlu0 %v2325_v2  ;;  %v5996_v2 = vpop.permute.xlu0 %3001  ;;  %v6000_v62 = vpop.permute.xlu2 %3046 }
 0x638   :  { %2320 = vmax.xlane.f32.xlu0 %v2319_v32  ;;  %v5998_v32 = vpop.permute.xlu1 %3083  ;;  %v6002_v47 = vpop.permute.xlu0 %2925 }
 0x639   :  { %v2306_v43 = vpop.xlane.xlu2 %2305 }
 0x640   :  { %2335 = vmax.xlane.f32.xlu0 %v2334_v61  ;;  %v6004_v23 = vpop.permute.xlu1 %2929  ;;  %v6006_v39 = vpop.permute.xlu0 %3124 }
 0x641   :  { %v2330_v45 = vpop.xlane.xlu2 %2329 }
 0x648   :  { %v6008_v61 = vpop.permute.xlu1 %3079 }
 0x649   :  { %v6010_v59 = vpop.xlane.xlu2 %2323 }
 0x650   :  { %v6012_v44 = vpop.permute.xlu1 %2923 }
 0x651   :  { %v6017_v54 = vpop.xlane.xlu2 %2338 }
 0x658   :  { %v6019_v29 = vpop.permute.xlu1 %3081 }
 0x66b   :  { %v1428_v37 = vpop.xlane.xlu0 %1427 }
 0x66c   :  { %4403 = vrcp.f32 %v1428_v37  ;;  %v6932_v37 = vld [vmem:[#allocation33_spill] sm:$0xff] }
 0x672   :  { %v4404_v20 = vpop.eup %4403 }
 0x673   :  { %v2303_v48 = vpop.xlane.xlu0 %2302  ;;  %v1468_v0 = vmul.f32 %v4404_v20, %v5903_v35  ;;  %v2354_v20 = vsub.f32 %v5833_v27, %v2330_v45 }
 0x674   :  { %v2345_v12 = vsub.f32 %v5911_v26, %v2303_v48  ;;  %v6933_v26 = vld [vmem:[#allocation32_spill] sm:$0xff] }
 0x675   :  { %3946 = vmatmul.msk.f32.gmra.mxu1 %vm524_vm2, %v1468_v0 }
 0x676   :  { %v2363_v36 = vmul.f32 1.442695, %v2345_v12  ;;  %v2333_v12 = vpop.xlane.xlu2 %2332 }
 0x678   :  { %4405 = vpow2.f32 %v2363_v36  ;;  %v2381_v36 = vmul.f32 1.442695, %v2354_v20 }
 0x67b   :  { %v2300_v22 = vpop.xlane.xlu0 %2299 }
 0x67c   :  { %v2344_v42 = vsub.f32 %v5919_v57, %v2300_v22  ;;  %v6031_v22 = vpop.permute.xlu1 %3003 }
 0x67d   :  { %3967 = vmatmul.msk.f32.vlgmr.msra.gmra.mxu1 %vm233_vm1, %v6932_v37 }
 0x67e   :  { %v6024_v60 = vpop.eup %4405  ;;  %v2361_v35 = vmul.f32 1.442695, %v2344_v42  ;;  %4059 = vmatpush.xpose.msk.msra.mxu1 %vm233_vm1, %v3008_v7  ;;  %v2355_v42 = vsub.f32 %v5866_v8, %v2333_v12  ;;  %v2342_v7 = vpop.xlane.xlu2 %2341 }
 0x67f   :  { %v2397_v48 = vsel %vm524_vm2, %v6024_v60, 0.0  ;;  %v2358_v8 = vsub.f32 %v5876_v18, %v2342_v7 }
 0x680   :  { %4407 = vpow2.f32 %v2361_v35  ;;  %2398 = vadd.xlane.f32.xlu1 %v2397_v48  ;;  %v2383_v27 = vmul.f32 1.442695, %v2355_v42 }
 0x681   :  { %4409 = vpow2.f32 %v2381_v36 }
 0x682   :  { %4060 = vmatpush.xpose.msk.msra.mxu1 %vm233_vm1, %v3006_v10  ;;  %4411 = vpow2.f32 %v2383_v27 }
 0x683   :  { %v2315_v0 = vpop.xlane.xlu0 %2314 }
 0x684   :  { %v2349_v18 = vsub.f32 %v5929_v14, %v2315_v0 }
 0x685   :  { %3968 = vmatmul.msk.f32.gmra.mxu1 %vm233_vm1, %v6933_v26  ;;  %v2346_v26 = vsub.f32 %v5802_v6, %v2306_v43 }
 0x686   :  { %v6035_v57 = vpop.eup %4407 }
 0x687   :  { %v2394_v45 = vsel %vm524_vm2, %v6035_v57, 0.0  ;;  %v6040_v10 = vpop.eup %4409 }
 0x688   :  { %2395 = vadd.xlane.f32.xlu2 %v2394_v45  ;;  %v2424_v42 = vsel %vm524_vm2, %v6040_v10, 0.0  ;;  %v2365_v45 = vmul.f32 1.442695, %v2346_v26 }
 0x68a   :  { %v2297_v37 = vpop.xlane.xlu1 %2296 }
 0x68b   :  { %v2309_v20 = vpop.xlane.xlu0 %2308  ;;  %v2343_v35 = vsub.f32 %v5938_v56, %v2297_v37  ;;  %v2389_v56 = vmul.f32 1.442695, %v2358_v8  ;;  %v6936_v8 = vld [vmem:[#allocation48_spill] sm:$0xff] }
 0x68c   :  { %v2347_v48 = vsub.f32 %v5942_v19, %v2309_v20  ;;  %v6050_v19 = vpop.eup %4411 }
 0x68d   :  { %3969 = vmatmul.msk.f32.gmra.mxu1 %vm233_vm1, %v6934_v31  ;;  %v2359_v12 = vmul.f32 1.442695, %v2343_v35  ;;  %v6935_v31 = vld [vmem:[#allocation34_spill] sm:$0xff]  ;;  %v2427_v35 = vsel %vm524_vm2, %v6050_v19, 0.0 }
 0x68e   :  { %v2367_v36 = vmul.f32 1.442695, %v2347_v48  ;;  %v2371_v48 = vmul.f32 1.442695, %v2349_v18  ;;  %v6937_v18 = vld [vmem:[#allocation36_spill] sm:$0xff] }
 0x68f   :  { %4413 = vpow2.f32 %v2359_v12 }
 0x690   :  { %2425 = vadd.xlane.f32.xlu2 %v2424_v42  ;;  %4415 = vpow2.f32 %v2367_v36 }
 0x691   :  { %4417 = vpow2.f32 %v2365_v45 }
 0x692   :  { %4419 = vpow2.f32 %v2389_v56 }
 0x693   :  { %v2318_v37 = vpop.xlane.xlu0 %2317 }
 0x694   :  { %v2350_v43 = vsub.f32 %v5954_v30, %v2318_v37 }
 0x695   :  { %3970 = vmatmul.msk.f32.gmra.mxu1 %vm233_vm1, %v6935_v31  ;;  %v6055_v6 = vpop.eup %4413 }
 0x696   :  { %v2373_v27 = vmul.f32 1.442695, %v2350_v43  ;;  %v6058_v7 = vpop.eup %4415  ;;  %v2391_v20 = vsel %vm524_vm2, %v6055_v6, 0.0 }
 0x697   :  { %2392 = vadd.xlane.f32.xlu0 %v2391_v20  ;;  %v2403_v30 = vsel %vm524_vm2, %v6058_v7, 0.0  ;;  %v6066_v26 = vpop.eup %4417 }
 0x698   :  { %4421 = vpow2.f32 %v2373_v27  ;;  %2428 = vadd.xlane.f32.xlu2 %v2427_v35  ;;  %2404 = vadd.xlane.f32.xlu1 %v2403_v30  ;;  %v6068_v0 = vpop.eup %4419  ;;  %v2400_v42 = vsel %vm524_vm2, %v6066_v26, 0.0 }
 0x699   :  { %4423 = vpow2.f32 %v2371_v48  ;;  %v2436_v45 = vsel %vm524_vm2, %v6068_v0, 0.0  ;;  %v6938_v48 = vld [vmem:[#allocation38_spill] sm:$0xff] }
 0x69b   :  { %v2312_v14 = vpop.xlane.xlu0 %2311 }
 0x69c   :  { %v2348_v36 = vsub.f32 %v5963_v21, %v2312_v14 }
 0x69d   :  { %3971 = vmatmul.msk.f32.gmra.mxu1 %vm233_vm1, %v6936_v8 }
 0x69e   :  { %v6072_v12 = vpop.eup %4421  ;;  %v2369_v37 = vmul.f32 1.442695, %v2348_v36 }
 0x69f   :  { %v2412_v56 = vsel %vm524_vm2, %v6072_v12, 0.0  ;;  %2401 = vadd.xlane.f32.xlu0 %v2400_v42  ;;  %v6081_v31 = vpop.eup %4423  ;;  %v6939_v42 = vld [vmem:[#allocation47_spill] sm:$0xff] }
 0x6a0   :  { %2437 = vadd.xlane.f32.xlu2 %v2436_v45  ;;  %2413 = vadd.xlane.f32.xlu1 %v2412_v56  ;;  %4425 = vpow2.f32 %v2369_v37  ;;  %v2409_v27 = vsel %vm524_vm2, %v6081_v31, 0.0  ;;  %v2352_v45 = vsub.f32 %v5842_v58, %v6010_v59  ;;  %v6940_v37 = vld [vmem:[#allocation21_spill] sm:$0xff] }
 0x6a3   :  { %v2327_v43 = vpop.xlane.xlu0 %2326 }
 0x6a4   :  { %v2353_v21 = vsub.f32 %v5971_v53, %v2327_v43 }
 0x6a5   :  { %3972 = vmatmul.msk.f32.gmra.mxu1 %vm233_vm1, %v6937_v18  ;;  %v6941_v18 = vld [vmem:[#allocation45_spill] sm:$0xff] }
 0x6a6   :  { %v2379_v20 = vmul.f32 1.442695, %v2353_v21  ;;  %v6088_v30 = vpop.eup %4425  ;;  %v6942_v21 = vld [vmem:[#allocation43_spill] sm:$0xff] }
 0x6a7   :  { %2410 = vadd.xlane.f32.xlu0 %v2409_v27  ;;  %v2406_v8 = vsel %vm524_vm2, %v6088_v30, 0.0 }
 0x6a8   :  { %4427 = vpow2.f32 %v2379_v20 }
 0x6ab   :  { %v2321_v35 = vpop.xlane.xlu0 %2320 }
 0x6ac   :  { %v2351_v14 = vsub.f32 %v5979_v17, %v2321_v35  ;;  %v2377_v17 = vmul.f32 1.442695, %v2352_v45  ;;  %v6943_v35 = vld [vmem:[#allocation40_spill] sm:$0xff]  ;;  %v6126_v45 = vpop.f32.mrf.mxu1 }
 0x6ad   :  { %3973 = vmatmul.msk.f32.gmra.mxu1 %vm233_vm1, %v6938_v48 }
 0x6ae   :  { %v2375_v36 = vmul.f32 1.442695, %v2351_v14  ;;  %v6095_v53 = vpop.eup %4427  ;;  %v2357_v14 = vsub.f32 %v5855_v9, %v6017_v54 }
 0x6af   :  { %2407 = vadd.xlane.f32.xlu0 %v2406_v8  ;;  %v2421_v56 = vsel %vm524_vm2, %v6095_v53, 0.0 }
 0x6b0   :  { %4429 = vpow2.f32 %v2375_v36  ;;  %v6944_v36 = vld [vmem:[#allocation39_spill] sm:$0xff] }
 0x6b1   :  { %4431 = vpow2.f32 %v2377_v17 }
 0x6b3   :  { %v2336_v20 = vpop.xlane.xlu0 %2335 }
 0x6b4   :  { %v2356_v48 = vsub.f32 %v5984_v33, %v2336_v20  ;;  %v6138_v9 = vpop.f32.mrf.mxu1  ;;  %v6947_v20 = vld [vmem:[#allocation28_spill] sm:$0xff] }
 0x6b5   :  { %3974 = vmatmul.msk.f32.gmra.mxu1 %vm233_vm1, %v6939_v42  ;;  %v2387_v42 = vmul.f32 1.442695, %v2357_v14  ;;  %v6949_v14 = vld [vmem:[#allocation27_spill] sm:$0xff] }
 0x6b6   :  { %v6107_v43 = vpop.eup %4429  ;;  %v2385_v8 = vmul.f32 1.442695, %v2356_v48 }
 0x6b7   :  { %2422 = vadd.xlane.f32.xlu0 %v2421_v56  ;;  %v2415_v59 = vsel %vm524_vm2, %v6107_v43, 0.0  ;;  %v6113_v58 = vpop.eup %4431  ;;  %v1345_v56 = vsub.f32 %v5795_v3, %v5915_v16 }
 0x6b8   :  { %3122 = vrot.lane.b32.xlu2 %v4874_v52, %s4693_s24  ;;  %v2418_v27 = vsel %vm524_vm2, %v6113_v58, 0.0  ;;  %4433 = vpow2.f32 %v2385_v8  ;;  %v6950_v8 = vld [vmem:[#allocation51_spill] sm:$0xff] }
 0x6b9   :  { %3044 = vrot.lane.b32.xlu1 %v6940_v37, %s4693_s24  ;;  %4435 = vpow2.f32 %v2387_v42  ;;  %v1361_v17 = vmul.f32 1.442695, %v1345_v56 }
 0x6bb   :  { %4437 = vpow2.f32 %v1361_v17 }
 0x6bd   :  { %3975 = vmatmul.msk.f32.gmra.mxu1 %vm233_vm1, %v6941_v18  ;;  %v6945_v18 = vld [vmem:[#allocation46_spill] sm:$0xff] }
 0x6be   :  { %v6132_v33 = vpop.eup %4433 }
 0x6bf   :  { %2416 = vadd.xlane.f32.xlu0 %v2415_v59  ;;  %v6136_v54 = vpop.eup %4435  ;;  %v2430_v59 = vsel %vm524_vm2, %v6132_v33, 0.0 }
 0x6c0   :  { %v2433_v3 = vsel %vm524_vm2, %v6136_v54, 0.0 }
 0x6c1   :  { %v6146_v16 = vpop.eup %4437 }
 0x6c5   :  { %3976 = vmatmul.msk.f32.gmra.mxu1 %vm233_vm1, %v6942_v21  ;;  %v1393_v21 = vsel %vm524_vm2, %v6146_v16, 0.0 }
 0x6c7   :  { %2419 = vadd.xlane.f32.xlu0 %v2418_v27  ;;  %v6152_v27 = vpop.f32.mrf.mxu1 }
 0x6cd   :  { %3977 = vmatmul.msk.f32.gmra.mxu1 %vm233_vm1, %v6943_v35  ;;  %v6948_v35 = vld [vmem:[#allocation41_spill] sm:$0xff] }
 0x6d5   :  { %3978 = vmatmul.msk.f32.gmra.mxu1 %vm233_vm1, %v6944_v36 }
 0x6db   :  { %3040 = vrot.lane.b32.xlu0 %v6940_v37, %s4694_s25  ;;  %v6946_v37 = vld [vmem:[#allocation49_spill] sm:$0xff] }
 0x6dd   :  { %3979 = vmatmul.msk.f32.gmra.mxu1 %vm233_vm1, %v6945_v18  ;;  %v4219_v18 = vunpack.i.l.bf16 %v5907_v25 }
 0x6e1   :  { %2431 = vadd.xlane.f32.xlu2 %v2430_v59  ;;  %v4220_v59 = vunpack.i.h.bf16 %v5907_v25 }
 0x6e3   :  { %2434 = vadd.xlane.f32.xlu1 %v2433_v3  ;;  %3042 = vrot.lane.b32.xlu0 %v4825_v40, %s4694_s25 }
 0x6e5   :  { %3980 = vmatmul.msk.f32.gmra.mxu1 %vm233_vm1, %v6946_v37 }
 0x6e9   :  { %1394 = vadd.xlane.f32.xlu2 %v1393_v21 }
 0x6eb   :  { %3163 = vrot.lane.b32.xlu0 %v6947_v20, %s4693_s24 }
 0x6ed   :  { %3981 = vmatmul.msk.f32.gmra.mxu1 %vm233_vm1, %v6948_v35 }
 0x6f2   :  { %v6158_v48 = vpop.f32.mrf.mxu1 }
 0x6f3   :  { %v2399_v40 = vpop.xlane.xlu1 %2398  ;;  %3161 = vrot.lane.b32.xlu0 %v6949_v14, %s4693_s24 }
 0x6f4   :  { %4439 = vrcp.f32 %v2399_v40 }
 0x6f5   :  { %3982 = vmatmul.msk.f32.gmra.mxu1 %vm233_vm1, %v6950_v8 }
 0x6fa   :  { %v4440_v36 = vpop.eup %4439  ;;  %v6164_v42 = vpop.f32.mrf.mxu1 }
 0x6fb   :  { %v2457_v56 = vmul.f32 %v4440_v36, %v6024_v60  ;;  %v2396_v17 = vpop.xlane.xlu2 %2395  ;;  %3157 = vrot.lane.b32.xlu0 %v6949_v14, %s4694_s25 }
 0x6fc   :  { %3118 = vrot.lane.b32.xlu1 %v4874_v52, %s4694_s25 }
 0x6fd   :  { %4017 = vmatmul.msk.f32.vlgmr.msra.gmra.mxu3 %vm524_vm2, %v2457_v56  ;;  %4049 = vmatmul.msk.f32.vlgmr.msrb.gmra.mxu1 %vm233_vm1, %v5986_v5 }
 0x6fe   :  { %2672 = vmatpush.msra.mxu3 %v4219_v18  ;;  %4071 = vmatpush.xpose.msk.msrb.mxu1 %vm233_vm1, %v6006_v39  ;;  %v4549_v18 = vld [vmem:[#allocation7 + $0x10] sm:$0xff] }
 0x700   :  { %2673 = vmatpush.msra.mxu3 %v4220_v59  ;;  %v6951_v59 = vld [vmem:[#allocation42_spill] sm:$0xff] }
 0x701   :  { %3159 = vrot.lane.b32.xlu2 %v6947_v20, %s4694_s25  ;;  %v4234_v20 = vunpack.i.l.bf16 %v5931_v13 }
 0x702   :  { %v6180_v60 = vpop.f32.mrf.mxu1 }
 0x703   :  { %v6182_v3 = vpop.xlane.xlu2 %2425 }
 0x704   :  { %3120 = vrot.lane.b32.xlu1 %v4865_v51, %s4694_s25 }
 0x705   :  { %4050 = vmatmul.msk.f32.gmra.mxu1 %vm233_vm1, %v5975_v38 }
 0x70a   :  { %v6188_v52 = vpop.f32.mrf.mxu1  ;;  %v2393_v25 = vpop.xlane.xlu0 %2392 }
 0x70b   :  { %v6190_v5 = vpop.xlane.xlu2 %2428  ;;  %4441 = vrcp.f32 %v2393_v25  ;;  %v2405_v35 = vpop.xlane.xlu1 %2404  ;;  %v6214_v25 = vadd.f32 %v4549_v18, %v6951_v59  ;;  %v6952_v18 = vld [vmem:[#allocation35_spill] sm:$0xff] }
 0x70c   :  { %4242 = vrot.lane.b32.xlu1 %v6919_v55, %s4689_s20  ;;  %4443 = vrcp.f32 %v2396_v17  ;;  %v4235_v55 = vunpack.i.h.bf16 %v5931_v13 }
 0x70d   :  { %4061 = vmatmul.msk.f32.vlgmr.msra.gmra.mxu1 %vm233_vm1, %v5996_v2 }
 0x711   :  { %v4442_v39 = vpop.eup %4441 }
 0x712   :  { %v6196_v37 = vpop.f32.mrf.mxu1  ;;  %v2455_v51 = vmul.f32 %v4442_v39, %v6055_v6  ;;  %v2402_v21 = vpop.xlane.xlu0 %2401 }
 0x713   :  { %v6199_v38 = vpop.xlane.xlu2 %2437  ;;  %4445 = vrcp.f32 %v2402_v21  ;;  %v4444_v2 = vpop.eup %4443  ;;  %v4229_v21 = vunpack.i.l.bf16 %v5921_v49 }
 0x714   :  { %4015 = vmatmul.msk.f32.vlgmr.msra.gmra.mxu2 %vm524_vm2, %v2455_v51  ;;  %4447 = vrcp.f32 %v2405_v35  ;;  %v2456_v36 = vmul.f32 %v4444_v2, %v6035_v57  ;;  %v2414_v13 = vpop.xlane.xlu1 %2413  ;;  %v1346_v35 = vsub.f32 %v5808_v46, %v5944_v11  ;;  %v4240_v2 = vunpack.i.h.bf16 %v5956_v4 }
 0x715   :  { %2637 = vmatpush.msra.mxu2 %v4234_v20  ;;  %4062 = vmatmul.msk.f32.gmra.mxu1 %vm233_vm1, %v6031_v22  ;;  %v4239_v20 = vunpack.i.l.bf16 %v5956_v4 }
 0x717   :  { %2638 = vmatpush.msra.mxu2 %v4235_v55  ;;  %v4230_v55 = vunpack.i.h.bf16 %v5921_v49 }
 0x719   :  { %v4446_v40 = vpop.eup %4445 }
 0x71a   :  { %v6206_v6 = vpop.f32.mrf.mxu1  ;;  %v2411_v14 = vpop.xlane.xlu0 %2410  ;;  %v2458_v56 = vmul.f32 %v4446_v40, %v6066_v26  ;;  %v1363_v40 = vmul.f32 1.442695, %v1346_v35 }
 0x71b   :  { %v3123_v8 = vpop.permute.xlu2 %3122  ;;  %4449 = vrcp.f32 %v2411_v14  ;;  %v4448_v22 = vpop.eup %4447 }
 0x71c   :  { %4072 = vmatpush.xpose.msk.msrb.mxu1 %vm233_vm1, %v3123_v8  ;;  %4016 = vmatmul.msk.f32.gmra.mxu2 %vm524_vm2, %v2456_v36  ;;  %4451 = vrcp.f32 %v2414_v13  ;;  %v2459_v57 = vmul.f32 %v4448_v22, %v6058_v7  ;;  %v1321_v7 = vsel %vm524_vm2, %v6214_v25, -inf }
 0x71d   :  { %4018 = vmatmul.msk.f32.gmra.mxu3 %vm524_vm2, %v2458_v56 }
 0x721   :  { %v4450_v17 = vpop.eup %4449 }
 0x722   :  { %v6216_v39 = vpop.f32.mrf.mxu1  ;;  %v2461_v26 = vmul.f32 %v4450_v17, %v6081_v31  ;;  %v2408_v51 = vpop.xlane.xlu0 %2407 }
 0x723   :  { %4453 = vrcp.f32 %v2408_v51  ;;  %v4452_v31 = vpop.eup %4451 }
 0x724   :  { %4019 = vmatmul.msk.f32.vlgmr.msrb.gmra.mxu2 %vm524_vm2, %v2459_v57  ;;  %v2462_v49 = vmul.f32 %v4452_v31, %v6072_v12 }
 0x725   :  { %4021 = vmatmul.msk.f32.vlgmr.msrb.gmra.mxu3 %vm524_vm2, %v2461_v26  ;;  %2707 = vmatpush.msrb.mxu2 %v4239_v20 }
 0x726   :  { %2742 = vmatpush.msrb.mxu3 %v4229_v21  ;;  %1322 = vmax.xlane.f32.xlu0 %v1321_v7 }
 0x727   :  { %2708 = vmatpush.msrb.mxu2 %v4240_v2 }
 0x728   :  { %2743 = vmatpush.msrb.mxu3 %v4230_v55 }
 0x729   :  { %v4454_v14 = vpop.eup %4453 }
 0x72a   :  { %v6230_v46 = vpop.f32.mrf.mxu1  ;;  %v2423_v11 = vpop.xlane.xlu0 %2422  ;;  %v2460_v8 = vmul.f32 %v4454_v14, %v6088_v30 }
 0x72b   :  { %4455 = vrcp.f32 %v2423_v11  ;;  %v3045_v35 = vpop.permute.xlu1 %3044 }
 0x72c   :  { %4457 = vpow2.f32 %v1363_v40  ;;  %4020 = vmatmul.msk.f32.gmra.mxu2 %vm524_vm2, %v2460_v8 }
 0x72d   :  { %4022 = vmatmul.msk.f32.gmra.mxu3 %vm524_vm2, %v2462_v49  ;;  %4459 = vrcp.f32 %v6182_v3  ;;  %v4550_v3 = vld [vmem:[#allocation7 + $0x18] sm:$0xff] }
 0x72e   :  { %v6248_v59 = vadd.f32 %v4550_v3, %v6952_v18 }
 0x730   :  { %v1324_v51 = vsel %vm524_vm2, %v6248_v59, -inf }
 0x731   :  { %v4456_v4 = vpop.eup %4455 }
 0x732   :  { %v6237_v36 = vpop.f32.mrf.mxu1  ;;  %v6239_v56 = vpop.eup %4457  ;;  %v2465_v13 = vmul.f32 %v4456_v4, %v6095_v53 }
 0x733   :  { %v2417_v22 = vpop.xlane.xlu0 %2416  ;;  %v1396_v12 = vsel %vm524_vm2, %v6239_v56, 0.0  ;;  %v4460_v30 = vpop.eup %4459 }
 0x734   :  { %4461 = vrcp.f32 %v2417_v22 }
 0x735   :  { %4025 = vmatmul.msk.f32.vlgmr.msra.gmra.mxu3 %vm524_vm2, %v2465_v13 }
 0x736   :  { %4055 = vmatpush.xpose.msk.msra.mxu3 %vm233_vm1, %v5925_v28  ;;  %1397 = vadd.xlane.f32.xlu1 %v1396_v12  ;;  %v2466_v28 = vmul.f32 %v4460_v30, %v6040_v10 }
 0x73a   :  { %v4462_v17 = vpop.eup %4461  ;;  %4056 = vmatpush.xpose.msk.msra.mxu3 %vm233_vm1, %v5988_v34  ;;  %v6252_v53 = vpop.f32.mrf.mxu1 }
 0x73b   :  { %v2463_v57 = vmul.f32 %v4462_v17, %v6107_v43  ;;  %v2420_v26 = vpop.xlane.xlu0 %2419 }
 0x73c   :  { %4463 = vrcp.f32 %v2420_v26  ;;  %v6954_v26 = vld [vmem:[#allocation17_spill] sm:$0xff] }
 0x73d   :  { %4023 = vmatmul.msk.f32.vlgmr.msra.gmra.mxu2 %vm524_vm2, %v2463_v57  ;;  %4026 = vmatmul.msk.f32.gmra.mxu3 %vm524_vm2, %v2466_v28  ;;  %4465 = vrcp.f32 %v6190_v5  ;;  %v4251_v28 = vpack.i.bf16 %v6954_v26, %v4783_v24 }
 0x73e   :  { %4051 = vmatpush.xpose.msk.msra.mxu2 %vm233_vm1, %v6004_v23  ;;  %1325 = vmax.xlane.f32.xlu1 %v1324_v51 }
 0x742   :  { %v4464_v34 = vpop.eup %4463  ;;  %4052 = vmatpush.xpose.msk.msra.mxu2 %vm233_vm1, %v5994_v63  ;;  %v6265_v43 = vpop.f32.mrf.mxu1 }
 0x743   :  { %v2464_v10 = vmul.f32 %v4464_v34, %v6113_v58  ;;  %v4466_v21 = vpop.eup %4465 }
 0x744   :  { %v2467_v23 = vmul.f32 %v4466_v21, %v6050_v19 }
 0x745   :  { %4024 = vmatmul.msk.f32.gmra.mxu2 %vm524_vm2, %v2464_v10  ;;  %v6336_v10 = vld [vmem:[#allocation7 + $0x30] sm:$0xff] }
 0x74a   :  { %v6269_v20 = vpop.f32.mrf.mxu1 }
 0x74d   :  { %4027 = vmatmul.msk.f32.vlgmr.msrb.gmra.mxu2 %vm524_vm2, %v2467_v23  ;;  %v3041_v5 = vpop.permute.xlu0 %3040 }
 0x74e   :  { %4063 = vmatpush.xpose.msk.msrb.mxu2 %vm233_vm1, %v6000_v62 }
 0x752   :  { %4064 = vmatpush.xpose.msk.msrb.mxu2 %vm233_vm1, %v3045_v35  ;;  %v6276_v63 = vpop.f32.mrf.mxu1 }
 0x754   :  { %v2432_v55 = vpop.xlane.xlu2 %2431 }
 0x755   :  { %4467 = vrcp.f32 %v2432_v55  ;;  %v3043_v58 = vpop.permute.xlu0 %3042 }
 0x756   :  { %v2435_v2 = vpop.xlane.xlu1 %2434 }
 0x757   :  { %4469 = vrcp.f32 %v2435_v2  ;;  %4247 = vrot.lane.b32.xlu1 %v6922_v41, %s4689_s20 }
 0x758   :  { %4471 = vrcp.f32 %v6199_v38 }
 0x75a   :  { %v6280_v19 = vpop.f32.mrf.mxu1 }
 0x75b   :  { %v4468_v7 = vpop.eup %4467 }
 0x75c   :  { %v2468_v31 = vmul.f32 %v4468_v7, %v6132_v33 }
 0x75d   :  { %v4470_v62 = vpop.eup %4469  ;;  %v3164_v14 = vpop.permute.xlu0 %3163 }
 0x75e   :  { %4028 = vmatmul.msk.f32.gmra.mxu2 %vm524_vm2, %v2468_v31  ;;  %v2469_v40 = vmul.f32 %v4470_v62, %v6136_v54  ;;  %v4472_v8 = vpop.eup %4471 }
 0x75f   :  { %v2470_v33 = vmul.f32 %v4472_v8, %v6068_v0 }
 0x760   :  { %4029 = vmatmul.msk.f32.vlgmr.msrb.gmra.mxu3 %vm524_vm2, %v2469_v40 }
 0x761   :  { %4067 = vmatpush.xpose.msk.msrb.mxu3 %vm233_vm1, %v5965_v50 }
 0x762   :  { %v6289_v11 = vpop.f32.mrf.mxu1 }
 0x765   :  { %4068 = vmatpush.xpose.msk.msrb.mxu3 %vm233_vm1, %v5998_v32  ;;  %v3162_v54 = vpop.permute.xlu0 %3161  ;;  %v1395_v32 = vpop.xlane.xlu2 %1394 }
 0x766   :  { %4053 = vmatmul.msk.f32.vlgmr.msra.gmra.mxu2 %vm233_vm1, %v6012_v44  ;;  %4473 = vrcp.f32 %v1395_v32  ;;  %v6956_v32 = vld [vmem:[#allocation22_spill] sm:$0xff] }
 0x767   :  { %4075 = vmatpush.xpose.msk.msra.mxu2 %vm233_vm1, %v3164_v14 }
 0x768   :  { %4030 = vmatmul.msk.f32.gmra.mxu3 %vm524_vm2, %v2470_v33 }
 0x76a   :  { %v6298_v38 = vpop.f32.mrf.mxu1 }
 0x76b   :  { %4076 = vmatpush.xpose.msk.msra.mxu2 %vm233_vm1, %v3162_v54 }
 0x76c   :  { %v4474_v4 = vpop.eup %4473 }
 0x76d   :  { %v1457_v30 = vmul.f32 %v4474_v4, %v6146_v16 }
 0x76e   :  { %4054 = vmatmul.msk.f32.gmra.mxu2 %vm233_vm1, %v6002_v47  ;;  %v3119_v50 = vpop.permute.xlu1 %3118 }
 0x76f   :  { %4073 = vmatmul.msk.f32.vlgmr.msrb.gmra.mxu1 %vm233_vm1, %v3119_v50  ;;  %v6955_v50 = vld [vmem:[#allocation19_spill] sm:$0xff] }
 0x770   :  { %4057 = vmatmul.msk.f32.vlgmr.msra.gmra.mxu3 %vm233_vm1, %v5950_v15  ;;  %v6315_v15 = vld [vmem:[#allocation7 + $0x38] sm:$0xff] }
 0x772   :  { %v6306_v44 = vpop.f32.mrf.mxu1 }
 0x773   :  { %6953 = vst [vmem:[#allocation18_spill] sm:$0xff] %v6306_v44 }
 0x776   :  { %4065 = vmatmul.msk.f32.vlgmr.msrb.gmra.mxu2 %vm233_vm1, %v3041_v5  ;;  %v3121_v0 = vpop.permute.xlu1 %3120 }
 0x777   :  { %4074 = vmatmul.msk.f32.gmra.mxu1 %vm233_vm1, %v3121_v0  ;;  %v4266_v0 = vpack.i.bf16 %v6956_v32, %v6955_v50 }
 0x778   :  { %4058 = vmatmul.msk.f32.gmra.mxu3 %vm233_vm1, %v5992_v1  ;;  %v3158_v1 = vpop.permute.xlu0 %3157 }
 0x77a   :  { %v2917_v49 = vpop.f32.mrf.mxu1 }
 0x77b   :  { %v6351_v31 = vadd.f32 %v2917_v49, %v6336_v10 }
 0x77d   :  { %v3196_v62 = vsel %vm524_vm2, %v6351_v31, -inf }
 0x77e   :  { %4066 = vmatmul.msk.f32.gmra.mxu2 %vm233_vm1, %v3043_v58  ;;  %v4243_v47 = vpop.permute.xlu1 %4242 }
 0x77f   :  { %v4244_v13 = vunpack.i.l.bf16 %v4243_v47  ;;  %v4245_v22 = vunpack.i.h.bf16 %v4243_v47 }
 0x780   :  { %4069 = vmatmul.msk.f32.vlgmr.msrb.gmra.mxu3 %vm233_vm1, %v6008_v61  ;;  %v3160_v61 = vpop.permute.xlu2 %3159  ;;  %v6360_v54 = vpop.f32.mrf.mxu3 }
 0x781   :  { %1499 = vmatpush.msrb.mxu0 %v4244_v13 }
 0x782   :  { %v2920_v12 = vpop.f32.mrf.mxu1 }
 0x783   :  { %v6319_v17 = vadd.f32 %v2920_v12, %v6315_v15  ;;  %1500 = vmatpush.msrb.mxu0 %v4245_v22 }
 0x784   :  { %3935 = vmatmul.msk.f32.vlgmr.msrb.gmra.mxu0 %vm524_vm2, %v1457_v30 }
 0x785   :  { %v3199_v3 = vsel %vm524_vm2, %v6319_v17, -inf }
 0x786   :  { %4077 = vmatmul.msk.f32.vlgmr.msra.gmra.mxu2 %vm233_vm1, %v3158_v1  ;;  %3200 = vmax.xlane.f32.xlu1 %v3199_v3 }
 0x788   :  { %4070 = vmatmul.msk.f32.gmra.mxu3 %vm233_vm1, %v6019_v29 }
 0x78a   :  { %v3034_v29 = vpop.f32.mrf.mxu1 }
 0x78b   :  { %v6339_v21 = vadd.f32 %v3034_v29, %v6336_v10 }
 0x78d   :  { %v3214_v24 = vsel %vm524_vm2, %v6339_v21, -inf }
 0x78e   :  { %4078 = vmatmul.msk.f32.gmra.mxu2 %vm233_vm1, %v3160_v61 }
 0x792   :  { %v3037_v40 = vpop.f32.mrf.mxu1 }
 0x797   :  { %v6374_v30 = vpop.f32.mrf.mxu2 }
 0x799   :  { %v1323_v16 = vpop.xlane.xlu0 %1322 }
 0x79a   :  { %v1353_v18 = vsub.f32 %v6214_v25, %v1323_v16 }
 0x79c   :  { %v1377_v57 = vmul.f32 1.442695, %v1353_v18 }
 0x79e   :  { %4475 = vpow2.f32 %v1377_v57 }
 0x79f   :  { %4252 = vrot.lane.b32.xlu1 %v4251_v28, %s4695_s26  ;;  %v6383_v16 = vpop.f32.mrf.mxu2  ;;  %v6957_v28 = vld [vmem:[#allocation15_spill] sm:$0xff] }
 0x7a0   :  { %v6365_v49 = vpop.f32.mrf.mxu3 }
 0x7a4   :  { %v6332_v51 = vpop.eup %4475 }
 0x7a5   :  { %v1417_v34 = vsel %vm524_vm2, %v6332_v51, 0.0 }
 0x7a6   :  { %1418 = vadd.xlane.f32.xlu2 %v1417_v34  ;;  %v6958_v34 = vld [vmem:[#allocation16_spill] sm:$0xff] }
 0x7a7   :  { %v6387_v57 = vpop.f32.mrf.mxu2  ;;  %v4256_v29 = vpack.i.bf16 %v6958_v34, %v6957_v28 }
 0x7a8   :  { %v6372_v22 = vpop.f32.mrf.mxu3 }
 0x7a9   :  { %v1398_v25 = vpop.xlane.xlu1 %1397 }
 0x7aa   :  { %4477 = vrcp.f32 %v1398_v25 }
 0x7ae   :  { %3215 = vmax.xlane.f32.xlu2 %v3214_v24 }
 0x7b0   :  { %v4478_v23 = vpop.eup %4477  ;;  %v6381_v61 = vpop.f32.mrf.mxu3 }
 0x7b1   :  { %v1326_v5 = vpop.xlane.xlu1 %1325  ;;  %v1458_v35 = vmul.f32 %v4478_v23, %v6239_v56  ;;  %v6356_v56 = vadd.f32 %v3037_v40, %v6315_v15 }
 0x7b2   :  { %v1354_v55 = vsub.f32 %v6248_v59, %v1326_v5 }
 0x7b3   :  { %3936 = vmatmul.msk.f32.gmra.mxu0 %vm524_vm2, %v1458_v35  ;;  %v3217_v33 = vsel %vm524_vm2, %v6356_v56, -inf  ;;  %v6394_v35 = vpop.f32.mrf.mxu2 }
 0x7b4   :  { %v1379_v58 = vmul.f32 1.442695, %v1354_v55  ;;  %v6959_v55 = vld [vmem:[#allocation20_spill] sm:$0xff] }
 0x7b6   :  { %4479 = vpow2.f32 %v1379_v58  ;;  %v6960_v58 = vld [vmem:[#allocation26_spill] sm:$0xff] }
 0x7b8   :  { %v6385_v18 = vpop.f32.mrf.mxu3 }
 0x7bc   :  { %v6346_v2 = vpop.eup %4479 }
 0x7bd   :  { %v1420_v7 = vsel %vm524_vm2, %v6346_v2, 0.0 }
 0x7be   :  { %1421 = vadd.xlane.f32.xlu0 %v1420_v7  ;;  %v4261_v7 = vpack.i.bf16 %v6960_v58, %v6959_v55 }
 0x7c0   :  { %v6391_v25 = vpop.f32.mrf.mxu3 }
 0x7c6   :  { %3197 = vmax.xlane.f32.xlu0 %v3196_v62 }
 0x7c9   :  { %v4248_v59 = vpop.permute.xlu1 %4247 }
 0x7ca   :  { %v4249_v14 = vunpack.i.l.bf16 %v4248_v59  ;;  %v4250_v8 = vunpack.i.h.bf16 %v4248_v59  ;;  %v6401_v59 = vpop.f32.mrf.mxu2 }
 0x7cc   :  { %1639 = vmatpush.msra.mxu0 %v4249_v14 }
 0x7ce   :  { %3218 = vmax.xlane.f32.xlu0 %v3217_v33  ;;  %1640 = vmatpush.msra.mxu0 %v4250_v8 }
 0x7e2   :  { %4267 = vrot.lane.b32.xlu0 %v4266_v0, %s4695_s26  ;;  %v1753_v0 = vld [vmem:[#allocation8 + $0x8] sm:$0xff] }
 0x7e3   :  { %v6398_v62 = vpop.f32.mrf.mxu3  ;;  %1817 = vmatpush.msrb.mxu0 %v1753_v0 }
 0x7eb   :  { %v6403_v8 = vpop.f32.mrf.mxu3 }
 0x7ec   :  { %v3151_v47 = vpop.f32.mrf.mxu1 }
 0x7ed   :  { %v6368_v4 = vadd.f32 %v3151_v47, %v6336_v10 }
 0x7ef   :  { %v3232_v13 = vsel %vm524_vm2, %v6368_v4, -inf }
 0x7f0   :  { %3233 = vmax.xlane.f32.xlu2 %v3232_v13  ;;  %v6408_v13 = vpop.f32.mrf.mxu2 }
 0x7f4   :  { %v3154_v12 = vpop.f32.mrf.mxu1 }
 0x7f5   :  { %v6377_v1 = vadd.f32 %v3154_v12, %v6315_v15  ;;  %v2995_v12 = vpop.f32.mrf.mxu3 }
 0x7f7   :  { %v3235_v3 = vsel %vm524_vm2, %v6377_v1, -inf }
 0x7f8   :  { %3236 = vmax.xlane.f32.xlu2 %v3235_v3  ;;  %v6414_v34 = vpop.f32.mrf.mxu2 }
 0x7f9   :  { %v3201_v26 = vpop.xlane.xlu1 %3200 }
 0x810   :  { %4257 = vrot.lane.b32.xlu2 %v4256_v29, %s4695_s26 }
 0x811   :  { %v4253_v24 = vpop.permute.xlu1 %4252 }
 0x812   :  { %v4255_v23 = vunpack.i.h.bf16 %v4253_v24  ;;  %v4254_v5 = vunpack.i.l.bf16 %v4253_v24  ;;  %v2998_v24 = vpop.f32.mrf.mxu3 }
 0x814   :  { %3398 = vmatpush.msra.mxu3 %v4254_v5  ;;  %3468 = vmatpush.msrb.mxu2 %v4255_v23  ;;  %v6417_v23 = vpop.f32.mrf.mxu2 }
 0x818   :  { %4262 = vrot.lane.b32.xlu2 %v4261_v7, %s4695_s26 }
 0x819   :  { %v1419_v40 = vpop.xlane.xlu2 %1418 }
 0x81a   :  { %4481 = vrcp.f32 %v1419_v40 }
 0x820   :  { %v4482_v14 = vpop.eup %4481 }
 0x821   :  { %v1465_v33 = vmul.f32 %v4482_v14, %v6332_v51  ;;  %v3216_v50 = vpop.xlane.xlu2 %3215  ;;  %v3245_v51 = vsub.f32 %v6319_v17, %v3201_v26  ;;  %v3112_v17 = vpop.f32.mrf.mxu3 }
 0x822   :  { %v3250_v32 = vsub.f32 %v6339_v21, %v3216_v50 }
 0x823   :  { %3943 = vmatmul.msk.f32.vlgmr.msra.gmra.mxu0 %vm524_vm2, %v1465_v33  ;;  %v3262_v29 = vmul.f32 1.442695, %v3245_v51  ;;  %v2956_v33 = vpop.f32.mrf.mxu2 }
 0x824   :  { %v3272_v47 = vmul.f32 1.442695, %v3250_v32  ;;  %v1502_v32 = vpop.f32.mrf.mxu0 }
 0x826   :  { %4483 = vpow2.f32 %v3272_v47 }
 0x82c   :  { %v6410_v3 = vpop.eup %4483 }
 0x82d   :  { %v3310_v28 = vsel %vm524_vm2, %v6410_v3, 0.0 }
 0x82e   :  { %3311 = vadd.xlane.f32.xlu0 %v3310_v28 }
 0x831   :  { %v1422_v21 = vpop.xlane.xlu0 %1421 }
 0x832   :  { %4485 = vrcp.f32 %v1422_v21  ;;  %v3115_v21 = vpop.f32.mrf.mxu3 }
 0x833   :  { %4487 = vpow2.f32 %v3262_v29  ;;  %v1505_v29 = vpop.f32.mrf.mxu0 }
 0x838   :  { %v4486_v5 = vpop.eup %4485 }
 0x839   :  { %v3198_v55 = vpop.xlane.xlu0 %3197  ;;  %v1466_v58 = vmul.f32 %v4486_v5, %v6346_v2  ;;  %v6422_v14 = vpop.eup %4487  ;;  %v6441_v5 = vadd.f32 %v3115_v21, %v6315_v15 }
 0x83a   :  { %v3244_v7 = vsub.f32 %v6351_v31, %v3198_v55  ;;  %v3295_v26 = vsel %vm524_vm2, %v6422_v14, 0.0  ;;  %v6431_v31 = vadd.f32 %v2956_v33, %v6336_v10 }
 0x83b   :  { %3944 = vmatmul.msk.f32.gmra.mxu0 %vm524_vm2, %v1466_v58  ;;  %v3229_v58 = vsel %vm524_vm2, %v6441_v5, -inf }
 0x83c   :  { %v3260_v40 = vmul.f32 1.442695, %v3244_v7  ;;  %v3202_v51 = vsel %vm524_vm2, %v6431_v31, -inf  ;;  %v6448_v7 = vadd.f32 %v2995_v12, %v6336_v10 }
 0x83e   :  { %4489 = vpow2.f32 %v3260_v40  ;;  %v3208_v40 = vsel %vm524_vm2, %v6448_v7, -inf }
 0x841   :  { %v3219_v50 = vpop.xlane.xlu0 %3218  ;;  %3296 = vadd.xlane.f32.xlu2 %v3295_v26  ;;  %v6455_v26 = vadd.f32 %v2998_v24, %v6315_v15 }
 0x842   :  { %v3251_v0 = vsub.f32 %v6356_v56, %v3219_v50  ;;  %v2959_v50 = vpop.f32.mrf.mxu2 }
 0x843   :  { %3951 = vmatmul.msk.f32.vlgmr.msrb.gmra.mxu0 %vm233_vm1, %v1502_v32  ;;  %v3211_v33 = vsel %vm524_vm2, %v6455_v26, -inf  ;;  %v6462_v12 = vadd.f32 %v2959_v50, %v6315_v15 }
 0x844   :  { %v6428_v2 = vpop.eup %4489  ;;  %v3274_v47 = vmul.f32 1.442695, %v3251_v0 }
 0x845   :  { %v3292_v28 = vsel %vm524_vm2, %v6428_v2, 0.0  ;;  %v3205_v24 = vsel %vm524_vm2, %v6462_v12, -inf }
 0x846   :  { %4491 = vpow2.f32 %v3274_v47  ;;  %3293 = vadd.xlane.f32.xlu1 %v3292_v28  ;;  %v6962_v28 = vld [vmem:[#allocation23_spill] sm:$0xff] }
 0x849   :  { %3203 = vmax.xlane.f32.xlu2 %v3202_v51 }
 0x84a   :  { %v3073_v0 = vpop.f32.mrf.mxu2 }
 0x84b   :  { %3952 = vmatmul.msk.f32.gmra.mxu0 %vm233_vm1, %v1505_v29  ;;  %v6480_v21 = vadd.f32 %v3073_v0, %v6336_v10  ;;  %v6964_v0 = vld [vmem:[#allocation31_spill] sm:$0xff] }
 0x84c   :  { %v6438_v56 = vpop.eup %4491 }
 0x84d   :  { %v3313_v55 = vsel %vm524_vm2, %v6438_v56, 0.0 }
 0x84e   :  { %3314 = vadd.xlane.f32.xlu0 %v3313_v55 }
 0x851   :  { %3230 = vmax.xlane.f32.xlu2 %v3229_v58  ;;  %v6963_v58 = vld [vmem:[#allocation44_spill] sm:$0xff] }
 0x852   :  { %v3076_v29 = vpop.f32.mrf.mxu2 }
 0x853   :  { %3953 = vmatmul.msk.f32.gmra.mxu0 %vm233_vm1, %v6126_v45  ;;  %v6961_v45 = vld [vmem:[#allocation29_spill] sm:$0xff]  ;;  %v6487_v50 = vadd.f32 %v3076_v29, %v6315_v15 }
 0x856   :  { %3209 = vmax.xlane.f32.xlu0 %v3208_v40 }
 0x85b   :  { %3954 = vmatmul.msk.f32.gmra.mxu0 %vm233_vm1, %v6138_v9  ;;  %v6471_v9 = vadd.f32 %v3112_v17, %v6336_v10 }
 0x85d   :  { %v3226_v51 = vsel %vm524_vm2, %v6471_v9, -inf }
 0x85e   :  { %3212 = vmax.xlane.f32.xlu0 %v3211_v33  ;;  %v3220_v33 = vsel %vm524_vm2, %v6480_v21, -inf }
 0x863   :  { %v6464_v32 = vpop.xlane.xlu2 %3233  ;;  %3955 = vmatmul.msk.f32.gmra.mxu0 %vm233_vm1, %v6961_v45  ;;  %v4268_v45 = vpop.permute.xlu0 %4267 }
 0x866   :  { %3206 = vmax.xlane.f32.xlu0 %v3205_v24 }
 0x86b   :  { %v6473_v47 = vpop.xlane.xlu2 %3236  ;;  %3956 = vmatmul.msk.f32.gmra.mxu0 %vm233_vm1, %v6962_v28  ;;  %v3190_v28 = vpop.f32.mrf.mxu2 }
 0x86c   :  { %v6494_v29 = vadd.f32 %v3190_v28, %v6336_v10 }
 0x86e   :  { %3227 = vmax.xlane.f32.xlu0 %v3226_v51 }
 0x873   :  { %v4258_v55 = vpop.permute.xlu2 %4257  ;;  %3957 = vmatmul.msk.f32.gmra.mxu0 %vm233_vm1, %v6963_v58  ;;  %v4269_v58 = vunpack.i.l.bf16 %v4268_v45 }
 0x874   :  { %v4260_v40 = vunpack.i.h.bf16 %v4258_v55  ;;  %v4259_v17 = vunpack.i.l.bf16 %v4258_v55  ;;  %v3223_v55 = vsel %vm524_vm2, %v6487_v50, -inf }
 0x876   :  { %3221 = vmax.xlane.f32.xlu0 %v3220_v33  ;;  %3399 = vmatpush.msra.mxu3 %v4259_v17  ;;  %v4270_v33 = vunpack.i.h.bf16 %v4268_v45  ;;  %v3193_v17 = vpop.f32.mrf.mxu2 }
 0x877   :  { %3469 = vmatpush.msrb.mxu2 %v4260_v40  ;;  %v3238_v40 = vsel %vm524_vm2, %v6494_v29, -inf }
 0x87b   :  { %v4263_v24 = vpop.permute.xlu2 %4262  ;;  %3958 = vmatmul.msk.f32.gmra.mxu0 %vm233_vm1, %v6964_v0 }
 0x87c   :  { %v4265_v51 = vunpack.i.h.bf16 %v4263_v24  ;;  %v4264_v44 = vunpack.i.l.bf16 %v4263_v24  ;;  %v6499_v24 = vadd.f32 %v3193_v17, %v6315_v15 }
 0x87e   :  { %3224 = vmax.xlane.f32.xlu0 %v3223_v55  ;;  %3503 = vmatpush.msrb.mxu3 %v4264_v44  ;;  %v3241_v0 = vsel %vm524_vm2, %v6499_v24, -inf }
 0x87f   :  { %3573 = vmatpush.msra.mxu2 %v4265_v51 }
 0x880   :  { %3504 = vmatpush.msrb.mxu3 %v4269_v58 }
 0x881   :  { %3574 = vmatpush.msra.mxu2 %v4270_v33 }
 0x886   :  { %3239 = vmax.xlane.f32.xlu0 %v3238_v40 }
 0x88e   :  { %3242 = vmax.xlane.f32.xlu0 %v3241_v0 }
 0x8a0   :  { %v1642_v44 = vpop.f32.mrf.mxu0 }
 0x8a1   :  { %3959 = vmatmul.msk.f32.gmra.mxu0 %vm233_vm1, %v1642_v44  ;;  %v3312_v10 = vpop.xlane.xlu0 %3311 }
 0x8b4   :  { %v3297_v45 = vpop.xlane.xlu2 %3296 }
 0x8b8   :  { %v1645_v51 = vpop.f32.mrf.mxu0 }
 0x8b9   :  { %v3294_v28 = vpop.xlane.xlu1 %3293  ;;  %3960 = vmatmul.msk.f32.gmra.mxu0 %vm233_vm1, %v1645_v51 }
 0x8ba   :  { %4493 = vrcp.f32 %v3294_v28 }
 0x8bb   :  { %4495 = vrcp.f32 %v3297_v45 }
 0x8bc   :  { %v3204_v55 = vpop.xlane.xlu2 %3203 }
 0x8bd   :  { %v3246_v58 = vsub.f32 %v6431_v31, %v3204_v55 }
 0x8bf   :  { %v3264_v33 = vmul.f32 1.442695, %v3246_v58  ;;  %v2751_v58 = vld [vmem:[#allocation8 + $0x10] sm:$0xff] }
 0x8c0   :  { %v4494_v15 = vpop.eup %4493  ;;  %2815 = vmatpush.msra.mxu0 %v2751_v58 }
 0x8c1   :  { %v3356_v40 = vmul.f32 %v4494_v15, %v6428_v2  ;;  %4497 = vpow2.f32 %v3264_v33  ;;  %v3315_v17 = vpop.xlane.xlu0 %3314  ;;  %3961 = vmatmul.msk.f32.gmra.mxu0 %vm233_vm1, %v6152_v27  ;;  %v4496_v0 = vpop.eup %4495  ;;  %v3256_v27 = vsub.f32 %v6368_v4, %v6464_v32 }
 0x8c2   :  { %4499 = vrcp.f32 %v3312_v10  ;;  %v3357_v2 = vmul.f32 %v4496_v0, %v6422_v14 }
 0x8c3   :  { %4079 = vmatmul.msk.f32.vlgmr.msra.gmra.mxu3 %vm524_vm2, %v3356_v40  ;;  %v3284_v10 = vmul.f32 1.442695, %v3256_v27  ;;  %v3257_v27 = vsub.f32 %v6377_v1, %v6473_v47 }
 0x8c4   :  { %v3231_v15 = vpop.xlane.xlu2 %3230 }
 0x8c5   :  { %v3255_v4 = vsub.f32 %v6441_v5, %v3231_v15 }
 0x8c7   :  { %v6510_v44 = vpop.eup %4497  ;;  %v3282_v0 = vmul.f32 1.442695, %v3255_v4  ;;  %v6968_v4 = vld [vmem:[#allocation52_spill] sm:$0xff] }
 0x8c8   :  { %v3298_v51 = vsel %vm524_vm2, %v6510_v44, 0.0  ;;  %v4500_v55 = vpop.eup %4499 }
 0x8c9   :  { %v3210_v31 = vpop.xlane.xlu0 %3209  ;;  %3299 = vadd.xlane.f32.xlu0 %v3298_v51  ;;  %3962 = vmatmul.msk.f32.gmra.mxu0 %vm233_vm1, %v6158_v48  ;;  %v3362_v33 = vmul.f32 %v4500_v55, %v6410_v3  ;;  %v6965_v48 = vld [vmem:[#allocation53_spill] sm:$0xff] }
 0x8ca   :  { %v3248_v45 = vsub.f32 %v6448_v7, %v3210_v31  ;;  %v6966_v31 = vld [vmem:[#allocation54_spill] sm:$0xff] }
 0x8cb   :  { %4080 = vmatmul.msk.f32.gmra.mxu3 %vm524_vm2, %v3357_v2 }
 0x8cc   :  { %v3268_v28 = vmul.f32 1.442695, %v3248_v45 }
 0x8ce   :  { %4501 = vpow2.f32 %v3268_v28 }
 0x8cf   :  { %4503 = vrcp.f32 %v3315_v17 }
 0x8d0   :  { %4505 = vpow2.f32 %v3284_v10 }
 0x8d1   :  { %v3213_v40 = vpop.xlane.xlu0 %3212  ;;  %3963 = vmatmul.msk.f32.gmra.mxu0 %vm233_vm1, %v6965_v48 }
 0x8d2   :  { %v3249_v14 = vsub.f32 %v6455_v26, %v3213_v40 }
 0x8d3   :  { %4085 = vmatmul.msk.f32.vlgmr.msrb.gmra.mxu3 %vm524_vm2, %v3362_v33  ;;  %v6967_v33 = vld [vmem:[#allocation24_spill] sm:$0xff] }
 0x8d4   :  { %v6526_v7 = vpop.eup %4501  ;;  %v3270_v32 = vmul.f32 1.442695, %v3249_v14 }
 0x8d5   :  { %v3304_v17 = vsel %vm524_vm2, %v6526_v7, 0.0  ;;  %v4504_v3 = vpop.eup %4503 }
 0x8d6   :  { %4507 = vpow2.f32 %v3270_v32  ;;  %3305 = vadd.xlane.f32.xlu2 %v3304_v17  ;;  %v3363_v26 = vmul.f32 %v4504_v3, %v6438_v56  ;;  %v6534_v2 = vpop.eup %4505  ;;  %v3286_v56 = vmul.f32 1.442695, %v3257_v27 }
 0x8d7   :  { %4509 = vpow2.f32 %v3282_v0  ;;  %v3328_v55 = vsel %vm524_vm2, %v6534_v2, 0.0 }
 0x8d9   :  { %v3207_v51 = vpop.xlane.xlu0 %3206  ;;  %3964 = vmatmul.msk.f32.gmra.mxu0 %vm233_vm1, %v6966_v31 }
 0x8da   :  { %v3247_v45 = vsub.f32 %v6462_v12, %v3207_v51  ;;  %v6546_v12 = vpop.f32.mrf.mxu0 }
 0x8db   :  { %4086 = vmatmul.msk.f32.gmra.mxu3 %vm524_vm2, %v3363_v26  ;;  %v6969_v26 = vld [vmem:[#allocation50_spill] sm:$0xff] }
 0x8dc   :  { %v6538_v5 = vpop.eup %4507  ;;  %v3266_v28 = vmul.f32 1.442695, %v3247_v45  ;;  %v6970_v45 = vld [vmem:[#allocation25_spill] sm:$0xff] }
 0x8dd   :  { %v3307_v10 = vsel %vm524_vm2, %v6538_v5, 0.0  ;;  %v6550_v15 = vpop.eup %4509 }
 0x8de   :  { %4511 = vpow2.f32 %v3266_v28  ;;  %3329 = vadd.xlane.f32.xlu2 %v3328_v55  ;;  %3308 = vadd.xlane.f32.xlu0 %v3307_v10  ;;  %v3325_v14 = vsel %vm524_vm2, %v6550_v15, 0.0 }
 0x8df   :  { %4513 = vpow2.f32 %v3286_v56 }
 0x8e1   :  { %v3228_v58 = vpop.xlane.xlu0 %3227  ;;  %3965 = vmatmul.msk.f32.gmra.mxu0 %vm233_vm1, %v6967_v33 }
 0x8e2   :  { %v3254_v1 = vsub.f32 %v6471_v9, %v3228_v58  ;;  %v6563_v17 = vpop.f32.mrf.mxu0 }
 0x8e4   :  { %v6553_v47 = vpop.eup %4511  ;;  %v3280_v40 = vmul.f32 1.442695, %v3254_v1 }
 0x8e5   :  { %v3301_v48 = vsel %vm524_vm2, %v6553_v47, 0.0  ;;  %v6561_v32 = vpop.eup %4513 }
 0x8e6   :  { %4515 = vpow2.f32 %v3280_v40  ;;  %3302 = vadd.xlane.f32.xlu0 %v3301_v48  ;;  %3326 = vadd.xlane.f32.xlu2 %v3325_v14  ;;  %v3331_v0 = vsel %vm524_vm2, %v6561_v32, 0.0 }
 0x8e9   :  { %3966 = vmatmul.msk.f32.gmra.mxu0 %vm233_vm1, %v6968_v4  ;;  %v3222_v27 = vpop.xlane.xlu0 %3221 }
 0x8ea   :  { %v6573_v51 = vpop.f32.mrf.mxu0 }
 0x8ec   :  { %v6565_v9 = vpop.eup %4515 }
 0x8ed   :  { %v3322_v3 = vsel %vm524_vm2, %v6565_v9, 0.0 }
 0x8ee   :  { %3323 = vadd.xlane.f32.xlu1 %v3322_v3  ;;  %3332 = vadd.xlane.f32.xlu0 %v3331_v0 }
 0x8f1   :  { %4031 = vmatmul.msk.f32.vlgmr.msra.gmra.mxu0 %vm233_vm1, %v6374_v30 }
 0x8f2   :  { %v6577_v31 = vpop.f32.mrf.mxu0 }
 0x8f9   :  { %4032 = vmatmul.msk.f32.gmra.mxu0 %vm233_vm1, %v6383_v16  ;;  %v6971_v16 = vld [vmem:[#allocation30_spill] sm:$0xff] }
 0x8fa   :  { %v6587_v30 = vpop.f32.mrf.mxu0 }
 0x8fe   :  { %4277 = vrot.lane.b32.xlu2 %v6969_v26, %s4695_s26 }
 0x901   :  { %4033 = vmatmul.msk.f32.gmra.mxu0 %vm233_vm1, %v6360_v54  ;;  %v3225_v54 = vpop.xlane.xlu0 %3224 }
 0x902   :  { %4282 = vrot.lane.b32.xlu0 %v6922_v41, %s4695_s26  ;;  %v6595_v28 = vpop.f32.mrf.mxu0  ;;  %v3253_v41 = vsub.f32 %v6487_v50, %v3225_v54 }
 0x904   :  { %v3278_v55 = vmul.f32 1.442695, %v3253_v41 }
 0x906   :  { %4517 = vpow2.f32 %v3278_v55 }
 0x907   :  { %4272 = vrot.lane.b32.xlu1 %v6970_v45, %s4695_s26 }
 0x909   :  { %4034 = vmatmul.msk.f32.gmra.mxu0 %vm233_vm1, %v6365_v49  ;;  %v3252_v49 = vsub.f32 %v6480_v21, %v3222_v27  ;;  %v3240_v56 = vpop.xlane.xlu0 %3239 }
 0x90a   :  { %4287 = vrot.lane.b32.xlu0 %v6971_v16, %s4695_s26  ;;  %v6600_v10 = vpop.f32.mrf.mxu0 }
 0x90c   :  { %v6605_v58 = vpop.eup %4517 }
 0x90d   :  { %v3319_v50 = vsel %vm524_vm2, %v6605_v58, 0.0 }
 0x911   :  { %4035 = vmatmul.msk.f32.gmra.mxu0 %vm233_vm1, %v6387_v57  ;;  %v3276_v57 = vmul.f32 1.442695, %v3252_v49  ;;  %v3243_v1 = vpop.xlane.xlu0 %3242 }
 0x912   :  { %v6607_v33 = vpop.f32.mrf.mxu0  ;;  %v3259_v48 = vsub.f32 %v6499_v24, %v3243_v1 }
 0x913   :  { %4519 = vpow2.f32 %v3276_v57 }
 0x919   :  { %4036 = vmatmul.msk.f32.gmra.mxu0 %vm233_vm1, %v6394_v35  ;;  %v3258_v35 = vsub.f32 %v6494_v29, %v3240_v56  ;;  %v6614_v40 = vpop.eup %4519  ;;  %v3290_v29 = vmul.f32 1.442695, %v3259_v48 }
 0x91a   :  { %v3316_v14 = vsel %vm524_vm2, %v6614_v40, 0.0 }
 0x91b   :  { %v3288_v21 = vmul.f32 1.442695, %v3258_v35 }
 0x91d   :  { %4521 = vpow2.f32 %v3288_v21 }
 0x91e   :  { %4523 = vpow2.f32 %v3290_v29 }
 0x921   :  { %4037 = vmatmul.msk.f32.gmra.mxu0 %vm233_vm1, %v6372_v22  ;;  %v6616_v22 = vpop.f32.mrf.mxu0 }
 0x923   :  { %v6623_v4 = vpop.eup %4521 }
 0x924   :  { %v3334_v3 = vsel %vm524_vm2, %v6623_v4, 0.0  ;;  %v6631_v24 = vpop.eup %4523 }
 0x927   :  { %3320 = vadd.xlane.f32.xlu2 %v3319_v50 }
 0x929   :  { %4038 = vmatmul.msk.f32.gmra.mxu0 %vm233_vm1, %v6381_v61 }
 0x931   :  { %3317 = vadd.xlane.f32.xlu1 %v3316_v14  ;;  %4039 = vmatmul.msk.f32.gmra.mxu0 %vm233_vm1, %v6401_v59  ;;  %v3337_v59 = vsel %vm524_vm2, %v6631_v24, 0.0 }
 0x936   :  { %v6625_v61 = vpop.f32.mrf.mxu0 }
 0x939   :  { %3335 = vadd.xlane.f32.xlu1 %v3334_v3  ;;  %4040 = vmatmul.msk.f32.gmra.mxu0 %vm233_vm1, %v6408_v13 }
 0x93c   :  { %v3300_v45 = vpop.xlane.xlu0 %3299 }
 0x93e   :  { %v6633_v0 = vpop.f32.mrf.mxu0 }
 0x941   :  { %3338 = vadd.xlane.f32.xlu1 %v3337_v59  ;;  %4041 = vmatmul.msk.f32.gmra.mxu0 %vm233_vm1, %v6385_v18 }
 0x946   :  { %v6639_v26 = vpop.f32.mrf.mxu0 }
 0x949   :  { %v3306_v27 = vpop.xlane.xlu2 %3305  ;;  %4042 = vmatmul.msk.f32.gmra.mxu0 %vm233_vm1, %v6391_v25 }
 0x94a   :  { %4525 = vrcp.f32 %v3306_v27 }
 0x94e   :  { %v6643_v13 = vpop.f32.mrf.mxu0 }
 0x950   :  { %v4526_v16 = vpop.eup %4525 }
 0x951   :  { %v3360_v54 = vmul.f32 %v4526_v16, %v6526_v7  ;;  %v3309_v41 = vpop.xlane.xlu0 %3308  ;;  %v3330_v55 = vpop.xlane.xlu2 %3329  ;;  %4043 = vmatmul.msk.f32.gmra.mxu0 %vm233_vm1, %v6414_v34 }
 0x952   :  { %4527 = vrcp.f32 %v3309_v41 }
 0x953   :  { %4083 = vmatmul.msk.f32.vlgmr.msrb.gmra.mxu2 %vm524_vm2, %v3360_v54  ;;  %4529 = vrcp.f32 %v3330_v55 }
 0x956   :  { %v6649_v18 = vpop.f32.mrf.mxu0 }
 0x958   :  { %v4528_v49 = vpop.eup %4527 }
 0x959   :  { %v3303_v56 = vpop.xlane.xlu0 %3302  ;;  %v3327_v57 = vpop.xlane.xlu2 %3326  ;;  %4044 = vmatmul.msk.f32.gmra.mxu0 %vm233_vm1, %v6417_v23  ;;  %v3361_v25 = vmul.f32 %v4528_v49, %v6538_v5 }
 0x95a   :  { %v4530_v35 = vpop.eup %4529 }
 0x95b   :  { %4084 = vmatmul.msk.f32.gmra.mxu2 %vm524_vm2, %v3361_v25  ;;  %v3368_v23 = vmul.f32 %v4530_v35, %v6534_v2 }
 0x95e   :  { %v6655_v7 = vpop.f32.mrf.mxu0 }
 0x961   :  { %v3333_v50 = vpop.xlane.xlu0 %3332  ;;  %v4278_v34 = vpop.permute.xlu2 %4277  ;;  %4045 = vmatmul.msk.f32.gmra.mxu0 %vm233_vm1, %v6398_v62 }
 0x962   :  { %v4279_v21 = vunpack.i.l.bf16 %v4278_v34  ;;  %v3324_v1 = vpop.xlane.xlu1 %3323  ;;  %v4280_v48 = vunpack.i.h.bf16 %v4278_v34 }
 0x963   :  { %4531 = vrcp.f32 %v3324_v1 }
 0x964   :  { %4533 = vrcp.f32 %v3333_v50  ;;  %3608 = vmatpush.msra.mxu3 %v4279_v21 }
 0x965   :  { %4535 = vrcp.f32 %v3327_v57 }
 0x966   :  { %v6660_v5 = vpop.f32.mrf.mxu0  ;;  %3609 = vmatpush.msra.mxu3 %v4280_v48  ;;  %4537 = vrcp.f32 %v3300_v45 }
 0x967   :  { %4091 = vmatmul.msk.f32.vlgmr.msra.gmra.mxu3 %vm524_vm2, %v3368_v23  ;;  %4539 = vrcp.f32 %v3303_v56 }
 0x969   :  { %v4532_v14 = vpop.eup %4531  ;;  %4046 = vmatmul.msk.f32.gmra.mxu0 %vm233_vm1, %v6403_v8 }
 0x96a   :  { %v4534_v62 = vpop.eup %4533  ;;  %v3366_v29 = vmul.f32 %v4532_v14, %v6565_v9  ;;  %v3652_v14 = vld [vmem:[#allocation8 + $0x18] sm:$0xff] }
 0x96b   :  { %v3369_v3 = vmul.f32 %v4534_v62, %v6561_v32  ;;  %v4536_v2 = vpop.eup %4535  ;;  %4111 = vmatpush.msrb.mxu2 %v3652_v14  ;;  %4112 = vmatpush.msrb.mxu3 %v3652_v14 }
 0x96c   :  { %4089 = vmatmul.msk.f32.vlgmr.msra.gmra.mxu2 %vm524_vm2, %v3366_v29  ;;  %v3367_v27 = vmul.f32 %v4536_v2, %v6550_v15  ;;  %v4538_v41 = vpop.eup %4537 }
 0x96d   :  { %v3358_v32 = vmul.f32 %v4538_v41, %v6510_v44  ;;  %v4540_v50 = vpop.eup %4539 }
 0x96e   :  { %v6668_v59 = vpop.f32.mrf.mxu0  ;;  %v3359_v56 = vmul.f32 %v4540_v50, %v6553_v47 }
 0x96f   :  { %4092 = vmatmul.msk.f32.gmra.mxu3 %vm524_vm2, %v3369_v3  ;;  %v1957_v3 = vadd.f32 %v6252_v53, %v6616_v22 }
 0x974   :  { %4090 = vmatmul.msk.f32.gmra.mxu2 %vm524_vm2, %v3367_v27  ;;  %v4283_v16 = vpop.permute.xlu0 %4282 }
 0x975   :  { %v4284_v49 = vunpack.i.l.bf16 %v4283_v16  ;;  %v4285_v15 = vunpack.i.h.bf16 %v4283_v16 }
 0x976   :  { %v6673_v54 = vpop.f32.mrf.mxu0 }
 0x979   :  { %v4273_v8 = vpop.permute.xlu1 %4272 }
 0x97a   :  { %v4274_v9 = vunpack.i.l.bf16 %v4273_v8  ;;  %v4275_v55 = vunpack.i.h.bf16 %v4273_v8 }
 0x97c   :  { %3433 = vmatpush.msra.mxu1 %v4274_v9  ;;  %v4288_v57 = vpop.permute.xlu0 %4287  ;;  %v1960_v9 = vadd.f32 %v6265_v43, %v6625_v61 }
 0x97d   :  { %v4289_v45 = vunpack.i.l.bf16 %v4288_v57  ;;  %v4290_v34 = vunpack.i.h.bf16 %v4288_v57 }
 0x97e   :  { %v6676_v25 = vpop.f32.mrf.mxu0  ;;  %3434 = vmatpush.msra.mxu1 %v4275_v55 }
 0x97f   :  { %4081 = vmatmul.msk.f32.vlgmr.msra.gmra.mxu1 %vm524_vm2, %v3358_v32 }
 0x980   :  { %3538 = vmatpush.msrb.mxu1 %v4284_v49 }
 0x982   :  { %3539 = vmatpush.msrb.mxu1 %v4285_v15 }
 0x984   :  { %3643 = vmatpush.msra.mxu1 %v4289_v45 }
 0x986   :  { %3644 = vmatpush.msra.mxu1 %v4290_v34  ;;  %v6680_v35 = vpop.f32.mrf.mxu0 }
 0x987   :  { %4082 = vmatmul.msk.f32.gmra.mxu1 %vm524_vm2, %v3359_v56 }
 0x98e   :  { %v6683_v44 = vpop.f32.mrf.mxu0 }
 0x996   :  { %v6685_v21 = vpop.f32.mrf.mxu0 }
 0x99a   :  { %v3321_v62 = vpop.xlane.xlu2 %3320 }
 0x99e   :  { %v6687_v1 = vpop.f32.mrf.mxu0 }
 0x9a4   :  { %v3318_v48 = vpop.xlane.xlu1 %3317 }
 0x9a5   :  { %4541 = vrcp.f32 %v3318_v48 }
 0x9a6   :  { %v6689_v23 = vpop.f32.mrf.mxu0  ;;  %4543 = vrcp.f32 %v3321_v62 }
 0x9ab   :  { %v4542_v29 = vpop.eup %4541 }
 0x9ac   :  { %v3364_v47 = vmul.f32 %v4542_v29, %v6614_v40  ;;  %v3336_v2 = vpop.xlane.xlu1 %3335  ;;  %v4544_v8 = vpop.eup %4543 }
 0x9ad   :  { %4545 = vrcp.f32 %v3336_v2  ;;  %v3365_v41 = vmul.f32 %v4544_v8, %v6605_v58  ;;  %v3401_v58 = vpop.f32.mrf.mxu3  ;;  %v1933_v2 = vadd.f32 %v6164_v42, %v6546_v12  ;;  %v6729_v8 = vld [vmem:[%s6809_s5] ss:$0 sm:$0xff]  ;;  %s4696_s5 = smov [#allocation10]  }
 0x9ae   :  { %v2841_v27 = vpop.f32.mrf.mxu0  ;;  %4087 = vmatmul.msk.f32.vlgmr.msrb.gmra.mxu1 %vm524_vm2, %v3364_v47  ;;  %s3822_s7 = sshll.u32 %s4696_s5, 4  ;;  %s3823_s7 = int_to_ptr.vmem [resolvable:$true] %s3822_s7 }
 0x9af   :  { %v6695_v16 = vadd.f32 %v2841_v27, %v1957_v3  ;;  %3716 = vmatpush.msrb.mxu1 %v3652_v14  ;;  %v2865_v27 = vadd.f32 %v6668_v59, %v1933_v2  ;;  %v1945_v59 = vadd.f32 %v6206_v6, %v6587_v30  ;;  %v1951_v6 = vadd.f32 %v6230_v46, %v6600_v10 }
 0x9b1   :  { %v2871_v30 = vadd.f32 %v6687_v1, %v1951_v6 }
 0x9b3   :  { %v4546_v22 = vpop.eup %4545 }
 0x9b4   :  { %v3339_v53 = vpop.xlane.xlu1 %3338  ;;  %v3370_v32 = vmul.f32 %v4546_v22, %v6623_v4 }
 0x9b5   :  { %4547 = vrcp.f32 %v3339_v53  ;;  %v3404_v43 = vpop.f32.mrf.mxu3  ;;  %v1936_v53 = vadd.f32 %v6180_v60, %v6563_v17  ;;  %v1948_v60 = vadd.f32 %v6216_v39, %v6595_v28  ;;  %v1954_v28 = vadd.f32 %v6237_v36, %v6607_v33 }
 0x9b6   :  { %v2844_v55 = vpop.f32.mrf.mxu0  ;;  %4088 = vmatmul.msk.f32.gmra.mxu1 %vm524_vm2, %v3365_v41  ;;  %v1939_v36 = vadd.f32 %v6188_v52, %v6573_v51  ;;  %v1942_v52 = vadd.f32 %v6196_v37, %v6577_v31  ;;  %v1972_v37 = vadd.f32 %v6289_v11, %v6649_v18 }
 0x9b7   :  { %v6701_v40 = vadd.f32 %v2844_v55, %v1960_v9  ;;  %v2866_v22 = vadd.f32 %v6673_v54, %v1936_v53  ;;  %v2870_v17 = vadd.f32 %v6685_v21, %v1948_v60  ;;  %v1963_v21 = vadd.f32 %v6269_v20, %v6633_v0 }
 0x9b8   :  { %v1966_v20 = vadd.f32 %v6276_v63, %v6639_v26  ;;  %v2867_v33 = vadd.f32 %v6676_v25, %v1939_v36  ;;  %v1969_v63 = vadd.f32 %v6280_v19, %v6643_v13  ;;  %v2868_v51 = vadd.f32 %v6680_v35, %v1942_v52 }
 0x9bb   :  { %v4548_v49 = vpop.eup %4547 }
 0x9bc   :  { %v3371_v57 = vmul.f32 %v4548_v49, %v6631_v24  ;;  %v2869_v49 = vadd.f32 %v6683_v44, %v1945_v59 }
 0x9bd   :  { %v3506_v4 = vpop.f32.mrf.mxu3 }
 0x9be   :  { %4093 = vmatmul.msk.f32.vlgmr.msra.gmra.mxu1 %vm524_vm2, %v3370_v32  ;;  %v2847_v44 = vpop.f32.mrf.mxu0 }
 0x9bf   :  { %v2875_v46 = vadd.f32 %v2847_v44, %v1963_v21 }
 0x9c5   :  { %v3509_v45 = vpop.f32.mrf.mxu3 }
 0x9c6   :  { %4094 = vmatmul.msk.f32.gmra.mxu1 %vm524_vm2, %v3371_v57 }
 0x9ce   :  { %4095 = vmatmul.msk.f32.vlgmr.msrb.gmra.mxu1 %vm233_vm1, %v3401_v58 }
 0x9d6   :  { %v3471_v61 = vpop.f32.mrf.mxu2  ;;  %4096 = vmatmul.msk.f32.gmra.mxu1 %vm233_vm1, %v3404_v43 }
 0x9d7   :  { %4099 = vmatmul.msk.f32.vlgmr.msrb.gmra.mxu2 %vm233_vm1, %v3471_v61 }
 0x9de   :  { %v3474_v15 = vpop.f32.mrf.mxu2 }
 0x9df   :  { %4100 = vmatmul.msk.f32.gmra.mxu2 %vm233_vm1, %v3474_v15 }
 0x9e7   :  { %4101 = vmatmul.msk.f32.gmra.mxu2 %vm233_vm1, %v3506_v4 }
 0x9ea   :  { %v3611_v56 = vpop.f32.mrf.mxu3 }
 0x9ef   :  { %v3576_v50 = vpop.f32.mrf.mxu2  ;;  %4102 = vmatmul.msk.f32.gmra.mxu2 %vm233_vm1, %v3509_v45 }
 0x9f0   :  { %4105 = vmatmul.msk.f32.vlgmr.msrb.gmra.mxu3 %vm233_vm1, %v3576_v50  ;;  %v2872_v50 = vadd.f32 %v6689_v23, %v1954_v28 }
 0x9f2   :  { %v3614_v14 = vpop.f32.mrf.mxu3 }
 0x9f7   :  { %v3579_v24 = vpop.f32.mrf.mxu2 }
 0x9f8   :  { %4106 = vmatmul.msk.f32.gmra.mxu3 %vm233_vm1, %v3579_v24  ;;  %v2850_v24 = vpop.f32.mrf.mxu0 }
 0x9f9   :  { %v2876_v0 = vadd.f32 %v2850_v24, %v1966_v20 }
 0x9fc   :  { %v3436_v34 = vpop.f32.mrf.mxu1 }
 0x9fd   :  { %4097 = vmatmul.msk.f32.gmra.mxu1 %vm233_vm1, %v3436_v34 }
 0xa00   :  { %4107 = vmatmul.msk.f32.gmra.mxu3 %vm233_vm1, %v3611_v56 }
 0xa04   :  { %v3439_v48 = vpop.f32.mrf.mxu1 }
 0xa05   :  { %4098 = vmatmul.msk.f32.gmra.mxu1 %vm233_vm1, %v3439_v48 }
 0xa08   :  { %4108 = vmatmul.msk.f32.gmra.mxu3 %vm233_vm1, %v3614_v14 }
 0xa2b   :  { %v3541_v62 = vpop.f32.mrf.mxu1 }
 0xa2c   :  { %4103 = vmatmul.msk.f32.gmra.mxu2 %vm233_vm1, %v3541_v62 }
 0xa33   :  { %v3544_v29 = vpop.f32.mrf.mxu1 }
 0xa34   :  { %4104 = vmatmul.msk.f32.gmra.mxu2 %vm233_vm1, %v3544_v29 }
 0xa3b   :  { %v3646_v47 = vpop.f32.mrf.mxu1 }
 0xa3c   :  { %4109 = vmatmul.msk.f32.gmra.mxu3 %vm233_vm1, %v3646_v47 }
 0xa43   :  { %v3649_v3 = vpop.f32.mrf.mxu1 }
 0xa44   :  { %4110 = vmatmul.msk.f32.gmra.mxu3 %vm233_vm1, %v3649_v3  ;;  %v2853_v3 = vpop.f32.mrf.mxu0 }
 0xa45   :  { %v2877_v26 = vadd.f32 %v2853_v3, %v1969_v63 }
 0xa4b   :  { %v3718_v41 = vpop.f32.mrf.mxu1 }
 0xa4c   :  { %v3766_v9 = vadd.f32 %v3718_v41, %v2865_v27 }
 0xa4e   :  { %v3786_v55 = vadd.f32 %v6729_v8, %v3766_v9 }
 0xa50   :  { %3802 = vst.msk [vmem:[#allocation10] sm:$0xff] %vm111_vm0, %v3786_v55 }
 0xa53   :  { %v3721_v32 = vpop.f32.mrf.mxu1 }
 0xa54   :  { %v3767_v42 = vadd.f32 %v3721_v32, %v2866_v22  ;;  %v2856_v32 = vpop.f32.mrf.mxu0 }
 0xa55   :  { %v2878_v19 = vadd.f32 %v2856_v32, %v1972_v37 }
 0xa56   :  { %v3787_v12 = vadd.f32 %v6729_v8, %v3767_v42 }
 0xa58   :  { %3803 = vst.msk [vmem:[#allocation10 + $0x8] sm:$0xff] %vm111_vm0, %v3787_v12 }
 0xa5a   :  { %v3730_v57 = vpop.f32.mrf.mxu2 }
 0xa5b   :  { %v3770_v58 = vadd.f32 %v3730_v57, %v2869_v49 }
 0xa5c   :  { %v2859_v11 = vpop.f32.mrf.mxu0 }
 0xa5d   :  { %v3790_v43 = vadd.f32 %v6729_v8, %v3770_v58  ;;  %v1975_v58 = vadd.f32 %v6298_v38, %v6655_v7 }
 0xa5f   :  { %3806 = vst.msk [vmem:[#allocation10 + $0x20] sm:$0xff] %vm111_vm0, %v3790_v43  ;;  %v2879_v43 = vadd.f32 %v2859_v11, %v1975_v58 }
 0xa62   :  { %v3733_v54 = vpop.f32.mrf.mxu2 }
 0xa63   :  { %v3771_v61 = vadd.f32 %v3733_v54, %v2870_v17 }
 0xa64   :  { %v2862_v54 = vpop.f32.mrf.mxu0 }
 0xa65   :  { %v3791_v15 = vadd.f32 %v6729_v8, %v3771_v61  ;;  %v6972_v61 = vld [vmem:[#allocation18_spill] sm:$0xff] }
 0xa67   :  { %3807 = vst.msk [vmem:[#allocation10 + $0x28] sm:$0xff] %vm111_vm0, %v3791_v15  ;;  %v1978_v15 = vadd.f32 %v6972_v61, %v6660_v5 }
 0xa6a   :  { %v3736_v4 = vpop.f32.mrf.mxu2 }
 0xa6b   :  { %v3772_v45 = vadd.f32 %v3736_v4, %v2871_v30 }
 0xa6d   :  { %v3792_v39 = vadd.f32 %v6729_v8, %v3772_v45 }
 0xa6f   :  { %3808 = vst.msk [vmem:[#allocation10 + $0x30] sm:$0xff] %vm111_vm0, %v3792_v39 }
 0xa72   :  { %v3739_v10 = vpop.f32.mrf.mxu2 }
 0xa73   :  { %v3773_v34 = vadd.f32 %v3739_v10, %v2872_v50  ;;  %v3748_v1 = vpop.f32.mrf.mxu3 }
 0xa74   :  { %v3776_v56 = vadd.f32 %v3748_v1, %v2875_v46 }
 0xa75   :  { %v3793_v48 = vadd.f32 %v6729_v8, %v3773_v34 }
 0xa76   :  { %v3796_v14 = vadd.f32 %v6729_v8, %v3776_v56 }
 0xa77   :  { %3809 = vst.msk [vmem:[#allocation10 + $0x38] sm:$0xff] %vm111_vm0, %v3793_v48 }
 0xa78   :  { %3812 = vst.msk [vmem:[#allocation10 + $0x50] sm:$0xff] %vm111_vm0, %v3796_v14 }
 0xa7a   :  { %v3724_v23 = vpop.f32.mrf.mxu1 }
 0xa7b   :  { %v3768_v62 = vadd.f32 %v3724_v23, %v2867_v33  ;;  %v3751_v29 = vpop.f32.mrf.mxu3 }
 0xa7c   :  { %v3777_v47 = vadd.f32 %v3751_v29, %v2876_v0 }
 0xa7d   :  { %v3788_v2 = vadd.f32 %v6729_v8, %v3768_v62 }
 0xa7e   :  { %v3797_v27 = vadd.f32 %v6729_v8, %v3777_v47 }
 0xa7f   :  { %3804 = vst.msk [vmem:[#allocation10 + $0x10] sm:$0xff] %vm111_vm0, %v3788_v2 }
 0xa80   :  { %3813 = vst.msk [vmem:[#allocation10 + $0x58] sm:$0xff] %vm111_vm0, %v3797_v27 }
 0xa82   :  { %v3727_v25 = vpop.f32.mrf.mxu1 }
 0xa83   :  { %v3769_v41 = vadd.f32 %v3727_v25, %v2868_v51  ;;  %v3754_v9 = vpop.f32.mrf.mxu3 }
 0xa84   :  { %v3778_v55 = vadd.f32 %v3754_v9, %v2877_v26 }
 0xa85   :  { %v3789_v53 = vadd.f32 %v6729_v8, %v3769_v41 }
 0xa86   :  { %v3798_v22 = vadd.f32 %v6729_v8, %v3778_v55 }
 0xa87   :  { %3805 = vst.msk [vmem:[#allocation10 + $0x18] sm:$0xff] %vm111_vm0, %v3789_v53 }
 0xa88   :  { %3814 = vst.msk [vmem:[#allocation10 + $0x60] sm:$0xff] %vm111_vm0, %v3798_v22 }
 0xa8b   :  { %v3757_v31 = vpop.f32.mrf.mxu3 }
 0xa8c   :  { %v3779_v13 = vadd.f32 %v3757_v31, %v2878_v19 }
 0xa8e   :  { %v3799_v35 = vadd.f32 %v6729_v8, %v3779_v13 }
 0xa90   :  { %3815 = vst.msk [vmem:[#allocation10 + $0x68] sm:$0xff] %vm111_vm0, %v3799_v35 }
 0xaaf   :  { %v3742_v42 = vpop.f32.mrf.mxu2 }
 0xab0   :  { %v3774_v12 = vadd.f32 %v3742_v42, %v6695_v16 }
 0xab2   :  { %v3794_v59 = vadd.f32 %v6729_v8, %v3774_v12 }
 0xab4   :  { %3810 = vst.msk [vmem:[#allocation10 + $0x40] sm:$0xff] %vm111_vm0, %v3794_v59 }
 0xab7   :  { %v3745_v49 = vpop.f32.mrf.mxu2 }
 0xab8   :  { %v3775_v57 = vadd.f32 %v3745_v49, %v6701_v40  ;;  %v2880_v40 = vadd.f32 %v2862_v54, %v1978_v15 }
 0xaba   :  { %v3795_v18 = vadd.f32 %v6729_v8, %v3775_v57 }
 0xabc   :  { %3811 = vst.msk [vmem:[#allocation10 + $0x48] sm:$0xff] %vm111_vm0, %v3795_v18 }
 0xabf   :  { %v3760_v60 = vpop.f32.mrf.mxu3 }
 0xac0   :  { %v3780_v17 = vadd.f32 %v3760_v60, %v2879_v43 }
 0xac2   :  { %v3800_v16 = vadd.f32 %v6729_v8, %v3780_v17 }
 0xac4   :  { %3816 = vst.msk [vmem:[#allocation10 + $0x70] sm:$0xff] %vm111_vm0, %v3800_v16 }
 0xac7   :  { %v3763_v6 = vpop.f32.mrf.mxu3 }
 0xac8   :  { %v3781_v38 = vadd.f32 %v3763_v6, %v2880_v40 }
 0xaca   :  { %v3801_v7 = vadd.f32 %v6729_v8, %v3781_v38 }
 0xacc   :  { %3817 = vst.msk [vmem:[#allocation10 + $0x78] sm:$0xff] %vm111_vm0, %v3801_v7 }
 0xacd   :  { %3830 = dma.vmem_to_hbm [thread:$0]  %s3823_s7, 2048, %s3825_s10, [#allocation4], %s4680_s29, %s4680_s29, %s4681_s30  }
 0xace   :  { %4677 = dma.done.wait [#allocation4], 2048  }
 0xacf   :  { %4678 = vsyncadd [#allocation4], 4294965248 }
 0xad0   :  { %3835 = vsyncpa [#allocation3], 1 }
 0xad1   :  { %3836 = vsyncpa [#allocation6], 1 }
 0xad2   :  { %3837 = vsyncpa [#allocation9], 1 }
 0xad3   :  { %3838 = vsyncpa [#allocation4], 1 }

</bundles_post_ra>
